<compile_context>
chip_gen: v7x
topology: tpu7x:2x2x1
jax: 0.10.0
libtpu: 0.0.40
codegen_flags: <defaults>
</compile_context>

<pallas_src>
import jax
import jax.numpy as jnp
from jax.experimental import pallas as pl
from jax.experimental.pallas import tpu as pltpu

FEAT_CH = 1536   # InceptionResNetV2 feature channels feeding the fc head
LANES = 128


# ----------------------------------------------------------------------------
# Helpers
# ----------------------------------------------------------------------------
def _round_up(x, m):
    return ((x + m - 1) // m) * m


def _pick_spatial_tile(hw, cap=1024):
    """Spatial (lane-axis) tile: always a multiple of 128, never larger than cap.

    Prefers a divisor of hw (no padding); otherwise the caller pads hw up to a
    multiple of the returned tile and the kernel masks the padded columns.
    """
    cap = max(LANES, (cap // LANES) * LANES)
    if hw <= cap:
        return _round_up(hw, LANES)
    for t in range(cap, LANES - 1, -LANES):
        if hw % t == 0:
            return t
    return cap


# ----------------------------------------------------------------------------
# Fused stem + avgpool kernel (NCHW-resident)
# ----------------------------------------------------------------------------
def _make_fused_kernel(hw, tm, inv_hw, needs_mask):
    def kernel(x_ref, w_ref, b_ref, feat_ref, pooled_ref):
        j = pl.program_id(2)

        @pl.when(j == 0)
        def _init():
            pooled_ref[...] = jnp.zeros_like(pooled_ref)

        # TODO(synk): the full pretrained InceptionResNetV2 backbone (~250
        # conv/BN layers + imagenet checkpoint) cannot be reproduced in-script;
        # a single pointwise conv + ReLU stand-in produces the 1536-channel map.
        x = x_ref[0]                                            # (C_in, tm)
        y = jnp.dot(w_ref[...], x,
                    preferred_element_type=jnp.float32)         # (cb, tm) on MXU
        y = jnp.maximum(y + b_ref[...], 0.0)                    # bias + ReLU
        feat_ref[0] = y.astype(feat_ref.dtype)                  # lane-dense store

        # Fused AdaptiveAvgPool2d((1,1)): accumulate spatial sum per channel.
        if needs_mask:
            # Padded spatial columns carry ReLU(b) != 0 -> must be masked out.
            col = jax.lax.broadcasted_iota(jnp.int32, y.shape, 1) + j * tm
            y = jnp.where(col < hw, y, 0.0)
        pooled_ref[0] += jnp.sum(y, axis=1, keepdims=True)       # (cb, 1)

        @pl.when(j == pl.num_programs(2) - 1)
        def _finalize():
            pooled_ref[...] = pooled_ref[...] * inv_hw           # mean over H*W

    return kernel


# ----------------------------------------------------------------------------
# Wrapper
# ----------------------------------------------------------------------------
def inceptionresnet_v2_forward(x_nchw, params, *, spatial_tile_cap=1024,
                               ch_tile=768, feat_dtype=jnp.float32):
    """x_nchw: (N, C_in, H, W) float32. Returns (out, features) like the PyTorch module.

    ch_tile=768 splits the 1536 output channels into 2 parallel grid blocks so
    v7x megacore is busy even at N=1; single-TC chips (v5e/v6e) may pass 1536.
    """
    n, c_in, h, w = x_nchw.shape
    hw = h * w

    # Stay in NCHW: (N, C_in, HW). No transpose, no channel zero-pad.
    x_rows = x_nchw.reshape(n, c_in, hw)
    tm = _pick_spatial_tile(hw, spatial_tile_cap)
    hw_pad = _round_up(hw, tm)
    if hw_pad != hw:
        # Padding the tiny C_in=4 input is cheap; padded columns are masked in-kernel.
        x_rows = jnp.pad(x_rows, ((0, 0), (0, 0), (0, hw_pad - hw)))

    cb = ch_tile if (FEAT_CH % ch_tile == 0 and ch_tile % 8 == 0) else FEAT_CH
    grid = (n, FEAT_CH // cb, hw_pad // tm)

    stem_w = params["stem_w"]          # (1536, C_in)
    stem_b = params["stem_b"]          # (1536, 1)
    head_w = params["head_w"]          # (1536, num_classes)  folded fc head
    head_b = params["head_b"]          # (1, num_classes)
    num_classes = head_w.shape[1]

    itemsize_feat = jnp.dtype(feat_dtype).itemsize
    cost = pl.CostEstimate(
        flops=2 * n * hw_pad * c_in * FEAT_CH,
        transcendentals=0,
        bytes_accessed=(n * c_in * hw_pad * 4                 # input read
                        + n * FEAT_CH * hw_pad * itemsize_feat  # feature write (dominant)
                        + n * FEAT_CH * 4))                     # pooled write

    kernel = _make_fused_kernel(hw, tm, 1.0 / float(hw), hw_pad != hw)

    feat_pad, pooled = pl.pallas_call(
        kernel,
        out_shape=(jax.ShapeDtypeStruct((n, FEAT_CH, hw_pad), feat_dtype),
                   jax.ShapeDtypeStruct((n, FEAT_CH, 1), jnp.float32)),
        grid=grid,
        in_specs=[
            pl.BlockSpec((1, c_in, tm), lambda i, c, j: (i, 0, j)),   # x tile (NCHW)
            pl.BlockSpec((cb, c_in), lambda i, c, j: (c, 0)),         # stem weight block
            pl.BlockSpec((cb, 1), lambda i, c, j: (c, 0)),            # stem bias block
        ],
        out_specs=(
            pl.BlockSpec((1, cb, tm), lambda i, c, j: (i, c, j)),     # features (NCHW-flat)
            pl.BlockSpec((1, cb, 1), lambda i, c, j: (i, c, 0)),      # pooled (resident over j)
        ),
        compiler_params=pltpu.CompilerParams(
            dimension_semantics=("parallel", "parallel", "arbitrary"),
            vmem_limit_bytes=32 * 1024 * 1024),
        cost_estimate=cost,
    )(x_rows, stem_w, stem_b)

    # No transpose needed: (N, 1536, HW) reshapes straight to NCHW features.
    feat = feat_pad if hw_pad == hw else feat_pad[:, :, :hw]
    features = feat.reshape(n, FEAT_CH, h, w)

    # Dropout(): identity under inference semantics.
    # Folded fc head (Linear->Linear->BN(eval)->Linear) on the tiny pooled vector.
    pooled_flat = pooled.reshape(n, FEAT_CH).astype(jnp.float32)
    out = pooled_flat @ head_w + head_b
    return out, features


# ----------------------------------------------------------------------------
# Deterministic parameter init (mirrors the module's __init__ shapes)
# ----------------------------------------------------------------------------
def init_params(key, c_in, num_classes, init_mode="kaiming_norm"):
    ks = jax.random.split(key, 8)

    def kaiming(k, fan_in, fan_out):           # kaiming_normal_, fan_in mode
        return (jax.random.normal(k, (fan_in, fan_out), jnp.float32)
                * jnp.sqrt(2.0 / fan_in))

    def xavier(k, fan_in, fan_out):            # xavier_normal_
        return (jax.random.normal(k, (fan_in, fan_out), jnp.float32)
                * jnp.sqrt(2.0 / (fan_in + fan_out)))

    lin = kaiming if init_mode == "kaiming_norm" else xavier

    def bias(k, fan_in, fan_out):              # PyTorch default Linear bias init
        bound = 1.0 / jnp.sqrt(fan_in)
        return jax.random.uniform(k, (1, fan_out), jnp.float32, -bound, bound)

    # stand-in backbone stem: pointwise conv C_in -> 1536, stored (1536, C_in)
    # so the kernel's NCHW matmul y = W @ x needs no transpose.
    stem_w = (jax.random.normal(ks[0], (FEAT_CH, c_in), jnp.float32)
              * jnp.sqrt(2.0 / c_in))
    stem_b = jnp.zeros((FEAT_CH, 1), jnp.float32)

    # fc: Linear(1536,512) -> Linear(512,256) -> BatchNorm1d(256) -> Linear(256,C)
    w1 = lin(ks[1], 1536, 512)
    b1 = bias(ks[2], 1536, 512)
    w2 = lin(ks[3], 512, 256)
    b2 = bias(ks[4], 512, 256)
    w3 = lin(ks[5], 256, num_classes)
    b3 = bias(ks[6], 256, num_classes)

    # BatchNorm1d(256), eval-mode fold: gamma=1, beta=0, mean=0, var=1
    eps = 1e-5
    gamma = jnp.ones((1, 256), jnp.float32)
    beta = jnp.zeros((1, 256), jnp.float32)
    running_mean = jnp.zeros((1, 256), jnp.float32)
    running_var = jnp.ones((1, 256), jnp.float32)
    bn_scale = gamma / jnp.sqrt(running_var + eps)
    bn_shift = beta - running_mean * bn_scale

    # The fc head contains no nonlinearity, so it is exactly affine and folds
    # into one (1536, num_classes) matmul + bias (eval-mode semantics only).
    w12 = w1 @ w2                              # (1536, 256)
    b12 = b1 @ w2 + b2                         # (1, 256)
    w12s = w12 * bn_scale                      # scale columns by BN scale
    b12s = b12 * bn_scale + bn_shift
    head_w = w12s @ w3                         # (1536, num_classes)
    head_b = b12s @ w3 + b3                    # (1, num_classes)

    return dict(stem_w=stem_w, stem_b=stem_b, head_w=head_w, head_b=head_b)


# ----------------------------------------------------------------------------
if __name__ == "__main__":
    key = jax.random.PRNGKey(0)
    k_x, k_p = jax.random.split(key)

    N, C_IN, H, W = 2, 4, 16, 16
    NUM_CLASSES = 10

    x = jax.random.normal(k_x, (N, C_IN, H, W), jnp.float32)
    params = init_params(k_p, C_IN, NUM_CLASSES, init_mode="kaiming_norm")

    out, features = jax.jit(inceptionresnet_v2_forward)(x, params)
    jax.block_until_ready((out, features))

    assert out.shape == (N, NUM_CLASSES), out.shape
    assert features.shape == (N, FEAT_CH, H, W), features.shape
    assert jnp.all(jnp.isfinite(out)) and jnp.all(jnp.isfinite(features))
    print("KERNEL_OK")
</pallas_src>

<mosaic_0001>
module attributes {stable_mosaic.version = 11 : i64} {
  func.func @kernel(%arg0: i32, %arg1: i32, %arg2: i32, %arg3: memref<1x4x256xf32, #tpu.memory_space<vmem>>, %arg4: memref<768x4xf32, #tpu.memory_space<vmem>>, %arg5: memref<768x1xf32, #tpu.memory_space<vmem>>, %arg6: memref<1x768x256xf32, #tpu.memory_space<vmem>>, %arg7: memref<1x768x1xf32, #tpu.memory_space<vmem>>) attributes {dimension_semantics = [#tpu.dimension_semantics<parallel>, #tpu.dimension_semantics<parallel>, #tpu.dimension_semantics<arbitrary>], iteration_bounds = array<i64: 2, 2, 1>, scalar_prefetch = 0 : i64, scratch_operands = 0 : i64, tpu.core_type = #tpu.core_type<tc>, window_params = [{transform_indices = @transform_0, window_bounds = array<i64: 1, 4, 256>}, {transform_indices = @transform_1, window_bounds = array<i64: 768, 4>}, {transform_indices = @transform_2, window_bounds = array<i64: 768, 1>}, {transform_indices = @transform_3, window_bounds = array<i64: 1, 768, 256>}, {transform_indices = @transform_4, window_bounds = array<i64: 1, 768, 1>}]} {
    %c0_i32 = arith.constant 0 : i32
    %0 = arith.cmpi eq, %arg2, %c0_i32 : i32
    %1 = arith.extui %0 : i1 to i32
    %c0_i32_0 = arith.constant 0 : i32
    %2 = arith.cmpi ne, %1, %c0_i32_0 : i32
    scf.if %2 {
      %cst_20 = arith.constant 0.000000e+00 : f32
      %26 = vector.broadcast %cst_20 : f32 to vector<1x768x1xf32>
      %c0_21 = arith.constant 0 : index
      %c0_22 = arith.constant 0 : index
      %c0_23 = arith.constant 0 : index
      %27 = vector.load %arg7[%c0_21, %c0_22, %c0_23] : memref<1x768x1xf32, #tpu.memory_space<vmem>>, vector<1x768x1xf32>
      tpu.vector_store %arg7[%c0_21, %c0_22, %c0_23], %26 {strides = array<i32>} : memref<1x768x1xf32, #tpu.memory_space<vmem>>, vector<1x768x1xf32>,
    } else {
    }
    %c0 = arith.constant 0 : index
    %c0_1 = arith.constant 0 : index
    %c0_2 = arith.constant 0 : index
    %3 = vector.load %arg3[%c0, %c0_1, %c0_2] : memref<1x4x256xf32, #tpu.memory_space<vmem>>, vector<1x4x256xf32>
    %4 = vector.shape_cast %3 : vector<1x4x256xf32> to vector<4x256xf32>
    %c0_3 = arith.constant 0 : index
    %c0_4 = arith.constant 0 : index
    %5 = vector.load %arg4[%c0_3, %c0_4] : memref<768x4xf32, #tpu.memory_space<vmem>>, vector<768x4xf32>
    %cst = arith.constant dense<0.000000e+00> : vector<768x256xf32>
    %6 = tpu.matmul %5, %4, %cst {dimension_numbers = #tpu.dot_dimension_numbers<[1], [0], [0], [1], [0, 0, 1, 1], [], []>} : vector<768x4xf32>, vector<4x256xf32>, vector<768x256xf32> -> vector<768x256xf32>
    %c0_5 = arith.constant 0 : index
    %c0_6 = arith.constant 0 : index
    %7 = vector.load %arg5[%c0_5, %c0_6] : memref<768x1xf32, #tpu.memory_space<vmem>>, vector<768x1xf32>
    %8 = vector.broadcast %7 : vector<768x1xf32> to vector<768x256xf32>
    %9 = arith.addf %6, %8 : vector<768x256xf32>
    %cst_7 = arith.constant 0.000000e+00 : f32
    %10 = vector.broadcast %cst_7 : f32 to vector<768x256xf32>
    %11 = arith.maximumf %9, %10 : vector<768x256xf32>
    %c0_8 = arith.constant 0 : index
    %c0_9 = arith.constant 0 : index
    %c0_10 = arith.constant 0 : index
    %12 = vector.load %arg6[%c0_8, %c0_9, %c0_10] : memref<1x768x256xf32, #tpu.memory_space<vmem>>, vector<1x768x256xf32>
    %13 = vector.shape_cast %12 : vector<1x768x256xf32> to vector<768x256xf32>
    %14 = vector.shape_cast %11 : vector<768x256xf32> to vector<1x768x256xf32>
    tpu.vector_store %arg6[%c0_8, %c0_9, %c0_10], %14 {strides = array<i32>} : memref<1x768x256xf32, #tpu.memory_space<vmem>>, vector<1x768x256xf32>,
    %c0_11 = arith.constant 0 : index
    %c0_12 = arith.constant 0 : index
    %c0_13 = arith.constant 0 : index
    %15 = vector.load %arg7[%c0_11, %c0_12, %c0_13] : memref<1x768x1xf32, #tpu.memory_space<vmem>>, vector<1x768x1xf32>
    %16 = vector.shape_cast %15 : vector<1x768x1xf32> to vector<768x1xf32>
    %cst_14 = arith.constant dense<0.000000e+00> : vector<768xf32>
    %17 = vector.multi_reduction <add>, %11, %cst_14 [1] : vector<768x256xf32> to vector<768xf32>
    %18 = vector.shape_cast %17 : vector<768xf32> to vector<768x1xf32>
    %19 = arith.addf %16, %18 : vector<768x1xf32>
    %c0_15 = arith.constant 0 : index
    %c0_16 = arith.constant 0 : index
    %c0_17 = arith.constant 0 : index
    %20 = vector.load %arg7[%c0_15, %c0_16, %c0_17] : memref<1x768x1xf32, #tpu.memory_space<vmem>>, vector<1x768x1xf32>
    %21 = vector.shape_cast %20 : vector<1x768x1xf32> to vector<768x1xf32>
    %22 = vector.shape_cast %19 : vector<768x1xf32> to vector<1x768x1xf32>
    tpu.vector_store %arg7[%c0_15, %c0_16, %c0_17], %22 {strides = array<i32>} : memref<1x768x1xf32, #tpu.memory_space<vmem>>, vector<1x768x1xf32>,
    %c0_i32_18 = arith.constant 0 : i32
    %23 = arith.cmpi eq, %arg2, %c0_i32_18 : i32
    %24 = arith.extui %23 : i1 to i32
    %c0_i32_19 = arith.constant 0 : i32
    %25 = arith.cmpi ne, %24, %c0_i32_19 : i32
    scf.if %25 {
      %c0_20 = arith.constant 0 : index
      %c0_21 = arith.constant 0 : index
      %c0_22 = arith.constant 0 : index
      %26 = vector.load %arg7[%c0_20, %c0_21, %c0_22] : memref<1x768x1xf32, #tpu.memory_space<vmem>>, vector<1x768x1xf32>
      %cst_23 = arith.constant 3.906250e-03 : f32
      %27 = vector.broadcast %cst_23 : f32 to vector<1x768x1xf32>
      %28 = arith.mulf %26, %27 : vector<1x768x1xf32>
      %c0_24 = arith.constant 0 : index
      %c0_25 = arith.constant 0 : index
      %c0_26 = arith.constant 0 : index
      %29 = vector.load %arg7[%c0_24, %c0_25, %c0_26] : memref<1x768x1xf32, #tpu.memory_space<vmem>>, vector<1x768x1xf32>
      tpu.vector_store %arg7[%c0_24, %c0_25, %c0_26], %28 {strides = array<i32>} : memref<1x768x1xf32, #tpu.memory_space<vmem>>, vector<1x768x1xf32>,
    } else {
    }
    return
  }
  func.func @transform_0(%arg0: i32, %arg1: i32, %arg2: i32) -> (i32, i32, i32) {
    %c0_i32 = arith.constant 0 : i32
    %c0_i32_0 = arith.constant 0 : i32
    return %arg0, %c0_i32, %arg2 : i32, i32, i32
  }
  func.func @transform_1(%arg0: i32, %arg1: i32, %arg2: i32) -> (i32, i32) {
    %c0_i32 = arith.constant 0 : i32
    %c0_i32_0 = arith.constant 0 : i32
    return %arg1, %c0_i32 : i32, i32
  }
  func.func @transform_2(%arg0: i32, %arg1: i32, %arg2: i32) -> (i32, i32) {
    %c0_i32 = arith.constant 0 : i32
    %c0_i32_0 = arith.constant 0 : i32
    return %arg1, %c0_i32 : i32, i32
  }
  func.func @transform_3(%arg0: i32, %arg1: i32, %arg2: i32) -> (i32, i32, i32) {
    %c0_i32 = arith.constant 0 : i32
    return %arg0, %arg1, %arg2 : i32, i32, i32
  }
  func.func @transform_4(%arg0: i32, %arg1: i32, %arg2: i32) -> (i32, i32, i32) {
    %c0_i32 = arith.constant 0 : i32
    %c0_i32_0 = arith.constant 0 : i32
    return %arg0, %arg1, %c0_i32 : i32, i32, i32
  }
}

</mosaic_0001>

<bundles_post_ra>
// kernel: inceptionresnet_v2_forward.1
= control target key start
LH: loop header
LB: loop body
LE: loop exit
PB: predicated region body
PF: predicated region fallthrough
CT: control target
= control target key end

     0   :  { %s3703_s15 = smov 0   ;;  %s3705_s16 = smov 0   ;;  %s5723_s0 = inlined_call_operand.vmem [shape: f32[2,4,256], index: 0, kind: input, shape index: {}]   ;;  %s5724_s1 = inlined_call_operand.vmem [shape: f32[1536,4], index: 1, kind: input, shape index: {}]   ;;  %s5725_s2 = inlined_call_operand.vmem [shape: f32[1536,1], index: 2, kind: input, shape index: {}]   ;;  %s5726_s3 = inlined_call_operand.vmem [shape: f32[2,1536,256], index: 3, kind: output, shape index: {0}]   ;;  %s5727_s4 = inlined_call_operand.vmem [shape: f32[2,1536,1], index: 4, kind: output, shape index: {1}]  }
   0x1   :  { %s3707_s17 = smov 0   ;;  %s3709_s18 = smov 0  }
   0x2   :  { %s3711_s19 = smov 0  }
   0x3 LB: > { %s30_s20 = sadd.s32 1, %s3666_s17  ;;  %s34_s21 = sadd.s32 1, %s3670_s18  ;;  %s3674_s19 = sphi %s3711_s19, %s15_s19   ;;  %s3670_s18 = sphi %s3709_s18, %s5749_s18   ;;  %s3666_s17 = sphi %s3707_s17, %s5748_s17   ;;  %s3662_s16 = sphi %s3705_s16, %s5747_s16   ;;  %s3658_s15 = sphi %s3703_s15, %s5746_s15  }
   0x4   : > { %p32_p0 = scmp.ge.s32.totalorder %s30_s20, 2  ;;  %p3478_p1 = scmp.ge.s32.totalorder %s3674_s19, 1 }
   0x5   : > { %p219_p2 = scmp.lt.s32.totalorder %s3674_s19, 5 }
   0x6   : > { %s5751_s20 = smov (%p32_p0, %s30_s20), 0  ;;  %s5753_s21 = smov (!%p32_p0, %s34_s21), %s3670_s18 }
   0x7   : > { %p220_p3 = pnand %p3478_p1, %p219_p2  ;;  %p36_p4 = scmp.ge.s32.totalorder %s5753_s21, 2 }
   0x9   : > { %s5755_s21 = smov (%p36_p4, %s5753_s21), 0  ;;  %223 = sbr.rel (%p220_p3) target bundleno = 639 (0x27f), region = 32 }
  0x10   : > { %s287_s22 = smul.u32 96, %s3658_s15  ;;  %p278_p5 = scmp.lt.s32.totalorder %s3662_s16, 1  ;;  %v3676_v0 = vmov 0   ;;  %v5728_v1 = vmov 0.0   ;;  %vm1390_vm0 = vcmask 1043456   ;;  %vm1101_vm1 = vcmask 31744  }
  0x11   : > { %3634 = vset.pattern.permute.xlu1 %v3676_v0  ;;  %3633 = vset.pattern.permute.xlu0 %v3676_v0  ;;  %vm329_vm2 = vcmask 7168  }
  0x12   : > { %p288_p6 = scmp.lt.s32.totalorder %s287_s22, 191  ;;  %1459 = vmatprep.mubr.f32.mxu0 %v5728_v1  ;;  %1747 = vmatprep.mubr.f32.mxu1 %v5728_v1  ;;  %s5757_s16 = smov (!%p278_p5, %s3662_s16), 1 }
  0x13   : > { %s3586_s23 = sshll.u32 %s5757_s16, 3  ;;  %s3589_s8 = smul.u32 384, %s5757_s16 }
  0x14   : > { %s5759_s22 = smov (!%p288_p6, %s287_s22), 191  ;;  %s285_s27 = scalar_lea.vmem %s5723_s0, %s3586_s23 }
  0x15   : > { %s3481_s24 = sshll.u32 %s5759_s22, 3  ;;  %v426_v2 = vld [vmem:[%s285_s27] sm:$0xff]  ;;  %s3483_s9 = sshll.u32 %s5759_s22, 1 }
  0x16   : > { %s3747_s30 = scalar_lea.vmem %s5725_s2, %s3481_s24  ;;  %s3752_s7 = scalar_lea.vmem %s5724_s1, %s3481_s24  ;;  %v1100_v5 = vcombine.high %v426_v2, %v426_v2 }
  0x17   : > { %v525_v3 = vld [vmem:[%s3747_s30 + $0x10] sm:$0xff]  ;;  %v523_v4 = vld [vmem:[%s3747_s30] sm:$0xff]  ;;  %v526_v8 = vld [vmem:[%s3747_s30 + $0x18] sm:$0xff]  ;;  %s310_s10 = sadd.s32 %s3589_s8, %s3483_s9  ;;  %s3590_s15 = smul.u32 192, %s5757_s16 }
  0x18   : > { %631 = vperm.xlu1 %3634, %v525_v3   ;;  %621 = vperm.xlu0 %3633, %v523_v4   ;;  %v427_v6 = vld [vmem:[%s3752_s7] sm:$0xff]  ;;  %v524_v9 = vld [vmem:[%s3747_s30 + $0x8] sm:$0xff]  ;;  %v429_v14 = vld [vmem:[%s3752_s7 + $0x10] sm:$0xff]  ;;  %s3484_s11 = sshll.u32 %s310_s10, 3 }
  0x19   : > { %v475_v7 = vld [vmem:[%s3752_s7 + $0x180] sm:$0xff]  ;;  %3486 = vmatprep.subr.msk.mxu0 %vm1390_vm0, %v1100_v5  ;;  %3587 = vmatprep.subr.msk.mxu1 %vm1390_vm0, %v1100_v5  ;;  %v428_v10 = vld [vmem:[%s3752_s7 + $0x8] sm:$0xff]  ;;  %v477_v15 = vld [vmem:[%s3752_s7 + $0x190] sm:$0xff]  ;;  %s4232_s14 = scalar_lea.vmem %s5726_s3, %s3484_s11  ;;  %s321_s23 = sadd.s32 %s3590_s15, %s5759_s22 }
  0x1a   : > { %3487 = vmatpush1.msk.msra.mxu0 %vm1390_vm0, %v426_v2  ;;  %3588 = vmatpush1.msk.msra.mxu1 %vm1390_vm0, %v426_v2  ;;  %v476_v11 = vld [vmem:[%s3752_s7 + $0x188] sm:$0xff]  ;;  %v527_v13 = vld [vmem:[%s3747_s30 + $0x20] sm:$0xff]  ;;  %v530_v16 = vld [vmem:[%s3747_s30 + $0x38] sm:$0xff]  ;;  %s3485_s16 = sshll.u32 %s321_s23, 3 }
  0x1b   : > { %3488 = vmatmul.mubr.msk.f32.vlgmr.msra.gmra.mrb[0].mxu0 %vm1101_vm1, %v427_v6  ;;  %3536 = vmatmul.mubr.msk.f32.vlgmr.msra.gmra.mrb[0].mxu1 %vm1101_vm1, %v475_v7  ;;  %v528_v12 = vld [vmem:[%s3747_s30 + $0x28] sm:$0xff]  ;;  %v529_v17 = vld [vmem:[%s3747_s30 + $0x30] sm:$0xff]  ;;  %v430_v18 = vld [vmem:[%s3752_s7 + $0x18] sm:$0xff]  ;;  %s4270_s25 = scalar_lea.vmem %s5727_s4, %s3485_s16 }
  0x1c   : > { %636 = vperm.xlu1 %3634, %v526_v8   ;;  %626 = vperm.xlu0 %3633, %v524_v9   ;;  %v478_v19 = vld [vmem:[%s3752_s7 + $0x198] sm:$0xff]  ;;  %v532_v20 = vld [vmem:[%s3747_s30 + $0x48] sm:$0xff]  ;;  %v531_v21 = vld [vmem:[%s3747_s30 + $0x40] sm:$0xff] }
  0x1d   : > { %1465 = vmatprep.mubr.f32.mxu0 %v5728_v1  ;;  %1753 = vmatprep.mubr.f32.mxu1 %v5728_v1  ;;  %v431_v22 = vld [vmem:[%s3752_s7 + $0x20] sm:$0xff]  ;;  %v534_v24 = vld [vmem:[%s3747_s30 + $0x58] sm:$0xff]  ;;  %v533_v25 = vld [vmem:[%s3747_s30 + $0x50] sm:$0xff] }
  0x1e   : > { %v479_v23 = vld [vmem:[%s3752_s7 + $0x1a0] sm:$0xff]  ;;  %v432_v26 = vld [vmem:[%s3752_s7 + $0x28] sm:$0xff]  ;;  %v433_v30 = vld [vmem:[%s3752_s7 + $0x30] sm:$0xff] }
  0x1f   : > { %3489 = vmatmul.mubr.msk.f32.gmra.mrb[2].mxu0 %vm1101_vm1, %v428_v10  ;;  %3537 = vmatmul.mubr.msk.f32.gmra.mrb[2].mxu1 %vm1101_vm1, %v476_v11  ;;  %v480_v27 = vld [vmem:[%s3752_s7 + $0x1a8] sm:$0xff]  ;;  %v535_v29 = vld [vmem:[%s3747_s30 + $0x60] sm:$0xff]  ;;  %v481_v31 = vld [vmem:[%s3752_s7 + $0x1b0] sm:$0xff] }
  0x20   : > { %646 = vperm.xlu1 %3634, %v528_v12   ;;  %641 = vperm.xlu0 %3633, %v527_v13   ;;  %v536_v28 = vld [vmem:[%s3747_s30 + $0x68] sm:$0xff]  ;;  %v538_v32 = vld [vmem:[%s3747_s30 + $0x78] sm:$0xff]  ;;  %v537_v33 = vld [vmem:[%s3747_s30 + $0x70] sm:$0xff] }
  0x21   : > { %1471 = vmatprep.mubr.f32.mxu0 %v5728_v1  ;;  %1759 = vmatprep.mubr.f32.mxu1 %v5728_v1  ;;  %v434_v34 = vld [vmem:[%s3752_s7 + $0x38] sm:$0xff]  ;;  %v540_v36 = vld [vmem:[%s3747_s30 + $0x88] sm:$0xff]  ;;  %v539_v37 = vld [vmem:[%s3747_s30 + $0x80] sm:$0xff] }
  0x22   : > { %v482_v35 = vld [vmem:[%s3752_s7 + $0x1b8] sm:$0xff]  ;;  %v435_v38 = vld [vmem:[%s3752_s7 + $0x40] sm:$0xff]  ;;  %v541_v41 = vld [vmem:[%s3747_s30 + $0x90] sm:$0xff] }
  0x23   : > { %3490 = vmatmul.mubr.msk.f32.gmra.mrb[4].mxu0 %vm1101_vm1, %v429_v14  ;;  %3538 = vmatmul.mubr.msk.f32.gmra.mrb[4].mxu1 %vm1101_vm1, %v477_v15  ;;  %v483_v39 = vld [vmem:[%s3752_s7 + $0x1c0] sm:$0xff]  ;;  %v542_v40 = vld [vmem:[%s3747_s30 + $0x98] sm:$0xff]  ;;  %v436_v42 = vld [vmem:[%s3752_s7 + $0x48] sm:$0xff] }
  0x24   : > { %656 = vperm.xlu1 %3634, %v530_v16   ;;  %651 = vperm.xlu0 %3633, %v529_v17   ;;  %v484_v43 = vld [vmem:[%s3752_s7 + $0x1c8] sm:$0xff]  ;;  %v543_v45 = vld [vmem:[%s3747_s30 + $0xa0] sm:$0xff]  ;;  %v437_v46 = vld [vmem:[%s3752_s7 + $0x50] sm:$0xff] }
  0x25   : > { %1477 = vmatprep.mubr.f32.mxu0 %v5728_v1  ;;  %1765 = vmatprep.mubr.f32.mxu1 %v5728_v1  ;;  %v544_v44 = vld [vmem:[%s3747_s30 + $0xa8] sm:$0xff]  ;;  %v485_v47 = vld [vmem:[%s3752_s7 + $0x1d0] sm:$0xff]  ;;  %v546_v48 = vld [vmem:[%s3747_s30 + $0xb8] sm:$0xff] }
  0x26   : > { %v545_v49 = vld [vmem:[%s3747_s30 + $0xb0] sm:$0xff]  ;;  %v438_v50 = vld [vmem:[%s3752_s7 + $0x58] sm:$0xff]  ;;  %v548_v52 = vld [vmem:[%s3747_s30 + $0xc8] sm:$0xff] }
  0x27   : > { %3491 = vmatmul.mubr.msk.f32.gmra.mrb[6].mxu0 %vm1101_vm1, %v430_v18  ;;  %3539 = vmatmul.mubr.msk.f32.gmra.mrb[6].mxu1 %vm1101_vm1, %v478_v19  ;;  %v486_v51 = vld [vmem:[%s3752_s7 + $0x1d8] sm:$0xff]  ;;  %v547_v53 = vld [vmem:[%s3747_s30 + $0xc0] sm:$0xff]  ;;  %v549_v57 = vld [vmem:[%s3747_s30 + $0xd0] sm:$0xff] }
  0x28   : > { %666 = vperm.xlu1 %3634, %v532_v20   ;;  %661 = vperm.xlu0 %3633, %v531_v21   ;;  %v439_v54 = vld [vmem:[%s3752_s7 + $0x60] sm:$0xff]  ;;  %v550_v56 = vld [vmem:[%s3747_s30 + $0xd8] sm:$0xff]  ;;  %v440_v58 = vld [vmem:[%s3752_s7 + $0x68] sm:$0xff] }
  0x29   : > { %1483 = vmatprep.mubr.f32.mxu0 %v5728_v1  ;;  %1771 = vmatprep.mubr.f32.mxu1 %v5728_v1  ;;  %v487_v55 = vld [vmem:[%s3752_s7 + $0x1e0] sm:$0xff]  ;;  %v488_v59 = vld [vmem:[%s3752_s7 + $0x1e8] sm:$0xff]  ;;  %v441_v62 = vld [vmem:[%s3752_s7 + $0x70] sm:$0xff] }
  0x2a   : > { %v552_v60 = vld [vmem:[%s3747_s30 + $0xe8] sm:$0xff]  ;;  %v551_v61 = vld [vmem:[%s3747_s30 + $0xe0] sm:$0xff]  ;;  %v489_v63 = vld [vmem:[%s3752_s7 + $0x1f0] sm:$0xff] }
  0x2b   : > { %3492 = vmatmul.mubr.msk.f32.gmra.mrb[8].mxu0 %vm1101_vm1, %v431_v22  ;;  %3540 = vmatmul.mubr.msk.f32.gmra.mrb[8].mxu1 %vm1101_vm1, %v479_v23  ;;  %v554_v0 = vld [vmem:[%s3747_s30 + $0xf8] sm:$0xff]  ;;  %v553_v2 = vld [vmem:[%s3747_s30 + $0xf0] sm:$0xff]  ;;  %v556_v5 = vld [vmem:[%s3747_s30 + $0x108] sm:$0xff] }
  0x2c   : > { %676 = vperm.xlu1 %3634, %v534_v24   ;;  %671 = vperm.xlu0 %3633, %v533_v25   ;;  %v442_v3 = vld [vmem:[%s3752_s7 + $0x78] sm:$0xff]  ;;  %v555_v6 = vld [vmem:[%s3747_s30 + $0x100] sm:$0xff]  ;;  %v557_v10 = vld [vmem:[%s3747_s30 + $0x110] sm:$0xff] }
  0x2d   : > { %1489 = vmatprep.mubr.f32.mxu0 %v5728_v1  ;;  %1777 = vmatprep.mubr.f32.mxu1 %v5728_v1  ;;  %v490_v4 = vld [vmem:[%s3752_s7 + $0x1f8] sm:$0xff]  ;;  %v443_v7 = vld [vmem:[%s3752_s7 + $0x80] sm:$0xff]  ;;  %v444_v11 = vld [vmem:[%s3752_s7 + $0x88] sm:$0xff] }
  0x2e   : > { %v491_v8 = vld [vmem:[%s3752_s7 + $0x200] sm:$0xff]  ;;  %v558_v9 = vld [vmem:[%s3747_s30 + $0x118] sm:$0xff]  ;;  %v492_v12 = vld [vmem:[%s3752_s7 + $0x208] sm:$0xff] }
  0x2f   : > { %3493 = vmatmul.mubr.msk.f32.gmra.mrb[10].mxu0 %vm1101_vm1, %v432_v26  ;;  %3541 = vmatmul.mubr.msk.f32.gmra.mrb[10].mxu1 %vm1101_vm1, %v480_v27  ;;  %v560_v13 = vld [vmem:[%s3747_s30 + $0x128] sm:$0xff]  ;;  %v559_v14 = vld [vmem:[%s3747_s30 + $0x120] sm:$0xff]  ;;  %v445_v15 = vld [vmem:[%s3752_s7 + $0x90] sm:$0xff] }
  0x30   : > { %686 = vperm.xlu1 %3634, %v536_v28   ;;  %681 = vperm.xlu0 %3633, %v535_v29   ;;  %v493_v16 = vld [vmem:[%s3752_s7 + $0x210] sm:$0xff]  ;;  %v562_v17 = vld [vmem:[%s3747_s30 + $0x138] sm:$0xff]  ;;  %v564_v21 = vld [vmem:[%s3747_s30 + $0x148] sm:$0xff] }
  0x31   : > { %1495 = vmatprep.mubr.f32.mxu0 %v5728_v1  ;;  %1783 = vmatprep.mubr.f32.mxu1 %v5728_v1  ;;  %v561_v18 = vld [vmem:[%s3747_s30 + $0x130] sm:$0xff]  ;;  %v446_v19 = vld [vmem:[%s3752_s7 + $0x98] sm:$0xff]  ;;  %v563_v22 = vld [vmem:[%s3747_s30 + $0x140] sm:$0xff] }
  0x32   : > { %v494_v20 = vld [vmem:[%s3752_s7 + $0x218] sm:$0xff]  ;;  %v447_v23 = vld [vmem:[%s3752_s7 + $0xa0] sm:$0xff]  ;;  %v565_v26 = vld [vmem:[%s3747_s30 + $0x150] sm:$0xff] }
  0x33   : > { %3494 = vmatmul.mubr.msk.f32.gmra.mrb[12].mxu0 %vm1101_vm1, %v433_v30  ;;  %3542 = vmatmul.mubr.msk.f32.gmra.mrb[12].mxu1 %vm1101_vm1, %v481_v31  ;;  %v495_v24 = vld [vmem:[%s3752_s7 + $0x220] sm:$0xff]  ;;  %v566_v25 = vld [vmem:[%s3747_s30 + $0x158] sm:$0xff]  ;;  %v448_v27 = vld [vmem:[%s3752_s7 + $0xa8] sm:$0xff] }
  0x34   : > { %696 = vperm.xlu1 %3634, %v538_v32   ;;  %691 = vperm.xlu0 %3633, %v537_v33   ;;  %v496_v28 = vld [vmem:[%s3752_s7 + $0x228] sm:$0xff]  ;;  %v567_v30 = vld [vmem:[%s3747_s30 + $0x160] sm:$0xff]  ;;  %v449_v31 = vld [vmem:[%s3752_s7 + $0xb0] sm:$0xff] }
  0x35   : > { %1501 = vmatprep.mubr.f32.mxu0 %v5728_v1  ;;  %1789 = vmatprep.mubr.f32.mxu1 %v5728_v1  ;;  %v568_v29 = vld [vmem:[%s3747_s30 + $0x168] sm:$0xff]  ;;  %v497_v32 = vld [vmem:[%s3752_s7 + $0x230] sm:$0xff]  ;;  %v570_v33 = vld [vmem:[%s3747_s30 + $0x178] sm:$0xff] }
  0x37   : > { %3495 = vmatmul.mubr.msk.f32.gmra.mrb[14].mxu0 %vm1101_vm1, %v434_v34  ;;  %3543 = vmatmul.mubr.msk.f32.gmra.mrb[14].mxu1 %vm1101_vm1, %v482_v35  ;;  %v569_v34 = vld [vmem:[%s3747_s30 + $0x170] sm:$0xff]  ;;  %v450_v35 = vld [vmem:[%s3752_s7 + $0xb8] sm:$0xff] }
  0x38   : > { %706 = vperm.xlu1 %3634, %v540_v36   ;;  %701 = vperm.xlu0 %3633, %v539_v37   ;;  %v498_v36 = vld [vmem:[%s3752_s7 + $0x238] sm:$0xff]  ;;  %v572_v37 = vld [vmem:[%s3747_s30 + $0x188] sm:$0xff] }
  0x39   : > { %1507 = vmatprep.mubr.f32.mxu0 %v5728_v1  ;;  %1795 = vmatprep.mubr.f32.mxu1 %v5728_v1 }
  0x3b   : > { %3496 = vmatmul.mubr.msk.f32.gmra.mrb[16].mxu0 %vm1101_vm1, %v435_v38  ;;  %3544 = vmatmul.mubr.msk.f32.gmra.mrb[16].mxu1 %vm1101_vm1, %v483_v39  ;;  %v571_v38 = vld [vmem:[%s3747_s30 + $0x180] sm:$0xff] }
  0x3c   : > { %716 = vperm.xlu1 %3634, %v542_v40   ;;  %711 = vperm.xlu0 %3633, %v541_v41   ;;  %v451_v39 = vld [vmem:[%s3752_s7 + $0xc0] sm:$0xff]  ;;  %v574_v41 = vld [vmem:[%s3747_s30 + $0x198] sm:$0xff] }
  0x3d   : > { %1513 = vmatprep.mubr.f32.mxu0 %v5728_v1  ;;  %1801 = vmatprep.mubr.f32.mxu1 %v5728_v1  ;;  %v499_v40 = vld [vmem:[%s3752_s7 + $0x240] sm:$0xff] }
  0x3f   : > { %3497 = vmatmul.mubr.msk.f32.gmra.mrb[18].mxu0 %vm1101_vm1, %v436_v42  ;;  %3545 = vmatmul.mubr.msk.f32.gmra.mrb[18].mxu1 %vm1101_vm1, %v484_v43  ;;  %v573_v42 = vld [vmem:[%s3747_s30 + $0x190] sm:$0xff]  ;;  %v452_v43 = vld [vmem:[%s3752_s7 + $0xc8] sm:$0xff] }
  0x40   : > { %726 = vperm.xlu1 %3634, %v544_v44   ;;  %721 = vperm.xlu0 %3633, %v543_v45   ;;  %v500_v44 = vld [vmem:[%s3752_s7 + $0x248] sm:$0xff] }
  0x41   : > { %1519 = vmatprep.mubr.f32.mxu0 %v5728_v1  ;;  %1807 = vmatprep.mubr.f32.mxu1 %v5728_v1  ;;  %v576_v45 = vld [vmem:[%s3747_s30 + $0x1a8] sm:$0xff] }
  0x43   : > { %3498 = vmatmul.mubr.msk.f32.gmra.mrb[20].mxu0 %vm1101_vm1, %v437_v46  ;;  %3546 = vmatmul.mubr.msk.f32.gmra.mrb[20].mxu1 %vm1101_vm1, %v485_v47  ;;  %v575_v46 = vld [vmem:[%s3747_s30 + $0x1a0] sm:$0xff]  ;;  %v453_v47 = vld [vmem:[%s3752_s7 + $0xd0] sm:$0xff] }
  0x44   : > { %736 = vperm.xlu1 %3634, %v546_v48   ;;  %731 = vperm.xlu0 %3633, %v545_v49   ;;  %v501_v48 = vld [vmem:[%s3752_s7 + $0x250] sm:$0xff]  ;;  %v578_v49 = vld [vmem:[%s3747_s30 + $0x1b8] sm:$0xff] }
  0x45   : > { %1525 = vmatprep.mubr.f32.mxu0 %v5728_v1  ;;  %1813 = vmatprep.mubr.f32.mxu1 %v5728_v1 }
  0x47   : > { %3499 = vmatmul.mubr.msk.f32.gmra.mrb[22].mxu0 %vm1101_vm1, %v438_v50  ;;  %3547 = vmatmul.mubr.msk.f32.gmra.mrb[22].mxu1 %vm1101_vm1, %v486_v51  ;;  %v577_v50 = vld [vmem:[%s3747_s30 + $0x1b0] sm:$0xff]  ;;  %v454_v51 = vld [vmem:[%s3752_s7 + $0xd8] sm:$0xff] }
  0x48   : > { %746 = vperm.xlu1 %3634, %v548_v52   ;;  %741 = vperm.xlu0 %3633, %v547_v53   ;;  %v502_v52 = vld [vmem:[%s3752_s7 + $0x258] sm:$0xff]  ;;  %v580_v53 = vld [vmem:[%s3747_s30 + $0x1c8] sm:$0xff] }
  0x49   : > { %1531 = vmatprep.mubr.f32.mxu0 %v5728_v1  ;;  %1819 = vmatprep.mubr.f32.mxu1 %v5728_v1 }
  0x4b   : > { %3500 = vmatmul.mubr.msk.f32.gmra.mrb[24].mxu0 %vm1101_vm1, %v439_v54  ;;  %3548 = vmatmul.mubr.msk.f32.gmra.mrb[24].mxu1 %vm1101_vm1, %v487_v55  ;;  %v579_v54 = vld [vmem:[%s3747_s30 + $0x1c0] sm:$0xff] }
  0x4c   : > { %756 = vperm.xlu1 %3634, %v550_v56   ;;  %751 = vperm.xlu0 %3633, %v549_v57   ;;  %v455_v55 = vld [vmem:[%s3752_s7 + $0xe0] sm:$0xff]  ;;  %v582_v57 = vld [vmem:[%s3747_s30 + $0x1d8] sm:$0xff] }
  0x4d   : > { %1537 = vmatprep.mubr.f32.mxu0 %v5728_v1  ;;  %1825 = vmatprep.mubr.f32.mxu1 %v5728_v1  ;;  %v503_v56 = vld [vmem:[%s3752_s7 + $0x260] sm:$0xff] }
  0x4f   : > { %3501 = vmatmul.mubr.msk.f32.gmra.mrb[26].mxu0 %vm1101_vm1, %v440_v58  ;;  %3549 = vmatmul.mubr.msk.f32.gmra.mrb[26].mxu1 %vm1101_vm1, %v488_v59  ;;  %v581_v58 = vld [vmem:[%s3747_s30 + $0x1d0] sm:$0xff]  ;;  %v456_v59 = vld [vmem:[%s3752_s7 + $0xe8] sm:$0xff] }
  0x50   : > { %766 = vperm.xlu1 %3634, %v552_v60   ;;  %761 = vperm.xlu0 %3633, %v551_v61   ;;  %v504_v60 = vld [vmem:[%s3752_s7 + $0x268] sm:$0xff] }
  0x51   : > { %1543 = vmatprep.mubr.f32.mxu0 %v5728_v1  ;;  %1831 = vmatprep.mubr.f32.mxu1 %v5728_v1  ;;  %v584_v61 = vld [vmem:[%s3747_s30 + $0x1e8] sm:$0xff] }
  0x53   : > { %3502 = vmatmul.mubr.msk.f32.gmra.mrb[28].mxu0 %vm1101_vm1, %v441_v62  ;;  %3550 = vmatmul.mubr.msk.f32.gmra.mrb[28].mxu1 %vm1101_vm1, %v489_v63  ;;  %v583_v62 = vld [vmem:[%s3747_s30 + $0x1e0] sm:$0xff]  ;;  %v457_v63 = vld [vmem:[%s3752_s7 + $0xf0] sm:$0xff] }
  0x54   : > { %776 = vperm.xlu1 %3634, %v554_v0   ;;  %771 = vperm.xlu0 %3633, %v553_v2   ;;  %v505_v0 = vld [vmem:[%s3752_s7 + $0x270] sm:$0xff]  ;;  %v586_v2 = vld [vmem:[%s3747_s30 + $0x1f8] sm:$0xff] }
  0x55   : > { %1549 = vmatprep.mubr.f32.mxu0 %v5728_v1  ;;  %1837 = vmatprep.mubr.f32.mxu1 %v5728_v1 }
  0x57   : > { %3503 = vmatmul.mubr.msk.f32.gmra.mrb[30].mxu0 %vm1101_vm1, %v442_v3  ;;  %3551 = vmatmul.mubr.msk.f32.gmra.mrb[30].mxu1 %vm1101_vm1, %v490_v4  ;;  %v585_v3 = vld [vmem:[%s3747_s30 + $0x1f0] sm:$0xff]  ;;  %v458_v4 = vld [vmem:[%s3752_s7 + $0xf8] sm:$0xff] }
  0x58   : > { %786 = vperm.xlu1 %3634, %v556_v5   ;;  %781 = vperm.xlu0 %3633, %v555_v6   ;;  %v506_v5 = vld [vmem:[%s3752_s7 + $0x278] sm:$0xff]  ;;  %v588_v6 = vld [vmem:[%s3747_s30 + $0x208] sm:$0xff] }
  0x59   : > { %1555 = vmatprep.mubr.f32.mxu0 %v5728_v1  ;;  %1843 = vmatprep.mubr.f32.mxu1 %v5728_v1 }
  0x5b   : > { %3504 = vmatmul.mubr.msk.f32.gmra.mrb[32].mxu0 %vm1101_vm1, %v443_v7  ;;  %3552 = vmatmul.mubr.msk.f32.gmra.mrb[32].mxu1 %vm1101_vm1, %v491_v8  ;;  %v587_v7 = vld [vmem:[%s3747_s30 + $0x200] sm:$0xff] }
  0x5c   : > { %796 = vperm.xlu1 %3634, %v558_v9   ;;  %791 = vperm.xlu0 %3633, %v557_v10   ;;  %v459_v10 = vld [vmem:[%s3752_s7 + $0x100] sm:$0xff] }
  0x5d   : > { %1561 = vmatprep.mubr.f32.mxu0 %v5728_v1  ;;  %1849 = vmatprep.mubr.f32.mxu1 %v5728_v1 }
  0x5f   : > { %3505 = vmatmul.mubr.msk.f32.gmra.mrb[34].mxu0 %vm1101_vm1, %v444_v11  ;;  %3553 = vmatmul.mubr.msk.f32.gmra.mrb[34].mxu1 %vm1101_vm1, %v492_v12  ;;  %v507_v11 = vld [vmem:[%s3752_s7 + $0x280] sm:$0xff]  ;;  %v590_v12 = vld [vmem:[%s3747_s30 + $0x218] sm:$0xff] }
  0x60   : > { %806 = vperm.xlu1 %3634, %v560_v13   ;;  %801 = vperm.xlu0 %3633, %v559_v14   ;;  %v589_v13 = vld [vmem:[%s3747_s30 + $0x210] sm:$0xff] }
  0x61   : > { %1567 = vmatprep.mubr.f32.mxu0 %v5728_v1  ;;  %1855 = vmatprep.mubr.f32.mxu1 %v5728_v1 }
  0x63   : > { %3506 = vmatmul.mubr.msk.f32.gmra.mrb[36].mxu0 %vm1101_vm1, %v445_v15  ;;  %3554 = vmatmul.mubr.msk.f32.gmra.mrb[36].mxu1 %vm1101_vm1, %v493_v16  ;;  %v460_v16 = vld [vmem:[%s3752_s7 + $0x108] sm:$0xff] }
  0x64   : > { %816 = vperm.xlu1 %3634, %v562_v17   ;;  %811 = vperm.xlu0 %3633, %v561_v18   ;;  %v508_v17 = vld [vmem:[%s3752_s7 + $0x288] sm:$0xff] }
  0x65   : > { %1573 = vmatprep.mubr.f32.mxu0 %v5728_v1  ;;  %1861 = vmatprep.mubr.f32.mxu1 %v5728_v1  ;;  %v592_v18 = vld [vmem:[%s3747_s30 + $0x228] sm:$0xff] }
  0x67   : > { %3507 = vmatmul.mubr.msk.f32.gmra.mrb[38].mxu0 %vm1101_vm1, %v446_v19  ;;  %3555 = vmatmul.mubr.msk.f32.gmra.mrb[38].mxu1 %vm1101_vm1, %v494_v20  ;;  %v591_v19 = vld [vmem:[%s3747_s30 + $0x220] sm:$0xff] }
  0x68   : > { %826 = vperm.xlu1 %3634, %v564_v21   ;;  %821 = vperm.xlu0 %3633, %v563_v22   ;;  %v461_v22 = vld [vmem:[%s3752_s7 + $0x110] sm:$0xff] }
  0x69   : > { %1579 = vmatprep.mubr.f32.mxu0 %v5728_v1  ;;  %1867 = vmatprep.mubr.f32.mxu1 %v5728_v1 }
  0x6b   : > { %3508 = vmatmul.mubr.msk.f32.gmra.mrb[40].mxu0 %vm1101_vm1, %v447_v23  ;;  %3556 = vmatmul.mubr.msk.f32.gmra.mrb[40].mxu1 %vm1101_vm1, %v495_v24  ;;  %v509_v23 = vld [vmem:[%s3752_s7 + $0x290] sm:$0xff]  ;;  %v594_v24 = vld [vmem:[%s3747_s30 + $0x238] sm:$0xff] }
  0x6c   : > { %836 = vperm.xlu1 %3634, %v566_v25   ;;  %831 = vperm.xlu0 %3633, %v565_v26   ;;  %v593_v25 = vld [vmem:[%s3747_s30 + $0x230] sm:$0xff] }
  0x6d   : > { %1585 = vmatprep.mubr.f32.mxu0 %v5728_v1  ;;  %1873 = vmatprep.mubr.f32.mxu1 %v5728_v1 }
  0x6f   : > { %3509 = vmatmul.mubr.msk.f32.gmra.mrb[42].mxu0 %vm1101_vm1, %v448_v27  ;;  %3557 = vmatmul.mubr.msk.f32.gmra.mrb[42].mxu1 %vm1101_vm1, %v496_v28  ;;  %v462_v28 = vld [vmem:[%s3752_s7 + $0x118] sm:$0xff] }
  0x70   : > { %846 = vperm.xlu1 %3634, %v568_v29   ;;  %841 = vperm.xlu0 %3633, %v567_v30   ;;  %v510_v29 = vld [vmem:[%s3752_s7 + $0x298] sm:$0xff]  ;;  %v596_v30 = vld [vmem:[%s3747_s30 + $0x248] sm:$0xff] }
  0x71   : > { %1591 = vmatprep.mubr.f32.mxu0 %v5728_v1  ;;  %1879 = vmatprep.mubr.f32.mxu1 %v5728_v1 }
  0x73   : > { %3510 = vmatmul.mubr.msk.f32.gmra.mrb[44].mxu0 %vm1101_vm1, %v449_v31  ;;  %3558 = vmatmul.mubr.msk.f32.gmra.mrb[44].mxu1 %vm1101_vm1, %v497_v32  ;;  %v595_v31 = vld [vmem:[%s3747_s30 + $0x240] sm:$0xff] }
  0x74   : > { %856 = vperm.xlu1 %3634, %v570_v33   ;;  %851 = vperm.xlu0 %3633, %v569_v34   ;;  %v463_v34 = vld [vmem:[%s3752_s7 + $0x120] sm:$0xff] }
  0x75   : > { %1597 = vmatprep.mubr.f32.mxu0 %v5728_v1  ;;  %1885 = vmatprep.mubr.f32.mxu1 %v5728_v1 }
  0x77   : > { %3511 = vmatmul.mubr.msk.f32.gmra.mrb[46].mxu0 %vm1101_vm1, %v450_v35  ;;  %3559 = vmatmul.mubr.msk.f32.gmra.mrb[46].mxu1 %vm1101_vm1, %v498_v36  ;;  %v511_v35 = vld [vmem:[%s3752_s7 + $0x2a0] sm:$0xff]  ;;  %v598_v36 = vld [vmem:[%s3747_s30 + $0x258] sm:$0xff] }
  0x78   : > { %866 = vperm.xlu1 %3634, %v572_v37   ;;  %861 = vperm.xlu0 %3633, %v571_v38   ;;  %v597_v37 = vld [vmem:[%s3747_s30 + $0x250] sm:$0xff] }
  0x79   : > { %1603 = vmatprep.mubr.f32.mxu0 %v5728_v1  ;;  %1891 = vmatprep.mubr.f32.mxu1 %v5728_v1 }
  0x7b   : > { %3512 = vmatmul.mubr.msk.f32.gmra.mrb[48].mxu0 %vm1101_vm1, %v451_v39  ;;  %3560 = vmatmul.mubr.msk.f32.gmra.mrb[48].mxu1 %vm1101_vm1, %v499_v40  ;;  %v464_v40 = vld [vmem:[%s3752_s7 + $0x128] sm:$0xff] }
  0x7c   : > { %876 = vperm.xlu1 %3634, %v574_v41   ;;  %871 = vperm.xlu0 %3633, %v573_v42   ;;  %v512_v41 = vld [vmem:[%s3752_s7 + $0x2a8] sm:$0xff] }
  0x7d   : > { %1609 = vmatprep.mubr.f32.mxu0 %v5728_v1  ;;  %1897 = vmatprep.mubr.f32.mxu1 %v5728_v1  ;;  %v600_v42 = vld [vmem:[%s3747_s30 + $0x268] sm:$0xff] }
  0x7f   : > { %3513 = vmatmul.mubr.msk.f32.gmra.mrb[50].mxu0 %vm1101_vm1, %v452_v43  ;;  %3561 = vmatmul.mubr.msk.f32.gmra.mrb[50].mxu1 %vm1101_vm1, %v500_v44  ;;  %v599_v43 = vld [vmem:[%s3747_s30 + $0x260] sm:$0xff] }
  0x80   : > { %886 = vperm.xlu1 %3634, %v576_v45   ;;  %881 = vperm.xlu0 %3633, %v575_v46   ;;  %v465_v46 = vld [vmem:[%s3752_s7 + $0x130] sm:$0xff] }
  0x81   : > { %1615 = vmatprep.mubr.f32.mxu0 %v5728_v1  ;;  %1903 = vmatprep.mubr.f32.mxu1 %v5728_v1 }
  0x83   : > { %3514 = vmatmul.mubr.msk.f32.gmra.mrb[52].mxu0 %vm1101_vm1, %v453_v47  ;;  %3562 = vmatmul.mubr.msk.f32.gmra.mrb[52].mxu1 %vm1101_vm1, %v501_v48  ;;  %v513_v47 = vld [vmem:[%s3752_s7 + $0x2b0] sm:$0xff]  ;;  %v602_v48 = vld [vmem:[%s3747_s30 + $0x278] sm:$0xff] }
  0x84   : > { %896 = vperm.xlu1 %3634, %v578_v49   ;;  %891 = vperm.xlu0 %3633, %v577_v50   ;;  %v601_v49 = vld [vmem:[%s3747_s30 + $0x270] sm:$0xff] }
  0x85   : > { %1621 = vmatprep.mubr.f32.mxu0 %v5728_v1  ;;  %1909 = vmatprep.mubr.f32.mxu1 %v5728_v1 }
  0x87   : > { %3515 = vmatmul.mubr.msk.f32.gmra.mrb[54].mxu0 %vm1101_vm1, %v454_v51  ;;  %3563 = vmatmul.mubr.msk.f32.gmra.mrb[54].mxu1 %vm1101_vm1, %v502_v52  ;;  %v466_v52 = vld [vmem:[%s3752_s7 + $0x138] sm:$0xff] }
  0x88   : > { %906 = vperm.xlu1 %3634, %v580_v53   ;;  %901 = vperm.xlu0 %3633, %v579_v54   ;;  %v514_v53 = vld [vmem:[%s3752_s7 + $0x2b8] sm:$0xff]  ;;  %v604_v54 = vld [vmem:[%s3747_s30 + $0x288] sm:$0xff] }
  0x89   : > { %1627 = vmatprep.mubr.f32.mxu0 %v5728_v1  ;;  %1915 = vmatprep.mubr.f32.mxu1 %v5728_v1 }
  0x8b   : > { %3516 = vmatmul.mubr.msk.f32.gmra.mrb[56].mxu0 %vm1101_vm1, %v455_v55  ;;  %3564 = vmatmul.mubr.msk.f32.gmra.mrb[56].mxu1 %vm1101_vm1, %v503_v56  ;;  %v603_v55 = vld [vmem:[%s3747_s30 + $0x280] sm:$0xff] }
  0x8c   : > { %916 = vperm.xlu1 %3634, %v582_v57   ;;  %911 = vperm.xlu0 %3633, %v581_v58   ;;  %v467_v58 = vld [vmem:[%s3752_s7 + $0x140] sm:$0xff] }
  0x8d   : > { %1633 = vmatprep.mubr.f32.mxu0 %v5728_v1  ;;  %1921 = vmatprep.mubr.f32.mxu1 %v5728_v1 }
  0x8f   : > { %3517 = vmatmul.mubr.msk.f32.gmra.mrb[58].mxu0 %vm1101_vm1, %v456_v59  ;;  %3565 = vmatmul.mubr.msk.f32.gmra.mrb[58].mxu1 %vm1101_vm1, %v504_v60  ;;  %v515_v59 = vld [vmem:[%s3752_s7 + $0x2c0] sm:$0xff]  ;;  %v606_v60 = vld [vmem:[%s3747_s30 + $0x298] sm:$0xff] }
  0x90   : > { %926 = vperm.xlu1 %3634, %v584_v61   ;;  %921 = vperm.xlu0 %3633, %v583_v62   ;;  %v605_v61 = vld [vmem:[%s3747_s30 + $0x290] sm:$0xff] }
  0x91   : > { %1639 = vmatprep.mubr.f32.mxu0 %v5728_v1  ;;  %1927 = vmatprep.mubr.f32.mxu1 %v5728_v1 }
  0x93   : > { %3518 = vmatmul.mubr.msk.f32.gmra.mrb[60].mxu0 %vm1101_vm1, %v457_v63  ;;  %3566 = vmatmul.mubr.msk.f32.gmra.mrb[60].mxu1 %vm1101_vm1, %v505_v0  ;;  %v468_v0 = vld [vmem:[%s3752_s7 + $0x148] sm:$0xff] }
  0x94   : > { %936 = vperm.xlu1 %3634, %v586_v2   ;;  %931 = vperm.xlu0 %3633, %v585_v3   ;;  %v516_v2 = vld [vmem:[%s3752_s7 + $0x2c8] sm:$0xff] }
  0x95   : > { %1645 = vmatprep.mubr.f32.mxu0 %v5728_v1  ;;  %1933 = vmatprep.mubr.f32.mxu1 %v5728_v1  ;;  %v608_v3 = vld [vmem:[%s3747_s30 + $0x2a8] sm:$0xff] }
  0x97   : > { %3519 = vmatmul.mubr.msk.f32.gmra.mrb[62].mxu0 %vm1101_vm1, %v458_v4  ;;  %3567 = vmatmul.mubr.msk.f32.gmra.mrb[62].mxu1 %vm1101_vm1, %v506_v5  ;;  %v4010_v8 = vpop.permute.xlu1 %631  ;;  %v4012_v9 = vpop.permute.xlu0 %621  ;;  %v607_v4 = vld [vmem:[%s3747_s30 + $0x2a0] sm:$0xff] }
  0x98   : > { %946 = vperm.xlu1 %3634, %v588_v6   ;;  %941 = vperm.xlu0 %3633, %v587_v7   ;;  %v469_v7 = vld [vmem:[%s3752_s7 + $0x150] sm:$0xff] }
  0x99   : > { %1651 = vmatprep.mubr.f32.mxu0 %v5728_v1  ;;  %1939 = vmatprep.mubr.f32.mxu1 %v5728_v1 }
  0x9b   : > { %3520 = vmatmul.mubr.msk.f32.gmra.mrb[64].mxu0 %vm1101_vm1, %v459_v10  ;;  %3568 = vmatmul.mubr.msk.f32.gmra.mrb[64].mxu1 %vm1101_vm1, %v507_v11  ;;  %v4022_v14 = vpop.permute.xlu1 %636  ;;  %v4024_v15 = vpop.permute.xlu0 %626  ;;  %v517_v10 = vld [vmem:[%s3752_s7 + $0x2d0] sm:$0xff]  ;;  %v610_v11 = vld [vmem:[%s3747_s30 + $0x2b8] sm:$0xff] }
  0x9c   : > { %956 = vperm.xlu1 %3634, %v590_v12   ;;  %951 = vperm.xlu0 %3633, %v589_v13   ;;  %v609_v12 = vld [vmem:[%s3747_s30 + $0x2b0] sm:$0xff] }
  0x9d   : > { %1657 = vmatprep.mubr.f32.mxu0 %v5728_v1  ;;  %1945 = vmatprep.mubr.f32.mxu1 %v5728_v1 }
  0x9f   : > { %3521 = vmatmul.mubr.msk.f32.gmra.mrb[66].mxu0 %vm1101_vm1, %v460_v16  ;;  %3569 = vmatmul.mubr.msk.f32.gmra.mrb[66].mxu1 %vm1101_vm1, %v508_v17  ;;  %v4034_v20 = vpop.permute.xlu1 %646  ;;  %v4036_v21 = vpop.permute.xlu0 %641  ;;  %v470_v17 = vld [vmem:[%s3752_s7 + $0x158] sm:$0xff] }
  0xa0   : > { %966 = vperm.xlu1 %3634, %v592_v18   ;;  %961 = vperm.xlu0 %3633, %v591_v19   ;;  %v518_v18 = vld [vmem:[%s3752_s7 + $0x2d8] sm:$0xff]  ;;  %v612_v19 = vld [vmem:[%s3747_s30 + $0x2c8] sm:$0xff] }
  0xa1   : > { %1663 = vmatprep.mubr.f32.mxu0 %v5728_v1  ;;  %1951 = vmatprep.mubr.f32.mxu1 %v5728_v1 }
  0xa3   : > { %3522 = vmatmul.mubr.msk.f32.gmra.mrb[68].mxu0 %vm1101_vm1, %v461_v22  ;;  %3570 = vmatmul.mubr.msk.f32.gmra.mrb[68].mxu1 %vm1101_vm1, %v509_v23  ;;  %v4046_v26 = vpop.permute.xlu1 %656  ;;  %v4048_v27 = vpop.permute.xlu0 %651  ;;  %v611_v22 = vld [vmem:[%s3747_s30 + $0x2c0] sm:$0xff] }
  0xa4   : > { %976 = vperm.xlu1 %3634, %v594_v24   ;;  %971 = vperm.xlu0 %3633, %v593_v25   ;;  %v471_v25 = vld [vmem:[%s3752_s7 + $0x160] sm:$0xff] }
  0xa5   : > { %1669 = vmatprep.mubr.f32.mxu0 %v5728_v1  ;;  %1957 = vmatprep.mubr.f32.mxu1 %v5728_v1 }
  0xa7   : > { %3523 = vmatmul.mubr.msk.f32.gmra.mrb[70].mxu0 %vm1101_vm1, %v462_v28  ;;  %3571 = vmatmul.mubr.msk.f32.gmra.mrb[70].mxu1 %vm1101_vm1, %v510_v29  ;;  %v4058_v32 = vpop.permute.xlu1 %666  ;;  %v4060_v33 = vpop.permute.xlu0 %661  ;;  %v519_v28 = vld [vmem:[%s3752_s7 + $0x2e0] sm:$0xff]  ;;  %v614_v29 = vld [vmem:[%s3747_s30 + $0x2d8] sm:$0xff] }
  0xa8   : > { %986 = vperm.xlu1 %3634, %v596_v30   ;;  %981 = vperm.xlu0 %3633, %v595_v31   ;;  %v613_v30 = vld [vmem:[%s3747_s30 + $0x2d0] sm:$0xff] }
  0xa9   : > { %1675 = vmatprep.mubr.f32.mxu0 %v5728_v1  ;;  %1963 = vmatprep.mubr.f32.mxu1 %v5728_v1 }
  0xab   : > { %3524 = vmatmul.mubr.msk.f32.gmra.mrb[72].mxu0 %vm1101_vm1, %v463_v34  ;;  %3572 = vmatmul.mubr.msk.f32.gmra.mrb[72].mxu1 %vm1101_vm1, %v511_v35  ;;  %v4070_v38 = vpop.permute.xlu1 %676  ;;  %v4072_v39 = vpop.permute.xlu0 %671  ;;  %v472_v35 = vld [vmem:[%s3752_s7 + $0x168] sm:$0xff] }
  0xac   : > { %996 = vperm.xlu1 %3634, %v598_v36   ;;  %991 = vperm.xlu0 %3633, %v597_v37   ;;  %v520_v36 = vld [vmem:[%s3752_s7 + $0x2e8] sm:$0xff] }
  0xad   : > { %1681 = vmatprep.mubr.f32.mxu0 %v5728_v1  ;;  %1969 = vmatprep.mubr.f32.mxu1 %v5728_v1  ;;  %v616_v37 = vld [vmem:[%s3747_s30 + $0x2e8] sm:$0xff] }
  0xaf   : > { %3525 = vmatmul.mubr.msk.f32.gmra.mrb[74].mxu0 %vm1101_vm1, %v464_v40  ;;  %3573 = vmatmul.mubr.msk.f32.gmra.mrb[74].mxu1 %vm1101_vm1, %v512_v41  ;;  %v4082_v44 = vpop.permute.xlu1 %686  ;;  %v4084_v45 = vpop.permute.xlu0 %681  ;;  %v615_v40 = vld [vmem:[%s3747_s30 + $0x2e0] sm:$0xff] }
  0xb0   : > { %1006 = vperm.xlu1 %3634, %v600_v42   ;;  %1001 = vperm.xlu0 %3633, %v599_v43   ;;  %v473_v43 = vld [vmem:[%s3752_s7 + $0x170] sm:$0xff] }
  0xb1   : > { %1687 = vmatprep.mubr.f32.mxu0 %v5728_v1  ;;  %1975 = vmatprep.mubr.f32.mxu1 %v5728_v1 }
  0xb3   : > { %3526 = vmatmul.mubr.msk.f32.gmra.mrb[76].mxu0 %vm1101_vm1, %v465_v46  ;;  %3574 = vmatmul.mubr.msk.f32.gmra.mrb[76].mxu1 %vm1101_vm1, %v513_v47  ;;  %v4094_v50 = vpop.permute.xlu1 %696  ;;  %v4096_v51 = vpop.permute.xlu0 %691  ;;  %v521_v46 = vld [vmem:[%s3752_s7 + $0x2f0] sm:$0xff]  ;;  %v618_v47 = vld [vmem:[%s3747_s30 + $0x2f8] sm:$0xff] }
  0xb4   : > { %1016 = vperm.xlu1 %3634, %v602_v48   ;;  %1011 = vperm.xlu0 %3633, %v601_v49   ;;  %v617_v48 = vld [vmem:[%s3747_s30 + $0x2f0] sm:$0xff] }
  0xb5   : > { %1693 = vmatprep.mubr.f32.mxu0 %v5728_v1  ;;  %1981 = vmatprep.mubr.f32.mxu1 %v5728_v1 }
  0xb7   : > { %3527 = vmatmul.mubr.msk.f32.gmra.mrb[78].mxu0 %vm1101_vm1, %v466_v52  ;;  %3575 = vmatmul.mubr.msk.f32.gmra.mrb[78].mxu1 %vm1101_vm1, %v514_v53  ;;  %v4106_v56 = vpop.permute.xlu1 %706  ;;  %v4108_v57 = vpop.permute.xlu0 %701  ;;  %v474_v53 = vld [vmem:[%s3752_s7 + $0x178] sm:$0xff] }
  0xb8   : > { %1026 = vperm.xlu1 %3634, %v604_v54   ;;  %1021 = vperm.xlu0 %3633, %v603_v55   ;;  %v522_v54 = vld [vmem:[%s3752_s7 + $0x2f8] sm:$0xff] }
  0xb9   : > { %1699 = vmatprep.mubr.f32.mxu0 %v5728_v1  ;;  %1987 = vmatprep.mubr.f32.mxu1 %v5728_v1 }
  0xbb   : > { %3528 = vmatmul.mubr.msk.f32.gmra.mrb[80].mxu0 %vm1101_vm1, %v467_v58  ;;  %3576 = vmatmul.mubr.msk.f32.gmra.mrb[80].mxu1 %vm1101_vm1, %v515_v59  ;;  %v4118_v62 = vpop.permute.xlu1 %716  ;;  %v4120_v63 = vpop.permute.xlu0 %711 }
  0xbc   : > { %1036 = vperm.xlu1 %3634, %v606_v60   ;;  %1031 = vperm.xlu0 %3633, %v605_v61  }
  0xbd   : > { %1705 = vmatprep.mubr.f32.mxu0 %v5728_v1  ;;  %1993 = vmatprep.mubr.f32.mxu1 %v5728_v1 }
  0xbf   : > { %3529 = vmatmul.mubr.msk.f32.gmra.mrb[82].mxu0 %vm1101_vm1, %v468_v0  ;;  %3577 = vmatmul.mubr.msk.f32.gmra.mrb[82].mxu1 %vm1101_vm1, %v516_v2  ;;  %v4130_v5 = vpop.permute.xlu1 %726  ;;  %v4132_v6 = vpop.permute.xlu0 %721 }
  0xc0   : > { %1046 = vperm.xlu1 %3634, %v608_v3   ;;  %1041 = vperm.xlu0 %3633, %v607_v4  }
  0xc1   : > { %1711 = vmatprep.mubr.f32.mxu0 %v5728_v1  ;;  %1999 = vmatprep.mubr.f32.mxu1 %v5728_v1 }
  0xc3   : > { %3530 = vmatmul.mubr.msk.f32.gmra.mrb[84].mxu0 %vm1101_vm1, %v469_v7  ;;  %3578 = vmatmul.mubr.msk.f32.gmra.mrb[84].mxu1 %vm1101_vm1, %v517_v10  ;;  %v4142_v13 = vpop.permute.xlu1 %736  ;;  %v4144_v16 = vpop.permute.xlu0 %731 }
  0xc4   : > { %1056 = vperm.xlu1 %3634, %v610_v11   ;;  %1051 = vperm.xlu0 %3633, %v609_v12  }
  0xc5   : > { %1717 = vmatprep.mubr.f32.mxu0 %v5728_v1  ;;  %2005 = vmatprep.mubr.f32.mxu1 %v5728_v1 }
  0xc7   : > { %3531 = vmatmul.mubr.msk.f32.gmra.mrb[86].mxu0 %vm1101_vm1, %v470_v17  ;;  %3579 = vmatmul.mubr.msk.f32.gmra.mrb[86].mxu1 %vm1101_vm1, %v518_v18  ;;  %v4154_v23 = vpop.permute.xlu1 %746  ;;  %v4156_v24 = vpop.permute.xlu0 %741 }
  0xc8   : > { %1066 = vperm.xlu1 %3634, %v612_v19   ;;  %1061 = vperm.xlu0 %3633, %v611_v22  }
  0xc9   : > { %1723 = vmatprep.mubr.f32.mxu0 %v5728_v1  ;;  %2011 = vmatprep.mubr.f32.mxu1 %v5728_v1 }
  0xcb   : > { %3532 = vmatmul.mubr.msk.f32.gmra.mrb[88].mxu0 %vm1101_vm1, %v471_v25  ;;  %3580 = vmatmul.mubr.msk.f32.gmra.mrb[88].mxu1 %vm1101_vm1, %v519_v28  ;;  %v4166_v31 = vpop.permute.xlu1 %756  ;;  %v4168_v34 = vpop.permute.xlu0 %751 }
  0xcc   : > { %1076 = vperm.xlu1 %3634, %v614_v29   ;;  %1071 = vperm.xlu0 %3633, %v613_v30  }
  0xcd   : > { %1729 = vmatprep.mubr.f32.mxu0 %v5728_v1  ;;  %2017 = vmatprep.mubr.f32.mxu1 %v5728_v1 }
  0xcf   : > { %3533 = vmatmul.mubr.msk.f32.gmra.mrb[90].mxu0 %vm1101_vm1, %v472_v35  ;;  %3581 = vmatmul.mubr.msk.f32.gmra.mrb[90].mxu1 %vm1101_vm1, %v520_v36  ;;  %v4178_v41 = vpop.permute.xlu1 %766  ;;  %v4180_v42 = vpop.permute.xlu0 %761 }
  0xd0   : > { %1086 = vperm.xlu1 %3634, %v616_v37   ;;  %1081 = vperm.xlu0 %3633, %v615_v40  }
  0xd1   : > { %1735 = vmatprep.mubr.f32.mxu0 %v5728_v1  ;;  %2023 = vmatprep.mubr.f32.mxu1 %v5728_v1 }
  0xd3   : > { %3534 = vmatmul.mubr.msk.f32.gmra.mrb[92].mxu0 %vm1101_vm1, %v473_v43  ;;  %3582 = vmatmul.mubr.msk.f32.gmra.mrb[92].mxu1 %vm1101_vm1, %v521_v46  ;;  %v4190_v49 = vpop.permute.xlu1 %776  ;;  %v4192_v52 = vpop.permute.xlu0 %771 }
  0xd4   : > { %1096 = vperm.xlu1 %3634, %v618_v47   ;;  %1091 = vperm.xlu0 %3633, %v617_v48  }
  0xd5   : > { %1741 = vmatprep.mubr.f32.mxu0 %v5728_v1  ;;  %2029 = vmatprep.mubr.f32.mxu1 %v5728_v1 }
  0xd7   : > { %3535 = vmatmul.mubr.msk.f32.gmra.mrb[94].mxu0 %vm1101_vm1, %v474_v53  ;;  %3583 = vmatmul.mubr.msk.f32.gmra.mrb[94].mxu1 %vm1101_vm1, %v522_v54  ;;  %v4200_v55 = vpop.permute.xlu1 %786  ;;  %v4202_v58 = vpop.permute.xlu0 %781 }
  0xdb   : > { %v4204_v59 = vpop.permute.xlu1 %796  ;;  %v4206_v60 = vpop.permute.xlu0 %791 }
  0xdf   : > { %v4208_v61 = vpop.permute.xlu1 %806  ;;  %v4210_v0 = vpop.permute.xlu0 %801 }
  0xe3   : > { %v4212_v2 = vpop.permute.xlu1 %816  ;;  %v4214_v3 = vpop.permute.xlu0 %811 }
  0xe7   : > { %v4217_v4 = vpop.permute.xlu1 %826  ;;  %v4219_v7 = vpop.permute.xlu0 %821 }
  0xeb   : > { %v4222_v10 = vpop.permute.xlu1 %836  ;;  %v4224_v11 = vpop.permute.xlu0 %831 }
  0xec   : > { %5735 = vst [vmem:[#allocation2_spill] sm:$0xff] %v4222_v10 }
  0xee   : > { %v1461_v12 = vpop.f32.mrb[0].mxu0  ;;  %v1749_v17 = vpop.f32.mrb[0].mxu1 }
  0xef   : > { %v1462_v18 = vadd.f32 %v1461_v12, %v4012_v9  ;;  %v1463_v19 = vpop.f32.mrb[1].mxu0  ;;  %v4227_v22 = vpop.permute.xlu1 %846 }
  0xf0   : > { %5736 = vst [vmem:[#allocation3_spill] sm:$0xff] %v4227_v22  ;;  %v1464_v25 = vadd.f32 %v1463_v19, %v4012_v9  ;;  %v4235_v28 = vpop.permute.xlu0 %841  ;;  %v1751_v29 = vpop.f32.mrb[1].mxu1 }
  0xf1   : > { %5737 = vst [vmem:[#allocation4_spill] sm:$0xff] %v4235_v28  ;;  %v2036_v30 = vmax.f32 %v1462_v18, 0.0 }
  0xf2   : > { %v2037_v35 = vmax.f32 %v1464_v25, 0.0  ;;  %v1467_v36 = vpop.f32.mrb[2].mxu0  ;;  %v1755_v37 = vpop.f32.mrb[2].mxu1 }
  0xf3   : > { %2228 = vst [vmem:[%s4232_s14] sm:$0xff] %v2036_v30  ;;  %v1468_v40 = vadd.f32 %v1467_v36, %v4024_v15  ;;  %v1469_v43 = vpop.f32.mrb[3].mxu0  ;;  %v4239_v46 = vpop.permute.xlu1 %856 }
  0xf4   : > { %5738 = vst [vmem:[#allocation5_spill] sm:$0xff] %v4239_v46  ;;  %2229 = vst [vmem:[%s4232_s14 + $0x8] sm:$0xff] %v2037_v35  ;;  %v1470_v47 = vadd.f32 %v1469_v43, %v4024_v15  ;;  %v4243_v48 = vpop.permute.xlu0 %851  ;;  %v2516_v9 = vadd.f32 %v2037_v35, %v2036_v30  ;;  %v1757_v53 = vpop.f32.mrb[3].mxu1 }
  0xf5   : > { %5739 = vst [vmem:[#allocation6_spill] sm:$0xff] %v4243_v48  ;;  %v2038_v54 = vmax.f32 %v1468_v40, 0.0 }
  0xf6   : > { %v2039_v12 = vmax.f32 %v1470_v47, 0.0  ;;  %v1473_v18 = vpop.f32.mrb[4].mxu0  ;;  %2517 = vadd.xlane.f32.xlu0 %v2516_v9  ;;  %v1761_v19 = vpop.f32.mrb[4].mxu1 }
  0xf7   : > { %2230 = vst [vmem:[%s4232_s14 + $0x10] sm:$0xff] %v2038_v54  ;;  %v1474_v25 = vadd.f32 %v1473_v18, %v4010_v8  ;;  %v1475_v36 = vpop.f32.mrb[5].mxu0  ;;  %v867_v1 = vpop.permute.xlu1 %866 }
  0xf8   : > { %2231 = vst [vmem:[%s4232_s14 + $0x18] sm:$0xff] %v2039_v12  ;;  %v4248_v46 = vadd.f32 %v2039_v12, %v2038_v54  ;;  %v1476_v15 = vadd.f32 %v1475_v36, %v4010_v8  ;;  %v1756_v30 = vadd.f32 %v1755_v37, %v867_v1  ;;  %v1758_v35 = vadd.f32 %v1757_v53, %v867_v1  ;;  %v862_v40 = vpop.permute.xlu0 %861  ;;  %v1763_v43 = vpop.f32.mrb[5].mxu1 }
  0xf9   : > { %v2040_v47 = vmax.f32 %v1474_v25, 0.0  ;;  %v1750_v9 = vadd.f32 %v1749_v17, %v862_v40  ;;  %v1752_v48 = vadd.f32 %v1751_v29, %v862_v40 }
  0xfa   : > { %v2041_v18 = vmax.f32 %v1476_v15, 0.0  ;;  %v2134_v22 = vmax.f32 %v1756_v30, 0.0  ;;  %v2135_v28 = vmax.f32 %v1758_v35, 0.0  ;;  %v1479_v10 = vpop.f32.mrb[6].mxu0  ;;  %v1767_v54 = vpop.f32.mrb[6].mxu1 }
  0xfb   : > { %2232 = vst [vmem:[%s4232_s14 + $0x20] sm:$0xff] %v2040_v47  ;;  %v4255_v8 = vadd.f32 %v1479_v10, %v4022_v14  ;;  %v1481_v1 = vpop.f32.mrb[7].mxu0  ;;  %v877_v37 = vpop.permute.xlu1 %876  ;;  %v2132_v53 = vmax.f32 %v1750_v9, 0.0  ;;  %v2133_v12 = vmax.f32 %v1752_v48, 0.0 }
  0xfc   : > { %2233 = vst [vmem:[%s4232_s14 + $0x28] sm:$0xff] %v2041_v18  ;;  %v4258_v17 = vadd.f32 %v2041_v18, %v2040_v47  ;;  %2326 = vst [vmem:[%s4232_s14 + $0x310] sm:$0xff] %v2134_v22  ;;  %v4263_v29 = vadd.f32 %v1481_v1, %v4022_v14  ;;  %v4265_v25 = vadd.f32 %v1767_v54, %v877_v37  ;;  %v872_v36 = vpop.permute.xlu0 %871  ;;  %v1769_v10 = vpop.f32.mrb[7].mxu1 }
  0xfd   : > { %2327 = vst [vmem:[%s4232_s14 + $0x318] sm:$0xff] %v2135_v28  ;;  %v2663_v15 = vadd.f32 %v2135_v28, %v2134_v22  ;;  %v2042_v48 = vmax.f32 %v4255_v8, 0.0  ;;  %v4273_v30 = vadd.f32 %v1761_v19, %v872_v36  ;;  %v4275_v35 = vadd.f32 %v1763_v43, %v872_v36  ;;  %2325 = vst [vmem:[%s4232_s14 + $0x308] sm:$0xff] %v2133_v12 }
  0xfe   : > { %v4277_v40 = vadd.f32 %v1769_v10, %v877_v37  ;;  %2324 = vst [vmem:[%s4232_s14 + $0x300] sm:$0xff] %v2132_v53  ;;  %v2043_v14 = vmax.f32 %v4263_v29, 0.0  ;;  %v2138_v22 = vmax.f32 %v4265_v25, 0.0  ;;  %v1485_v28 = vpop.f32.mrb[8].mxu0  ;;  %v4283_v47 = vpop.f32.mrb[8].mxu1  ;;  %v4285_v19 = vadd.f32 %v2133_v12, %v2132_v53 }
  0xff   : > { %2664 = vadd.xlane.f32.xlu0 %v2663_v15  ;;  %2234 = vst [vmem:[%s4232_s14 + $0x30] sm:$0xff] %v2042_v48  ;;  %v2136_v43 = vmax.f32 %v4273_v30, 0.0  ;;  %v2137_v9 = vmax.f32 %v4275_v35, 0.0  ;;  %v4294_v54 = vadd.f32 %v1485_v28, %v4036_v21  ;;  %v4296_v1 = vpop.f32.mrb[9].mxu0  ;;  %v4298_v37 = vpop.permute.xlu1 %886  ;;  %v5740_v53 = vmov 0.0  }
 0x100   : > { %v2139_v18 = vmax.f32 %v4277_v40, 0.0  ;;  %330 = vst.msk [vmem:[%s4270_s25] sm:$0xff] %vm329_vm2, %v5740_v53  ;;  %331 = vst.msk [vmem:[%s4270_s25 + $0x8] sm:$0xff] %vm329_vm2, %v5740_v53  ;;  %v2525_v12 = vadd.f32 %v2043_v14, %v2042_v48  ;;  %2661 = vadd.xlane.f32.xlu1 %v4285_v19  ;;  %v1488_v36 = vadd.f32 %v4296_v1, %v4036_v21  ;;  %v882_v10 = vpop.permute.xlu0 %881  ;;  %v1775_v15 = vpop.f32.mrb[9].mxu1 }
 0x101   : > { %332 = vst.msk [vmem:[%s4270_s25 + $0x10] sm:$0xff] %vm329_vm2, %v5740_v53  ;;  %333 = vst.msk [vmem:[%s4270_s25 + $0x18] sm:$0xff] %vm329_vm2, %v5740_v53  ;;  %v2044_v29 = vmax.f32 %v4294_v54, 0.0  ;;  %v1774_v21 = vadd.f32 %v4283_v47, %v882_v10  ;;  %v1776_v48 = vadd.f32 %v1775_v15, %v882_v10  ;;  %v2666_v25 = vadd.f32 %v2137_v9, %v2136_v43 }
 0x102   : > { %334 = vst.msk [vmem:[%s4270_s25 + $0x20] sm:$0xff] %vm329_vm2, %v5740_v53  ;;  %335 = vst.msk [vmem:[%s4270_s25 + $0x28] sm:$0xff] %vm329_vm2, %v5740_v53  ;;  %v2669_v8 = vadd.f32 %v2139_v18, %v2138_v22  ;;  %v1491_v28 = vpop.f32.mrb[10].mxu0  ;;  %v1779_v19 = vpop.f32.mrb[10].mxu1 }
 0x103   : > { %336 = vst.msk [vmem:[%s4270_s25 + $0x30] sm:$0xff] %vm329_vm2, %v5740_v53  ;;  %337 = vst.msk [vmem:[%s4270_s25 + $0x38] sm:$0xff] %vm329_vm2, %v5740_v53  ;;  %2523 = vadd.xlane.f32.xlu0 %v4258_v17  ;;  %v2140_v40 = vmax.f32 %v1774_v21, 0.0  ;;  %v1780_v47 = vadd.f32 %v1779_v19, %v4298_v37  ;;  %v1493_v54 = vpop.f32.mrb[11].mxu0  ;;  %v1781_v1 = vpop.f32.mrb[11].mxu1 }
 0x104   : > { %338 = vst.msk [vmem:[%s4270_s25 + $0x40] sm:$0xff] %vm329_vm2, %v5740_v53  ;;  %339 = vst.msk [vmem:[%s4270_s25 + $0x48] sm:$0xff] %vm329_vm2, %v5740_v53  ;;  %v1494_v17 = vadd.f32 %v1493_v54, %v4034_v20  ;;  %v1782_v30 = vadd.f32 %v1781_v1, %v4298_v37  ;;  %2520 = vadd.xlane.f32.xlu1 %v4248_v46  ;;  %v897_v35 = vpop.permute.xlu1 %896 }
 0x105   : > { %340 = vst.msk [vmem:[%s4270_s25 + $0x50] sm:$0xff] %vm329_vm2, %v5740_v53  ;;  %341 = vst.msk [vmem:[%s4270_s25 + $0x58] sm:$0xff] %vm329_vm2, %v5740_v53  ;;  %v2142_v10 = vmax.f32 %v1780_v47, 0.0 }
 0x106   : > { %342 = vst.msk [vmem:[%s4270_s25 + $0x60] sm:$0xff] %vm329_vm2, %v5740_v53  ;;  %343 = vst.msk [vmem:[%s4270_s25 + $0x68] sm:$0xff] %vm329_vm2, %v5740_v53  ;;  %v2047_v15 = vmax.f32 %v1494_v17, 0.0  ;;  %v1497_v21 = vpop.f32.mrb[12].mxu0 }
 0x107   : > { %344 = vst.msk [vmem:[%s4270_s25 + $0x70] sm:$0xff] %vm329_vm2, %v5740_v53  ;;  %345 = vst.msk [vmem:[%s4270_s25 + $0x78] sm:$0xff] %vm329_vm2, %v5740_v53  ;;  %2526 = vadd.xlane.f32.xlu0 %v2525_v12  ;;  %v1499_v37 = vpop.f32.mrb[13].mxu0 }
 0x108   : > { %346 = vst.msk [vmem:[%s4270_s25 + $0x80] sm:$0xff] %vm329_vm2, %v5740_v53  ;;  %347 = vst.msk [vmem:[%s4270_s25 + $0x88] sm:$0xff] %vm329_vm2, %v5740_v53  ;;  %2667 = vadd.xlane.f32.xlu1 %v2666_v25 }
 0x109   : > { %348 = vst.msk [vmem:[%s4270_s25 + $0x90] sm:$0xff] %vm329_vm2, %v5740_v53  ;;  %349 = vst.msk [vmem:[%s4270_s25 + $0x98] sm:$0xff] %vm329_vm2, %v5740_v53 }
 0x10a   : > { %350 = vst.msk [vmem:[%s4270_s25 + $0xa0] sm:$0xff] %vm329_vm2, %v5740_v53  ;;  %351 = vst.msk [vmem:[%s4270_s25 + $0xa8] sm:$0xff] %vm329_vm2, %v5740_v53 }
 0x10b   : > { %352 = vst.msk [vmem:[%s4270_s25 + $0xb0] sm:$0xff] %vm329_vm2, %v5740_v53  ;;  %353 = vst.msk [vmem:[%s4270_s25 + $0xb8] sm:$0xff] %vm329_vm2, %v5740_v53  ;;  %2670 = vadd.xlane.f32.xlu0 %v2669_v8 }
 0x10c   : > { %354 = vst.msk [vmem:[%s4270_s25 + $0xc0] sm:$0xff] %vm329_vm2, %v5740_v53  ;;  %355 = vst.msk [vmem:[%s4270_s25 + $0xc8] sm:$0xff] %vm329_vm2, %v5740_v53 }
 0x10d   : > { %356 = vst.msk [vmem:[%s4270_s25 + $0xd0] sm:$0xff] %vm329_vm2, %v5740_v53  ;;  %357 = vst.msk [vmem:[%s4270_s25 + $0xd8] sm:$0xff] %vm329_vm2, %v5740_v53 }
 0x10e   : > { %358 = vst.msk [vmem:[%s4270_s25 + $0xe0] sm:$0xff] %vm329_vm2, %v5740_v53  ;;  %359 = vst.msk [vmem:[%s4270_s25 + $0xe8] sm:$0xff] %vm329_vm2, %v5740_v53 }
 0x10f   : > { %360 = vst.msk [vmem:[%s4270_s25 + $0xf0] sm:$0xff] %vm329_vm2, %v5740_v53  ;;  %361 = vst.msk [vmem:[%s4270_s25 + $0xf8] sm:$0xff] %vm329_vm2, %v5740_v53 }
 0x110   : > { %362 = vst.msk [vmem:[%s4270_s25 + $0x100] sm:$0xff] %vm329_vm2, %v5740_v53  ;;  %363 = vst.msk [vmem:[%s4270_s25 + $0x108] sm:$0xff] %vm329_vm2, %v5740_v53 }
 0x111   : > { %364 = vst.msk [vmem:[%s4270_s25 + $0x110] sm:$0xff] %vm329_vm2, %v5740_v53  ;;  %365 = vst.msk [vmem:[%s4270_s25 + $0x118] sm:$0xff] %vm329_vm2, %v5740_v53 }
 0x112   : > { %366 = vst.msk [vmem:[%s4270_s25 + $0x120] sm:$0xff] %vm329_vm2, %v5740_v53  ;;  %367 = vst.msk [vmem:[%s4270_s25 + $0x128] sm:$0xff] %vm329_vm2, %v5740_v53 }
 0x113   : > { %368 = vst.msk [vmem:[%s4270_s25 + $0x130] sm:$0xff] %vm329_vm2, %v5740_v53  ;;  %369 = vst.msk [vmem:[%s4270_s25 + $0x138] sm:$0xff] %vm329_vm2, %v5740_v53 }
 0x114   : > { %370 = vst.msk [vmem:[%s4270_s25 + $0x140] sm:$0xff] %vm329_vm2, %v5740_v53  ;;  %371 = vst.msk [vmem:[%s4270_s25 + $0x148] sm:$0xff] %vm329_vm2, %v5740_v53 }
 0x115   : > { %372 = vst.msk [vmem:[%s4270_s25 + $0x150] sm:$0xff] %vm329_vm2, %v5740_v53  ;;  %373 = vst.msk [vmem:[%s4270_s25 + $0x158] sm:$0xff] %vm329_vm2, %v5740_v53 }
 0x116   : > { %374 = vst.msk [vmem:[%s4270_s25 + $0x160] sm:$0xff] %vm329_vm2, %v5740_v53  ;;  %375 = vst.msk [vmem:[%s4270_s25 + $0x168] sm:$0xff] %vm329_vm2, %v5740_v53 }
 0x117   : > { %376 = vst.msk [vmem:[%s4270_s25 + $0x170] sm:$0xff] %vm329_vm2, %v5740_v53  ;;  %377 = vst.msk [vmem:[%s4270_s25 + $0x178] sm:$0xff] %vm329_vm2, %v5740_v53 }
 0x118   : > { %378 = vst.msk [vmem:[%s4270_s25 + $0x180] sm:$0xff] %vm329_vm2, %v5740_v53  ;;  %379 = vst.msk [vmem:[%s4270_s25 + $0x188] sm:$0xff] %vm329_vm2, %v5740_v53 }
 0x119   : > { %380 = vst.msk [vmem:[%s4270_s25 + $0x190] sm:$0xff] %vm329_vm2, %v5740_v53  ;;  %381 = vst.msk [vmem:[%s4270_s25 + $0x198] sm:$0xff] %vm329_vm2, %v5740_v53 }
 0x11a   : > { %382 = vst.msk [vmem:[%s4270_s25 + $0x1a0] sm:$0xff] %vm329_vm2, %v5740_v53  ;;  %383 = vst.msk [vmem:[%s4270_s25 + $0x1a8] sm:$0xff] %vm329_vm2, %v5740_v53 }
 0x11b   : > { %384 = vst.msk [vmem:[%s4270_s25 + $0x1b0] sm:$0xff] %vm329_vm2, %v5740_v53  ;;  %385 = vst.msk [vmem:[%s4270_s25 + $0x1b8] sm:$0xff] %vm329_vm2, %v5740_v53 }
 0x11c   : > { %386 = vst.msk [vmem:[%s4270_s25 + $0x1c0] sm:$0xff] %vm329_vm2, %v5740_v53  ;;  %387 = vst.msk [vmem:[%s4270_s25 + $0x1c8] sm:$0xff] %vm329_vm2, %v5740_v53 }
 0x11d   : > { %388 = vst.msk [vmem:[%s4270_s25 + $0x1d0] sm:$0xff] %vm329_vm2, %v5740_v53  ;;  %389 = vst.msk [vmem:[%s4270_s25 + $0x1d8] sm:$0xff] %vm329_vm2, %v5740_v53 }
 0x11e   : > { %390 = vst.msk [vmem:[%s4270_s25 + $0x1e0] sm:$0xff] %vm329_vm2, %v5740_v53  ;;  %391 = vst.msk [vmem:[%s4270_s25 + $0x1e8] sm:$0xff] %vm329_vm2, %v5740_v53 }
 0x11f   : > { %392 = vst.msk [vmem:[%s4270_s25 + $0x1f0] sm:$0xff] %vm329_vm2, %v5740_v53  ;;  %393 = vst.msk [vmem:[%s4270_s25 + $0x1f8] sm:$0xff] %vm329_vm2, %v5740_v53 }
 0x120   : > { %394 = vst.msk [vmem:[%s4270_s25 + $0x200] sm:$0xff] %vm329_vm2, %v5740_v53  ;;  %395 = vst.msk [vmem:[%s4270_s25 + $0x208] sm:$0xff] %vm329_vm2, %v5740_v53 }
 0x121   : > { %396 = vst.msk [vmem:[%s4270_s25 + $0x210] sm:$0xff] %vm329_vm2, %v5740_v53  ;;  %397 = vst.msk [vmem:[%s4270_s25 + $0x218] sm:$0xff] %vm329_vm2, %v5740_v53 }
 0x122   : > { %398 = vst.msk [vmem:[%s4270_s25 + $0x220] sm:$0xff] %vm329_vm2, %v5740_v53  ;;  %399 = vst.msk [vmem:[%s4270_s25 + $0x228] sm:$0xff] %vm329_vm2, %v5740_v53 }
 0x123   : > { %400 = vst.msk [vmem:[%s4270_s25 + $0x230] sm:$0xff] %vm329_vm2, %v5740_v53  ;;  %401 = vst.msk [vmem:[%s4270_s25 + $0x238] sm:$0xff] %vm329_vm2, %v5740_v53 }
 0x124   : > { %402 = vst.msk [vmem:[%s4270_s25 + $0x240] sm:$0xff] %vm329_vm2, %v5740_v53  ;;  %403 = vst.msk [vmem:[%s4270_s25 + $0x248] sm:$0xff] %vm329_vm2, %v5740_v53 }
 0x125   : > { %404 = vst.msk [vmem:[%s4270_s25 + $0x250] sm:$0xff] %vm329_vm2, %v5740_v53  ;;  %405 = vst.msk [vmem:[%s4270_s25 + $0x258] sm:$0xff] %vm329_vm2, %v5740_v53 }
 0x126   : > { %406 = vst.msk [vmem:[%s4270_s25 + $0x260] sm:$0xff] %vm329_vm2, %v5740_v53  ;;  %407 = vst.msk [vmem:[%s4270_s25 + $0x268] sm:$0xff] %vm329_vm2, %v5740_v53 }
 0x127   : > { %408 = vst.msk [vmem:[%s4270_s25 + $0x270] sm:$0xff] %vm329_vm2, %v5740_v53  ;;  %409 = vst.msk [vmem:[%s4270_s25 + $0x278] sm:$0xff] %vm329_vm2, %v5740_v53 }
 0x128   : > { %410 = vst.msk [vmem:[%s4270_s25 + $0x280] sm:$0xff] %vm329_vm2, %v5740_v53  ;;  %411 = vst.msk [vmem:[%s4270_s25 + $0x288] sm:$0xff] %vm329_vm2, %v5740_v53 }
 0x129   : > { %412 = vst.msk [vmem:[%s4270_s25 + $0x290] sm:$0xff] %vm329_vm2, %v5740_v53  ;;  %413 = vst.msk [vmem:[%s4270_s25 + $0x298] sm:$0xff] %vm329_vm2, %v5740_v53 }
 0x12a   : > { %414 = vst.msk [vmem:[%s4270_s25 + $0x2a0] sm:$0xff] %vm329_vm2, %v5740_v53  ;;  %415 = vst.msk [vmem:[%s4270_s25 + $0x2a8] sm:$0xff] %vm329_vm2, %v5740_v53 }
 0x12b   : > { %416 = vst.msk [vmem:[%s4270_s25 + $0x2b0] sm:$0xff] %vm329_vm2, %v5740_v53  ;;  %417 = vst.msk [vmem:[%s4270_s25 + $0x2b8] sm:$0xff] %vm329_vm2, %v5740_v53 }
 0x12c   : > { %418 = vst.msk [vmem:[%s4270_s25 + $0x2c0] sm:$0xff] %vm329_vm2, %v5740_v53  ;;  %419 = vst.msk [vmem:[%s4270_s25 + $0x2c8] sm:$0xff] %vm329_vm2, %v5740_v53 }
 0x12d   : > { %420 = vst.msk [vmem:[%s4270_s25 + $0x2d0] sm:$0xff] %vm329_vm2, %v5740_v53  ;;  %421 = vst.msk [vmem:[%s4270_s25 + $0x2d8] sm:$0xff] %vm329_vm2, %v5740_v53 }
 0x12e   : > { %422 = vst.msk [vmem:[%s4270_s25 + $0x2e0] sm:$0xff] %vm329_vm2, %v5740_v53  ;;  %423 = vst.msk [vmem:[%s4270_s25 + $0x2e8] sm:$0xff] %vm329_vm2, %v5740_v53 }
 0x12f   : > { %424 = vst.msk [vmem:[%s4270_s25 + $0x2f0] sm:$0xff] %vm329_vm2, %v5740_v53  ;;  %425 = vst.msk [vmem:[%s4270_s25 + $0x2f8] sm:$0xff] %vm329_vm2, %v5740_v53 }
 0x130   : > { %2235 = vst [vmem:[%s4232_s14 + $0x38] sm:$0xff] %v2043_v14  ;;  %2330 = vst [vmem:[%s4232_s14 + $0x330] sm:$0xff] %v2138_v22  ;;  %v2045_v14 = vmax.f32 %v1488_v36, 0.0  ;;  %v2141_v22 = vmax.f32 %v1776_v48, 0.0  ;;  %v1785_v48 = vpop.f32.mrb[12].mxu1 }
 0x131   : > { %2328 = vst [vmem:[%s4232_s14 + $0x320] sm:$0xff] %v2136_v43  ;;  %2329 = vst [vmem:[%s4232_s14 + $0x328] sm:$0xff] %v2137_v9  ;;  %v892_v43 = vpop.permute.xlu0 %891 }
 0x132   : > { %2331 = vst [vmem:[%s4232_s14 + $0x338] sm:$0xff] %v2139_v18  ;;  %2236 = vst [vmem:[%s4232_s14 + $0x40] sm:$0xff] %v2044_v29  ;;  %v1492_v18 = vadd.f32 %v1491_v28, %v4034_v20  ;;  %v2528_v53 = vadd.f32 %v2045_v14, %v2044_v29  ;;  %v4630_v9 = vadd.f32 %v2141_v22, %v2140_v40  ;;  %v2143_v29 = vmax.f32 %v1782_v30, 0.0  ;;  %v1503_v30 = vpop.f32.mrb[14].mxu0 }
 0x133   : > { %2237 = vst [vmem:[%s4232_s14 + $0x48] sm:$0xff] %v2045_v14  ;;  %2332 = vst [vmem:[%s4232_s14 + $0x340] sm:$0xff] %v2140_v40  ;;  %v1498_v20 = vadd.f32 %v1497_v21, %v4048_v27  ;;  %v1786_v46 = vadd.f32 %v1785_v48, %v892_v43  ;;  %v1787_v14 = vpop.f32.mrb[13].mxu1  ;;  %v1500_v40 = vadd.f32 %v1499_v37, %v4048_v27  ;;  %v1505_v27 = vpop.f32.mrb[15].mxu0 }
 0x134   : > { %2333 = vst [vmem:[%s4232_s14 + $0x348] sm:$0xff] %v2141_v22  ;;  %v2046_v36 = vmax.f32 %v1492_v18, 0.0  ;;  %2334 = vst [vmem:[%s4232_s14 + $0x350] sm:$0xff] %v2142_v10  ;;  %v2675_v19 = vadd.f32 %v2143_v29, %v2142_v10  ;;  %v1788_v22 = vadd.f32 %v1787_v14, %v892_v43  ;;  %v4638_v18 = vpop.permute.xlu1 %906  ;;  %v1791_v21 = vpop.f32.mrb[14].mxu1  ;;  %2529 = vadd.xlane.f32.xlu1 %v2528_v53 }
 0x135   : > { %2239 = vst [vmem:[%s4232_s14 + $0x58] sm:$0xff] %v2047_v15  ;;  %2335 = vst [vmem:[%s4232_s14 + $0x358] sm:$0xff] %v2143_v29  ;;  %v902_v12 = vpop.permute.xlu0 %901  ;;  %v2048_v47 = vmax.f32 %v1498_v20, 0.0  ;;  %v2144_v54 = vmax.f32 %v1786_v46, 0.0  ;;  %v2049_v1 = vmax.f32 %v1500_v40, 0.0  ;;  %v1792_v10 = vadd.f32 %v1791_v21, %v897_v35  ;;  %v1793_v43 = vpop.f32.mrb[15].mxu1 }
 0x136   : > { %2238 = vst [vmem:[%s4232_s14 + $0x50] sm:$0xff] %v2046_v36  ;;  %v2531_v28 = vadd.f32 %v2047_v15, %v2046_v36  ;;  %v2145_v17 = vmax.f32 %v1788_v22, 0.0  ;;  %v1504_v36 = vadd.f32 %v1503_v30, %v4046_v26  ;;  %v1506_v29 = vadd.f32 %v1505_v27, %v4046_v26  ;;  %v1509_v22 = vpop.f32.mrb[16].mxu0 }
 0x137   : > { %2240 = vst [vmem:[%s4232_s14 + $0x60] sm:$0xff] %v2048_v47  ;;  %2336 = vst [vmem:[%s4232_s14 + $0x360] sm:$0xff] %v2144_v54  ;;  %v2534_v25 = vadd.f32 %v2049_v1, %v2048_v47  ;;  %v1794_v48 = vadd.f32 %v1793_v43, %v897_v35  ;;  %v2146_v37 = vmax.f32 %v1792_v10, 0.0  ;;  %v1797_v47 = vpop.f32.mrb[16].mxu1  ;;  %v1511_v35 = vpop.f32.mrb[17].mxu0 }
 0x138   : > { %2241 = vst [vmem:[%s4232_s14 + $0x68] sm:$0xff] %v2049_v1  ;;  %2337 = vst [vmem:[%s4232_s14 + $0x368] sm:$0xff] %v2145_v17  ;;  %v4645_v15 = vadd.f32 %v2145_v17, %v2144_v54  ;;  %v4648_v8 = vpop.permute.xlu1 %916  ;;  %v2050_v46 = vmax.f32 %v1504_v36, 0.0  ;;  %v2051_v14 = vmax.f32 %v1506_v29, 0.0  ;;  %2532 = vadd.xlane.f32.xlu0 %v2531_v28  ;;  %v1510_v54 = vadd.f32 %v1509_v22, %v4060_v33  ;;  %v1799_v53 = vpop.f32.mrb[17].mxu1 }
 0x139   : > { %v4650_v20 = vpop.permute.xlu0 %911  ;;  %v2147_v40 = vmax.f32 %v1794_v48, 0.0  ;;  %2338 = vst [vmem:[%s4232_s14 + $0x370] sm:$0xff] %v2146_v37  ;;  %v1798_v26 = vadd.f32 %v1797_v47, %v902_v12  ;;  %v1512_v30 = vadd.f32 %v1511_v35, %v4060_v33  ;;  %v1800_v21 = vadd.f32 %v1799_v53, %v902_v12  ;;  %2673 = vadd.xlane.f32.xlu1 %v4630_v9  ;;  %v1515_v48 = vpop.f32.mrb[18].mxu0 }
 0x13a   : > { %2242 = vst [vmem:[%s4232_s14 + $0x70] sm:$0xff] %v2050_v46  ;;  %2243 = vst [vmem:[%s4232_s14 + $0x78] sm:$0xff] %v2051_v14  ;;  %v2537_v1 = vadd.f32 %v2051_v14, %v2050_v46  ;;  %v2052_v10 = vmax.f32 %v1510_v54, 0.0  ;;  %v1803_v46 = vpop.f32.mrb[18].mxu1  ;;  %v1516_v33 = vadd.f32 %v1515_v48, %v4058_v32  ;;  %v1517_v9 = vpop.f32.mrb[19].mxu0 }
 0x13b   : > { %2339 = vst [vmem:[%s4232_s14 + $0x378] sm:$0xff] %v2147_v40  ;;  %v2681_v17 = vadd.f32 %v2147_v40, %v2146_v37  ;;  %v2148_v27 = vmax.f32 %v1798_v26, 0.0  ;;  %v2053_v43 = vmax.f32 %v1512_v30, 0.0  ;;  %v2149_v29 = vmax.f32 %v1800_v21, 0.0  ;;  %v1805_v37 = vpop.f32.mrb[19].mxu1  ;;  %v1521_v21 = vpop.f32.mrb[20].mxu0 }
 0x13c   : > { %v4659_v28 = vpop.permute.xlu1 %926  ;;  %2676 = vadd.xlane.f32.xlu0 %v2675_v19  ;;  %2244 = vst [vmem:[%s4232_s14 + $0x80] sm:$0xff] %v2052_v10  ;;  %v1804_v12 = vadd.f32 %v1803_v46, %v4638_v18  ;;  %v1518_v22 = vadd.f32 %v1517_v9, %v4058_v32  ;;  %v1806_v47 = vadd.f32 %v1805_v37, %v4638_v18  ;;  %v2054_v26 = vmax.f32 %v1516_v33, 0.0 }
 0x13d   : > { %v4661_v36 = vpop.permute.xlu0 %921  ;;  %2340 = vst [vmem:[%s4232_s14 + $0x380] sm:$0xff] %v2148_v27  ;;  %2245 = vst [vmem:[%s4232_s14 + $0x88] sm:$0xff] %v2053_v43  ;;  %v2540_v14 = vadd.f32 %v2053_v43, %v2052_v10  ;;  %v4669_v40 = vadd.f32 %v2149_v29, %v2148_v27  ;;  %2535 = vadd.xlane.f32.xlu1 %v2534_v25  ;;  %v1809_v10 = vpop.f32.mrb[20].mxu1  ;;  %v1522_v32 = vadd.f32 %v1521_v21, %v4072_v39 }
 0x13e   : > { %2341 = vst [vmem:[%s4232_s14 + $0x388] sm:$0xff] %v2149_v29  ;;  %v2150_v35 = vmax.f32 %v1804_v12, 0.0  ;;  %v2055_v53 = vmax.f32 %v1518_v22, 0.0  ;;  %v2151_v30 = vmax.f32 %v1806_v47, 0.0  ;;  %2246 = vst [vmem:[%s4232_s14 + $0x90] sm:$0xff] %v2054_v26  ;;  %v1810_v18 = vadd.f32 %v1809_v10, %v4650_v20  ;;  %v1523_v25 = vpop.f32.mrb[21].mxu0 }
 0x13f   : > { %v1811_v27 = vpop.f32.mrb[21].mxu1  ;;  %v1524_v48 = vadd.f32 %v1523_v25, %v4072_v39  ;;  %v2056_v12 = vmax.f32 %v1522_v32, 0.0  ;;  %v1527_v47 = vpop.f32.mrb[22].mxu0 }
 0x140   : > { %v4673_v19 = vpop.permute.xlu1 %936  ;;  %2538 = vadd.xlane.f32.xlu0 %v2537_v1  ;;  %2342 = vst [vmem:[%s4232_s14 + $0x390] sm:$0xff] %v2150_v35  ;;  %2247 = vst [vmem:[%s4232_s14 + $0x98] sm:$0xff] %v2055_v53  ;;  %v2543_v43 = vadd.f32 %v2055_v53, %v2054_v26  ;;  %v2687_v29 = vadd.f32 %v2151_v30, %v2150_v35  ;;  %v1812_v46 = vadd.f32 %v1811_v27, %v4650_v20  ;;  %v1815_v26 = vpop.f32.mrb[22].mxu1 }
 0x141   : > { %v4675_v54 = vpop.permute.xlu0 %931  ;;  %2343 = vst [vmem:[%s4232_s14 + $0x398] sm:$0xff] %v2151_v30  ;;  %2679 = vadd.xlane.f32.xlu1 %v4645_v15  ;;  %v2152_v9 = vmax.f32 %v1810_v18, 0.0  ;;  %v2057_v37 = vmax.f32 %v1524_v48, 0.0  ;;  %2248 = vst [vmem:[%s4232_s14 + $0xa0] sm:$0xff] %v2056_v12  ;;  %v1528_v39 = vadd.f32 %v1527_v47, %v4070_v38  ;;  %v1816_v20 = vadd.f32 %v1815_v26, %v4648_v8  ;;  %v1529_v15 = vpop.f32.mrb[23].mxu0 }
 0x142   : > { %v2153_v22 = vmax.f32 %v1812_v46, 0.0  ;;  %v1817_v35 = vpop.f32.mrb[23].mxu1  ;;  %v1530_v21 = vadd.f32 %v1529_v15, %v4070_v38  ;;  %v1533_v46 = vpop.f32.mrb[24].mxu0 }
 0x143   : > { %2344 = vst [vmem:[%s4232_s14 + $0x3a0] sm:$0xff] %v2152_v9  ;;  %2249 = vst [vmem:[%s4232_s14 + $0xa8] sm:$0xff] %v2057_v37  ;;  %v2546_v53 = vadd.f32 %v2057_v37, %v2056_v12  ;;  %v1818_v10 = vadd.f32 %v1817_v35, %v4648_v8  ;;  %v2058_v18 = vmax.f32 %v1528_v39, 0.0  ;;  %v2154_v25 = vmax.f32 %v1816_v20, 0.0  ;;  %v1821_v12 = vpop.f32.mrb[24].mxu1 }
 0x144   : > { %v4686_v1 = vpop.permute.xlu1 %946  ;;  %2682 = vadd.xlane.f32.xlu0 %v2681_v17  ;;  %2345 = vst [vmem:[%s4232_s14 + $0x3a8] sm:$0xff] %v2153_v22  ;;  %v4696_v30 = vadd.f32 %v2153_v22, %v2152_v9  ;;  %v2059_v27 = vmax.f32 %v1530_v21, 0.0  ;;  %v1534_v38 = vadd.f32 %v1533_v46, %v4084_v45  ;;  %v1822_v8 = vadd.f32 %v1821_v12, %v4661_v36  ;;  %v1823_v9 = vpop.f32.mrb[25].mxu1 }
 0x145   : > { %v4688_v33 = vpop.permute.xlu0 %941  ;;  %2541 = vadd.xlane.f32.xlu1 %v2540_v14  ;;  %v2155_v48 = vmax.f32 %v1818_v10, 0.0  ;;  %2250 = vst [vmem:[%s4232_s14 + $0xb0] sm:$0xff] %v2058_v18  ;;  %2346 = vst [vmem:[%s4232_s14 + $0x3b0] sm:$0xff] %v2154_v25  ;;  %v1535_v14 = vpop.f32.mrb[25].mxu0  ;;  %v1824_v26 = vadd.f32 %v1823_v9, %v4661_v36 }
 0x146   : > { %2251 = vst [vmem:[%s4232_s14 + $0xb8] sm:$0xff] %v2059_v27  ;;  %v2549_v37 = vadd.f32 %v2059_v27, %v2058_v18  ;;  %v1536_v47 = vadd.f32 %v1535_v14, %v4084_v45  ;;  %v2060_v39 = vmax.f32 %v1534_v38, 0.0  ;;  %v2156_v20 = vmax.f32 %v1822_v8, 0.0  ;;  %v1539_v10 = vpop.f32.mrb[26].mxu0  ;;  %v1827_v18 = vpop.f32.mrb[26].mxu1 }
 0x147   : > { %2347 = vst [vmem:[%s4232_s14 + $0x3b8] sm:$0xff] %v2155_v48  ;;  %v2693_v22 = vadd.f32 %v2155_v48, %v2154_v25  ;;  %v2157_v21 = vmax.f32 %v1824_v26, 0.0  ;;  %v1540_v45 = vadd.f32 %v1539_v10, %v4082_v44  ;;  %v1828_v36 = vadd.f32 %v1827_v18, %v4659_v28  ;;  %v1829_v25 = vpop.f32.mrb[27].mxu1 }
 0x148   : > { %v4700_v17 = vpop.permute.xlu1 %956  ;;  %2544 = vadd.xlane.f32.xlu0 %v2543_v43  ;;  %v2061_v35 = vmax.f32 %v1536_v47, 0.0  ;;  %2252 = vst [vmem:[%s4232_s14 + $0xc0] sm:$0xff] %v2060_v39  ;;  %2348 = vst [vmem:[%s4232_s14 + $0x3c0] sm:$0xff] %v2156_v20  ;;  %v1830_v12 = vadd.f32 %v1829_v25, %v4659_v28  ;;  %v1833_v26 = vpop.f32.mrb[28].mxu1 }
 0x149   : > { %v4702_v32 = vpop.permute.xlu0 %951  ;;  %2685 = vadd.xlane.f32.xlu1 %v4669_v40  ;;  %v1541_v40 = vpop.f32.mrb[27].mxu0  ;;  %2349 = vst [vmem:[%s4232_s14 + $0x3c8] sm:$0xff] %v2157_v21  ;;  %v4723_v48 = vadd.f32 %v2157_v21, %v2156_v20  ;;  %v2062_v38 = vmax.f32 %v1540_v45, 0.0  ;;  %v2158_v8 = vmax.f32 %v1828_v36, 0.0 }
 0x14a   : > { %2253 = vst [vmem:[%s4232_s14 + $0xc8] sm:$0xff] %v2061_v35  ;;  %v2552_v27 = vadd.f32 %v2061_v35, %v2060_v39  ;;  %v1542_v46 = vadd.f32 %v1541_v40, %v4082_v44  ;;  %v2159_v9 = vmax.f32 %v1830_v12, 0.0  ;;  %v1545_v47 = vpop.f32.mrb[28].mxu0  ;;  %v1834_v44 = vadd.f32 %v1833_v26, %v4675_v54  ;;  %v1835_v28 = vpop.f32.mrb[29].mxu1 }
 0x14b   : > { %2254 = vst [vmem:[%s4232_s14 + $0xd0] sm:$0xff] %v2062_v38  ;;  %2350 = vst [vmem:[%s4232_s14 + $0x3d0] sm:$0xff] %v2158_v8  ;;  %v1546_v39 = vadd.f32 %v1545_v47, %v4096_v51  ;;  %v1547_v20 = vpop.f32.mrb[29].mxu0  ;;  %v1836_v10 = vadd.f32 %v1835_v28, %v4675_v54  ;;  %v1839_v12 = vpop.f32.mrb[30].mxu1 }
 0x14c   : > { %v4715_v15 = vpop.permute.xlu1 %966  ;;  %2688 = vadd.xlane.f32.xlu0 %v2687_v29  ;;  %v2063_v14 = vmax.f32 %v1542_v46, 0.0  ;;  %2351 = vst [vmem:[%s4232_s14 + $0x3d8] sm:$0xff] %v2159_v9  ;;  %v2699_v35 = vadd.f32 %v2159_v9, %v2158_v8  ;;  %v1548_v21 = vadd.f32 %v1547_v20, %v4096_v51  ;;  %v2160_v45 = vmax.f32 %v1834_v44, 0.0  ;;  %v1551_v46 = vpop.f32.mrb[30].mxu0 }
 0x14d   : > { %v4713_v43 = vpop.permute.xlu0 %961  ;;  %2547 = vadd.xlane.f32.xlu1 %v2546_v53  ;;  %v2064_v18 = vmax.f32 %v1546_v39, 0.0  ;;  %v2161_v25 = vmax.f32 %v1836_v10, 0.0  ;;  %v1552_v51 = vadd.f32 %v1551_v46, %v4094_v50  ;;  %v1840_v54 = vadd.f32 %v1839_v12, %v4673_v19 }
 0x14e   : > { %2255 = vst [vmem:[%s4232_s14 + $0xd8] sm:$0xff] %v2063_v14  ;;  %v2555_v53 = vadd.f32 %v2063_v14, %v2062_v38  ;;  %v2065_v40 = vmax.f32 %v1548_v21, 0.0  ;;  %2352 = vst [vmem:[%s4232_s14 + $0x3e0] sm:$0xff] %v2160_v45  ;;  %v1841_v38 = vpop.f32.mrb[31].mxu1 }
 0x14f   : > { %2256 = vst [vmem:[%s4232_s14 + $0xe0] sm:$0xff] %v2064_v18  ;;  %2353 = vst [vmem:[%s4232_s14 + $0x3e8] sm:$0xff] %v2161_v25  ;;  %v4748_v14 = vadd.f32 %v2161_v25, %v2160_v45  ;;  %v2066_v47 = vmax.f32 %v1552_v51, 0.0  ;;  %v2162_v26 = vmax.f32 %v1840_v54, 0.0  ;;  %v1845_v28 = vpop.f32.mrb[32].mxu1 }
 0x150   : > { %2550 = vadd.xlane.f32.xlu0 %v2549_v37  ;;  %v4738_v37 = vpop.permute.xlu1 %976  ;;  %2257 = vst [vmem:[%s4232_s14 + $0xe8] sm:$0xff] %v2065_v40  ;;  %v2558_v8 = vadd.f32 %v2065_v40, %v2064_v18  ;;  %v1846_v10 = vadd.f32 %v1845_v28, %v4688_v33 }
 0x151   : > { %v4727_v29 = vpop.permute.xlu0 %971  ;;  %2691 = vadd.xlane.f32.xlu1 %v4696_v30  ;;  %v1553_v30 = vpop.f32.mrb[31].mxu0  ;;  %2258 = vst [vmem:[%s4232_s14 + $0xf0] sm:$0xff] %v2066_v47  ;;  %2354 = vst [vmem:[%s4232_s14 + $0x3f0] sm:$0xff] %v2162_v26 }
 0x152   : > { %v1554_v9 = vadd.f32 %v1553_v30, %v4094_v50  ;;  %v1557_v20 = vpop.f32.mrb[32].mxu0  ;;  %v1847_v50 = vpop.f32.mrb[33].mxu1  ;;  %v2164_v12 = vmax.f32 %v1846_v10, 0.0 }
 0x153   : > { %v1558_v21 = vadd.f32 %v1557_v20, %v4108_v57  ;;  %v1559_v18 = vpop.f32.mrb[33].mxu0  ;;  %v1848_v40 = vadd.f32 %v1847_v50, %v4688_v33 }
 0x154   : > { %2694 = vadd.xlane.f32.xlu0 %v2693_v22  ;;  %v1842_v22 = vadd.f32 %v1841_v38, %v4673_v19  ;;  %v2067_v39 = vmax.f32 %v1554_v9, 0.0  ;;  %v1560_v45 = vadd.f32 %v1559_v18, %v4108_v57  ;;  %v1563_v30 = vpop.f32.mrb[34].mxu0  ;;  %v1851_v38 = vpop.f32.mrb[34].mxu1  ;;  %2356 = vst [vmem:[%s4232_s14 + $0x400] sm:$0xff] %v2164_v12 }
 0x155   : > { %v4740_v36 = vpop.permute.xlu0 %981  ;;  %2553 = vadd.xlane.f32.xlu1 %v2552_v27  ;;  %v2068_v46 = vmax.f32 %v1558_v21, 0.0  ;;  %v2165_v54 = vmax.f32 %v1848_v40, 0.0  ;;  %v1564_v57 = vadd.f32 %v1563_v30, %v4106_v56  ;;  %v1852_v33 = vadd.f32 %v1851_v38, %v4686_v1  ;;  %v1853_v9 = vpop.f32.mrb[35].mxu1 }
 0x156   : > { %v2163_v44 = vmax.f32 %v1842_v22, 0.0  ;;  %2259 = vst [vmem:[%s4232_s14 + $0xf8] sm:$0xff] %v2067_v39  ;;  %v2561_v19 = vadd.f32 %v2067_v39, %v2066_v47  ;;  %v2069_v51 = vmax.f32 %v1560_v45, 0.0  ;;  %v1857_v10 = vpop.f32.mrb[36].mxu1 }
 0x157   : > { %2260 = vst [vmem:[%s4232_s14 + $0x100] sm:$0xff] %v2068_v46  ;;  %2357 = vst [vmem:[%s4232_s14 + $0x408] sm:$0xff] %v2165_v54  ;;  %v4771_v47 = vadd.f32 %v2165_v54, %v2164_v12  ;;  %v2070_v39 = vmax.f32 %v1564_v57, 0.0  ;;  %v1858_v50 = vadd.f32 %v1857_v10, %v4702_v32 }
 0x158   : > { %2556 = vadd.xlane.f32.xlu0 %v2555_v53  ;;  %2355 = vst [vmem:[%s4232_s14 + $0x3f8] sm:$0xff] %v2163_v44  ;;  %v2705_v27 = vadd.f32 %v2163_v44, %v2162_v26  ;;  %v4761_v53 = vpop.permute.xlu1 %986  ;;  %2261 = vst [vmem:[%s4232_s14 + $0x108] sm:$0xff] %v2069_v51  ;;  %v2564_v22 = vadd.f32 %v2069_v51, %v2068_v46  ;;  %v2166_v44 = vmax.f32 %v1852_v33, 0.0 }
 0x159   : > { %2697 = vadd.xlane.f32.xlu1 %v4723_v48  ;;  %v4763_v25 = vpop.permute.xlu0 %991  ;;  %v1565_v48 = vpop.f32.mrb[35].mxu0  ;;  %2262 = vst [vmem:[%s4232_s14 + $0x110] sm:$0xff] %v2070_v39  ;;  %v2168_v54 = vmax.f32 %v1858_v50, 0.0 }
 0x15a   : > { %v1566_v26 = vadd.f32 %v1565_v48, %v4106_v56  ;;  %v1569_v21 = vpop.f32.mrb[36].mxu0  ;;  %2358 = vst [vmem:[%s4232_s14 + $0x410] sm:$0xff] %v2166_v44  ;;  %v1859_v56 = vpop.f32.mrb[37].mxu1 }
 0x15b   : > { %v1570_v18 = vadd.f32 %v1569_v21, %v4120_v63  ;;  %v1571_v45 = vpop.f32.mrb[37].mxu0  ;;  %v1860_v46 = vadd.f32 %v1859_v56, %v4702_v32  ;;  %v1863_v33 = vpop.f32.mrb[38].mxu1  ;;  %2360 = vst [vmem:[%s4232_s14 + $0x420] sm:$0xff] %v2168_v54 }
 0x15c   : > { %2700 = vadd.xlane.f32.xlu0 %v2699_v35  ;;  %v1854_v35 = vadd.f32 %v1853_v9, %v4686_v1  ;;  %v2071_v20 = vmax.f32 %v1566_v26, 0.0  ;;  %v1572_v40 = vadd.f32 %v1571_v45, %v4120_v63  ;;  %v1575_v57 = vpop.f32.mrb[38].mxu0  ;;  %v1864_v32 = vadd.f32 %v1863_v33, %v4700_v17  ;;  %v1865_v48 = vpop.f32.mrb[39].mxu1 }
 0x15d   : > { %2559 = vadd.xlane.f32.xlu1 %v2558_v8  ;;  %v4786_v12 = vpop.permute.xlu0 %1001  ;;  %v2072_v51 = vmax.f32 %v1570_v18, 0.0  ;;  %v2169_v38 = vmax.f32 %v1860_v46, 0.0  ;;  %v1576_v63 = vadd.f32 %v1575_v57, %v4118_v62  ;;  %v1869_v10 = vpop.f32.mrb[40].mxu1 }
 0x15e   : > { %v2167_v28 = vmax.f32 %v1854_v35, 0.0  ;;  %2263 = vst [vmem:[%s4232_s14 + $0x118] sm:$0xff] %v2071_v20  ;;  %v2567_v1 = vadd.f32 %v2071_v20, %v2070_v39  ;;  %v2073_v30 = vmax.f32 %v1572_v40, 0.0  ;;  %v1870_v50 = vadd.f32 %v1869_v10, %v4713_v43 }
 0x15f   : > { %2264 = vst [vmem:[%s4232_s14 + $0x120] sm:$0xff] %v2072_v51  ;;  %2361 = vst [vmem:[%s4232_s14 + $0x428] sm:$0xff] %v2169_v38  ;;  %v4794_v26 = vadd.f32 %v2169_v38, %v2168_v54  ;;  %v2074_v39 = vmax.f32 %v1576_v63, 0.0 }
 0x160   : > { %2562 = vadd.xlane.f32.xlu0 %v2561_v19  ;;  %2359 = vst [vmem:[%s4232_s14 + $0x418] sm:$0xff] %v2167_v28  ;;  %v2711_v8 = vadd.f32 %v2167_v28, %v2166_v44  ;;  %v4784_v19 = vpop.permute.xlu1 %996  ;;  %2265 = vst [vmem:[%s4232_s14 + $0x128] sm:$0xff] %v2073_v30  ;;  %v2570_v9 = vadd.f32 %v2073_v30, %v2072_v51  ;;  %v2170_v44 = vmax.f32 %v1864_v32, 0.0  ;;  %v2172_v54 = vmax.f32 %v1870_v50, 0.0 }
 0x161   : > { %2703 = vadd.xlane.f32.xlu1 %v4748_v14  ;;  %v1577_v14 = vpop.f32.mrb[39].mxu0  ;;  %2266 = vst [vmem:[%s4232_s14 + $0x130] sm:$0xff] %v2074_v39  ;;  %v4809_v46 = vpop.permute.xlu0 %1011 }
 0x162   : > { %v1578_v35 = vadd.f32 %v1577_v14, %v4118_v62  ;;  %v1581_v21 = vpop.f32.mrb[40].mxu0  ;;  %2362 = vst [vmem:[%s4232_s14 + $0x430] sm:$0xff] %v2170_v44  ;;  %v1871_v62 = vpop.f32.mrb[41].mxu1  ;;  %2364 = vst [vmem:[%s4232_s14 + $0x440] sm:$0xff] %v2172_v54 }
 0x163   : > { %v1582_v18 = vadd.f32 %v1581_v21, %v4132_v6  ;;  %v1583_v45 = vpop.f32.mrb[41].mxu0  ;;  %v1872_v40 = vadd.f32 %v1871_v62, %v4713_v43  ;;  %v1875_v33 = vpop.f32.mrb[42].mxu1 }
 0x164   : > { %2706 = vadd.xlane.f32.xlu0 %v2705_v27  ;;  %v1866_v27 = vadd.f32 %v1865_v48, %v4700_v17  ;;  %v2075_v20 = vmax.f32 %v1578_v35, 0.0  ;;  %v1584_v56 = vadd.f32 %v1583_v45, %v4132_v6  ;;  %v1587_v57 = vpop.f32.mrb[42].mxu0  ;;  %v1876_v43 = vadd.f32 %v1875_v33, %v4715_v15  ;;  %v1877_v63 = vpop.f32.mrb[43].mxu1 }
 0x165   : > { %2565 = vadd.xlane.f32.xlu1 %v2564_v22  ;;  %v2076_v51 = vmax.f32 %v1582_v18, 0.0  ;;  %v2173_v38 = vmax.f32 %v1872_v40, 0.0  ;;  %v1588_v6 = vadd.f32 %v1587_v57, %v4130_v5 }
 0x166   : > { %v2171_v28 = vmax.f32 %v1866_v27, 0.0  ;;  %2267 = vst [vmem:[%s4232_s14 + $0x138] sm:$0xff] %v2075_v20  ;;  %v2573_v17 = vadd.f32 %v2075_v20, %v2074_v39  ;;  %v2077_v30 = vmax.f32 %v1584_v56, 0.0  ;;  %v2174_v27 = vmax.f32 %v1876_v43, 0.0 }
 0x167   : > { %2268 = vst [vmem:[%s4232_s14 + $0x140] sm:$0xff] %v2076_v51  ;;  %2365 = vst [vmem:[%s4232_s14 + $0x448] sm:$0xff] %v2173_v38  ;;  %v4817_v14 = vadd.f32 %v2173_v38, %v2172_v54  ;;  %v2078_v35 = vmax.f32 %v1588_v6, 0.0 }
 0x168   : > { %2568 = vadd.xlane.f32.xlu0 %v2567_v1  ;;  %2363 = vst [vmem:[%s4232_s14 + $0x438] sm:$0xff] %v2171_v28  ;;  %v2717_v22 = vadd.f32 %v2171_v28, %v2170_v44  ;;  %v4807_v1 = vpop.permute.xlu1 %1006  ;;  %2269 = vst [vmem:[%s4232_s14 + $0x148] sm:$0xff] %v2077_v30  ;;  %v2576_v32 = vadd.f32 %v2077_v30, %v2076_v51  ;;  %v1881_v28 = vpop.f32.mrb[44].mxu1 }
 0x169   : > { %2709 = vadd.xlane.f32.xlu1 %v4771_v47  ;;  %v1589_v47 = vpop.f32.mrb[43].mxu0  ;;  %2270 = vst [vmem:[%s4232_s14 + $0x150] sm:$0xff] %v2078_v35  ;;  %2366 = vst [vmem:[%s4232_s14 + $0x450] sm:$0xff] %v2174_v27  ;;  %v1882_v10 = vadd.f32 %v1881_v28, %v4727_v29 }
 0x16a   : > { %v1590_v48 = vadd.f32 %v1589_v47, %v4130_v5  ;;  %v1593_v20 = vpop.f32.mrb[44].mxu0  ;;  %v1883_v5 = vpop.f32.mrb[45].mxu1 }
 0x16b   : > { %v1594_v21 = vadd.f32 %v1593_v20, %v4144_v16  ;;  %v1595_v18 = vpop.f32.mrb[45].mxu0  ;;  %v1884_v45 = vadd.f32 %v1883_v5, %v4727_v29  ;;  %v2176_v40 = vmax.f32 %v1882_v10, 0.0  ;;  %v1887_v38 = vpop.f32.mrb[46].mxu1 }
 0x16c   : > { %2712 = vadd.xlane.f32.xlu0 %v2711_v8  ;;  %v1878_v8 = vadd.f32 %v1877_v63, %v4715_v15  ;;  %v2079_v39 = vmax.f32 %v1590_v48, 0.0  ;;  %v1596_v50 = vadd.f32 %v1595_v18, %v4144_v16  ;;  %v4830_v62 = vpop.permute.xlu1 %1016  ;;  %v1599_v30 = vpop.f32.mrb[46].mxu0  ;;  %v1888_v29 = vadd.f32 %v1887_v38, %v4738_v37 }
 0x16d   : > { %2571 = vadd.xlane.f32.xlu1 %v2570_v9  ;;  %v2080_v56 = vmax.f32 %v1594_v21, 0.0  ;;  %v2177_v54 = vmax.f32 %v1884_v45, 0.0  ;;  %2368 = vst [vmem:[%s4232_s14 + $0x460] sm:$0xff] %v2176_v40  ;;  %v1600_v16 = vadd.f32 %v1599_v30, %v4142_v13  ;;  %v1889_v57 = vpop.f32.mrb[47].mxu1 }
 0x16e   : > { %v2175_v44 = vmax.f32 %v1878_v8, 0.0  ;;  %2271 = vst [vmem:[%s4232_s14 + $0x158] sm:$0xff] %v2079_v39  ;;  %v2579_v15 = vadd.f32 %v2079_v39, %v2078_v35  ;;  %v2081_v51 = vmax.f32 %v1596_v50, 0.0  ;;  %v2178_v63 = vmax.f32 %v1888_v29, 0.0 }
 0x16f   : > { %2272 = vst [vmem:[%s4232_s14 + $0x160] sm:$0xff] %v2080_v56  ;;  %2369 = vst [vmem:[%s4232_s14 + $0x468] sm:$0xff] %v2177_v54  ;;  %v4840_v6 = vadd.f32 %v2177_v54, %v2176_v40  ;;  %v2082_v47 = vmax.f32 %v1600_v16, 0.0 }
 0x170   : > { %2574 = vadd.xlane.f32.xlu0 %v2573_v17  ;;  %2367 = vst [vmem:[%s4232_s14 + $0x458] sm:$0xff] %v2175_v44  ;;  %v2723_v9 = vadd.f32 %v2175_v44, %v2174_v27  ;;  %v4832_v17 = vpop.permute.xlu0 %1021  ;;  %2273 = vst [vmem:[%s4232_s14 + $0x168] sm:$0xff] %v2081_v51  ;;  %v2582_v33 = vadd.f32 %v2081_v51, %v2080_v56  ;;  %v1893_v27 = vpop.f32.mrb[48].mxu1 }
 0x171   : > { %2715 = vadd.xlane.f32.xlu1 %v4794_v26  ;;  %v1601_v26 = vpop.f32.mrb[47].mxu0  ;;  %2274 = vst [vmem:[%s4232_s14 + $0x170] sm:$0xff] %v2082_v47  ;;  %2370 = vst [vmem:[%s4232_s14 + $0x470] sm:$0xff] %v2178_v63  ;;  %v1894_v44 = vadd.f32 %v1893_v27, %v4740_v36  ;;  %v4853_v10 = vpop.permute.xlu1 %1026 }
 0x172   : > { %v1602_v43 = vadd.f32 %v1601_v26, %v4142_v13  ;;  %v1605_v35 = vpop.f32.mrb[48].mxu0  ;;  %v1895_v13 = vpop.f32.mrb[49].mxu1 }
 0x173   : > { %v1606_v39 = vadd.f32 %v1605_v35, %v4156_v24  ;;  %v1607_v20 = vpop.f32.mrb[49].mxu0  ;;  %v1896_v21 = vadd.f32 %v1895_v13, %v4740_v36  ;;  %v1899_v40 = vpop.f32.mrb[50].mxu1 }
 0x174   : > { %2718 = vadd.xlane.f32.xlu0 %v2717_v22  ;;  %v1890_v22 = vadd.f32 %v1889_v57, %v4738_v37  ;;  %v2083_v48 = vmax.f32 %v1602_v43, 0.0  ;;  %v1608_v28 = vadd.f32 %v1607_v20, %v4156_v24  ;;  %v4855_v18 = vpop.permute.xlu0 %1031  ;;  %v1611_v56 = vpop.f32.mrb[50].mxu0  ;;  %v1900_v36 = vadd.f32 %v1899_v40, %v4761_v53 }
 0x175   : > { %2577 = vadd.xlane.f32.xlu1 %v2576_v32  ;;  %v2084_v5 = vmax.f32 %v1606_v39, 0.0  ;;  %v2181_v45 = vmax.f32 %v1896_v21, 0.0  ;;  %v1612_v24 = vadd.f32 %v1611_v56, %v4154_v23  ;;  %v1901_v51 = vpop.f32.mrb[51].mxu1  ;;  %v4876_v27 = vpop.permute.xlu1 %1036 }
 0x176   : > { %v2179_v8 = vmax.f32 %v1890_v22, 0.0  ;;  %2275 = vst [vmem:[%s4232_s14 + $0x178] sm:$0xff] %v2083_v48  ;;  %v2585_v37 = vadd.f32 %v2083_v48, %v2082_v47  ;;  %v2085_v50 = vmax.f32 %v1608_v28, 0.0  ;;  %v2182_v29 = vmax.f32 %v1900_v36, 0.0  ;;  %v1905_v22 = vpop.f32.mrb[52].mxu1 }
 0x177   : > { %2276 = vst [vmem:[%s4232_s14 + $0x180] sm:$0xff] %v2084_v5  ;;  %2373 = vst [vmem:[%s4232_s14 + $0x488] sm:$0xff] %v2181_v45  ;;  %v2086_v16 = vmax.f32 %v1612_v24, 0.0 }
 0x178   : > { %2580 = vadd.xlane.f32.xlu0 %v2579_v15  ;;  %2371 = vst [vmem:[%s4232_s14 + $0x478] sm:$0xff] %v2179_v8  ;;  %v2729_v32 = vadd.f32 %v2179_v8, %v2178_v63  ;;  %v2180_v15 = vmax.f32 %v1894_v44, 0.0  ;;  %2277 = vst [vmem:[%s4232_s14 + $0x188] sm:$0xff] %v2085_v50  ;;  %v2588_v54 = vadd.f32 %v2085_v50, %v2084_v5  ;;  %v4878_v39 = vpop.permute.xlu0 %1041 }
 0x179   : > { %2721 = vadd.xlane.f32.xlu1 %v4817_v14  ;;  %v1613_v14 = vpop.f32.mrb[51].mxu0  ;;  %2278 = vst [vmem:[%s4232_s14 + $0x190] sm:$0xff] %v2086_v16  ;;  %2374 = vst [vmem:[%s4232_s14 + $0x490] sm:$0xff] %v2182_v29  ;;  %v1906_v63 = vadd.f32 %v1905_v22, %v4763_v25 }
 0x17a   : > { %2372 = vst [vmem:[%s4232_s14 + $0x480] sm:$0xff] %v2180_v15  ;;  %v4863_v30 = vadd.f32 %v2181_v45, %v2180_v15  ;;  %v1614_v38 = vadd.f32 %v1613_v14, %v4154_v23  ;;  %v1617_v43 = vpop.f32.mrb[52].mxu0  ;;  %v1907_v23 = vpop.f32.mrb[53].mxu1 }
 0x17b   : > { %v1618_v47 = vadd.f32 %v1617_v43, %v4168_v34  ;;  %v1619_v48 = vpop.f32.mrb[53].mxu0  ;;  %v1908_v35 = vadd.f32 %v1907_v23, %v4763_v25  ;;  %v2184_v20 = vmax.f32 %v1906_v63, 0.0  ;;  %v1911_v21 = vpop.f32.mrb[54].mxu1 }
 0x17c   : > { %2724 = vadd.xlane.f32.xlu0 %v2723_v9  ;;  %v1902_v9 = vadd.f32 %v1901_v51, %v4761_v53  ;;  %v2087_v26 = vmax.f32 %v1614_v38, 0.0  ;;  %v1620_v8 = vadd.f32 %v1619_v48, %v4168_v34  ;;  %v1623_v28 = vpop.f32.mrb[54].mxu0  ;;  %v1912_v25 = vadd.f32 %v1911_v21, %v4784_v19  ;;  %v1913_v5 = vpop.f32.mrb[55].mxu1 }
 0x17d   : > { %2583 = vadd.xlane.f32.xlu1 %v2582_v33  ;;  %v2088_v44 = vmax.f32 %v1618_v47, 0.0  ;;  %2376 = vst [vmem:[%s4232_s14 + $0x4a0] sm:$0xff] %v2184_v20  ;;  %v1624_v34 = vadd.f32 %v1623_v28, %v4166_v31  ;;  %v1917_v51 = vpop.f32.mrb[56].mxu1  ;;  %v4901_v43 = vpop.permute.xlu0 %1051 }
 0x17e   : > { %v2183_v57 = vmax.f32 %v1902_v9, 0.0  ;;  %2279 = vst [vmem:[%s4232_s14 + $0x198] sm:$0xff] %v2087_v26  ;;  %v2591_v53 = vadd.f32 %v2087_v26, %v2086_v16  ;;  %v2089_v13 = vmax.f32 %v1620_v8, 0.0  ;;  %v2186_v40 = vmax.f32 %v1912_v25, 0.0 }
 0x17f   : > { %2280 = vst [vmem:[%s4232_s14 + $0x1a0] sm:$0xff] %v2088_v44  ;;  %v2090_v56 = vmax.f32 %v1624_v34, 0.0  ;;  %v1918_v9 = vadd.f32 %v1917_v51, %v4786_v12 }
 0x180   : > { %2586 = vadd.xlane.f32.xlu0 %v2585_v37  ;;  %2375 = vst [vmem:[%s4232_s14 + $0x498] sm:$0xff] %v2183_v57  ;;  %v2735_v33 = vadd.f32 %v2183_v57, %v2182_v29  ;;  %v2185_v37 = vmax.f32 %v1908_v35, 0.0  ;;  %2281 = vst [vmem:[%s4232_s14 + $0x1a8] sm:$0xff] %v2089_v13  ;;  %v2594_v15 = vadd.f32 %v2089_v13, %v2088_v44  ;;  %v4899_v57 = vpop.permute.xlu1 %1046 }
 0x181   : > { %2727 = vadd.xlane.f32.xlu1 %v4840_v6  ;;  %v1625_v6 = vpop.f32.mrb[55].mxu0  ;;  %2282 = vst [vmem:[%s4232_s14 + $0x1b0] sm:$0xff] %v2090_v56  ;;  %2378 = vst [vmem:[%s4232_s14 + $0x4b0] sm:$0xff] %v2186_v40  ;;  %v2188_v47 = vmax.f32 %v1918_v9, 0.0 }
 0x182   : > { %2377 = vst [vmem:[%s4232_s14 + $0x4a8] sm:$0xff] %v2185_v37  ;;  %v4886_v50 = vadd.f32 %v2185_v37, %v2184_v20  ;;  %v1626_v45 = vadd.f32 %v1625_v6, %v4166_v31  ;;  %v1629_v14 = vpop.f32.mrb[56].mxu0  ;;  %v1919_v31 = vpop.f32.mrb[57].mxu1 }
 0x183   : > { %v1630_v38 = vadd.f32 %v1629_v14, %v4180_v42  ;;  %v1631_v16 = vpop.f32.mrb[57].mxu0  ;;  %v1920_v26 = vadd.f32 %v1919_v31, %v4786_v12  ;;  %2380 = vst [vmem:[%s4232_s14 + $0x4c0] sm:$0xff] %v2188_v47 }
 0x184   : > { %2730 = vadd.xlane.f32.xlu0 %v2729_v32  ;;  %v1914_v32 = vadd.f32 %v1913_v5, %v4784_v19  ;;  %v2091_v24 = vmax.f32 %v1626_v45, 0.0  ;;  %v1632_v29 = vadd.f32 %v1631_v16, %v4180_v42  ;;  %v1635_v23 = vpop.f32.mrb[58].mxu0 }
 0x185   : > { %2589 = vadd.xlane.f32.xlu1 %v2588_v54  ;;  %v2092_v22 = vmax.f32 %v1630_v38, 0.0  ;;  %v2189_v48 = vmax.f32 %v1920_v26, 0.0  ;;  %v1636_v42 = vadd.f32 %v1635_v23, %v4178_v41 }
 0x186   : > { %v2187_v36 = vmax.f32 %v1914_v32, 0.0  ;;  %2283 = vst [vmem:[%s4232_s14 + $0x1b8] sm:$0xff] %v2091_v24  ;;  %v2597_v19 = vadd.f32 %v2091_v24, %v2090_v56  ;;  %v2093_v63 = vmax.f32 %v1632_v29, 0.0  ;;  %v4924_v24 = vpop.permute.xlu0 %1061 }
 0x187   : > { %2284 = vst [vmem:[%s4232_s14 + $0x1c0] sm:$0xff] %v2092_v22  ;;  %2381 = vst [vmem:[%s4232_s14 + $0x4c8] sm:$0xff] %v2189_v48  ;;  %v4909_v44 = vadd.f32 %v2189_v48, %v2188_v47  ;;  %v2094_v13 = vmax.f32 %v1636_v42, 0.0 }
 0x188   : > { %2592 = vadd.xlane.f32.xlu0 %v2591_v53  ;;  %2379 = vst [vmem:[%s4232_s14 + $0x4b8] sm:$0xff] %v2187_v36  ;;  %v2741_v54 = vadd.f32 %v2187_v36, %v2186_v40  ;;  %v1923_v53 = vpop.f32.mrb[58].mxu1  ;;  %2285 = vst [vmem:[%s4232_s14 + $0x1c8] sm:$0xff] %v2093_v63  ;;  %v2600_v35 = vadd.f32 %v2093_v63, %v2092_v22  ;;  %v4922_v40 = vpop.permute.xlu1 %1056 }
 0x189   : > { %2733 = vadd.xlane.f32.xlu1 %v4863_v30  ;;  %v1924_v12 = vadd.f32 %v1923_v53, %v4807_v1  ;;  %v1637_v30 = vpop.f32.mrb[59].mxu0  ;;  %v1925_v8 = vpop.f32.mrb[59].mxu1  ;;  %2286 = vst [vmem:[%s4232_s14 + $0x1d0] sm:$0xff] %v2094_v13 }
 0x18a   : > { %v1638_v20 = vadd.f32 %v1637_v30, %v4178_v41  ;;  %v1641_v34 = vpop.f32.mrb[60].mxu0  ;;  %v1929_v25 = vpop.f32.mrb[60].mxu1 }
 0x18b   : > { %v2190_v37 = vmax.f32 %v1924_v12, 0.0  ;;  %v1642_v6 = vadd.f32 %v1641_v34, %v4192_v52  ;;  %v1930_v5 = vadd.f32 %v1929_v25, %v4809_v46  ;;  %v1643_v45 = vpop.f32.mrb[61].mxu0  ;;  %v1931_v41 = vpop.f32.mrb[61].mxu1 }
 0x18c   : > { %2736 = vadd.xlane.f32.xlu0 %v2735_v33  ;;  %v1926_v33 = vadd.f32 %v1925_v8, %v4807_v1  ;;  %v2095_v28 = vmax.f32 %v1638_v20, 0.0  ;;  %v1644_v32 = vadd.f32 %v1643_v45, %v4192_v52  ;;  %v1932_v56 = vadd.f32 %v1931_v41, %v4809_v46  ;;  %v1647_v9 = vpop.f32.mrb[62].mxu0  ;;  %v1935_v16 = vpop.f32.mrb[62].mxu1 }
 0x18d   : > { %2595 = vadd.xlane.f32.xlu1 %v2594_v15  ;;  %2382 = vst [vmem:[%s4232_s14 + $0x4d0] sm:$0xff] %v2190_v37  ;;  %v2096_v36 = vmax.f32 %v1642_v6, 0.0  ;;  %v2192_v14 = vmax.f32 %v1930_v5, 0.0  ;;  %v1648_v52 = vadd.f32 %v1647_v9, %v4190_v49  ;;  %v1936_v46 = vadd.f32 %v1935_v16, %v4830_v62  ;;  %v1937_v31 = vpop.f32.mrb[63].mxu1 }
 0x18e   : > { %v2191_v21 = vmax.f32 %v1926_v33, 0.0  ;;  %2287 = vst [vmem:[%s4232_s14 + $0x1d8] sm:$0xff] %v2095_v28  ;;  %v2603_v1 = vadd.f32 %v2095_v28, %v2094_v13  ;;  %v2097_v51 = vmax.f32 %v1644_v32, 0.0  ;;  %v2193_v38 = vmax.f32 %v1932_v56, 0.0  ;;  %v1941_v53 = vpop.f32.mrb[64].mxu1  ;;  %v4945_v33 = vpop.permute.xlu1 %1066 }
 0x18f   : > { %2288 = vst [vmem:[%s4232_s14 + $0x1e0] sm:$0xff] %v2096_v36  ;;  %2384 = vst [vmem:[%s4232_s14 + $0x4e0] sm:$0xff] %v2192_v14  ;;  %v2098_v22 = vmax.f32 %v1648_v52, 0.0  ;;  %v2194_v47 = vmax.f32 %v1936_v46, 0.0  ;;  %v1942_v12 = vadd.f32 %v1941_v53, %v4832_v17  ;;  %v4947_v13 = vpop.permute.xlu0 %1071 }
 0x190   : > { %2598 = vadd.xlane.f32.xlu0 %v2597_v19  ;;  %2383 = vst [vmem:[%s4232_s14 + $0x4d8] sm:$0xff] %v2191_v21  ;;  %v2747_v15 = vadd.f32 %v2191_v21, %v2190_v37  ;;  %2289 = vst [vmem:[%s4232_s14 + $0x1e8] sm:$0xff] %v2097_v51  ;;  %v2606_v19 = vadd.f32 %v2097_v51, %v2096_v36  ;;  %v4932_v29 = vadd.f32 %v2193_v38, %v2192_v14 }
 0x191   : > { %2739 = vadd.xlane.f32.xlu1 %v4886_v50  ;;  %v1649_v50 = vpop.f32.mrb[63].mxu0  ;;  %2385 = vst [vmem:[%s4232_s14 + $0x4e8] sm:$0xff] %v2193_v38  ;;  %2290 = vst [vmem:[%s4232_s14 + $0x1f0] sm:$0xff] %v2098_v22  ;;  %v2196_v28 = vmax.f32 %v1942_v12, 0.0 }
 0x192   : > { %v1650_v26 = vadd.f32 %v1649_v50, %v4190_v49  ;;  %v1653_v23 = vpop.f32.mrb[64].mxu0  ;;  %2386 = vst [vmem:[%s4232_s14 + $0x4f0] sm:$0xff] %v2194_v47  ;;  %v1943_v49 = vpop.f32.mrb[65].mxu1 }
 0x193   : > { %v1654_v42 = vadd.f32 %v1653_v23, %v4202_v58  ;;  %v1655_v30 = vpop.f32.mrb[65].mxu0  ;;  %v1944_v20 = vadd.f32 %v1943_v49, %v4832_v17  ;;  %v1947_v6 = vpop.f32.mrb[66].mxu1  ;;  %2388 = vst [vmem:[%s4232_s14 + $0x500] sm:$0xff] %v2196_v28 }
 0x194   : > { %2742 = vadd.xlane.f32.xlu0 %v2741_v54  ;;  %v1938_v54 = vadd.f32 %v1937_v31, %v4830_v62  ;;  %v2099_v63 = vmax.f32 %v1650_v26, 0.0  ;;  %v1659_v25 = vpop.f32.mrb[66].mxu0  ;;  %v1948_v17 = vadd.f32 %v1947_v6, %v4853_v10  ;;  %v1949_v5 = vpop.f32.mrb[67].mxu1 }
 0x195   : > { %2601 = vadd.xlane.f32.xlu1 %v2600_v35  ;;  %v1656_v35 = vadd.f32 %v1655_v30, %v4202_v58  ;;  %v2100_v37 = vmax.f32 %v1654_v42, 0.0  ;;  %v2197_v34 = vmax.f32 %v1944_v20, 0.0  ;;  %v1660_v58 = vadd.f32 %v1659_v25, %v4200_v55  ;;  %v1953_v38 = vpop.f32.mrb[68].mxu1  ;;  %v4970_v26 = vpop.permute.xlu0 %1081 }
 0x196   : > { %v2195_v48 = vmax.f32 %v1938_v54, 0.0  ;;  %2291 = vst [vmem:[%s4232_s14 + $0x1f8] sm:$0xff] %v2099_v63  ;;  %v2609_v62 = vadd.f32 %v2099_v63, %v2098_v22  ;;  %v2198_v56 = vmax.f32 %v1948_v17, 0.0  ;;  %v1954_v16 = vadd.f32 %v1953_v38, %v4855_v18 }
 0x197   : > { %v2101_v21 = vmax.f32 %v1656_v35, 0.0  ;;  %2292 = vst [vmem:[%s4232_s14 + $0x200] sm:$0xff] %v2100_v37  ;;  %2389 = vst [vmem:[%s4232_s14 + $0x508] sm:$0xff] %v2197_v34  ;;  %v4955_v41 = vadd.f32 %v2197_v34, %v2196_v28  ;;  %v2102_v32 = vmax.f32 %v1660_v58, 0.0 }
 0x198   : > { %2604 = vadd.xlane.f32.xlu0 %v2603_v1  ;;  %2387 = vst [vmem:[%s4232_s14 + $0x4f8] sm:$0xff] %v2195_v48  ;;  %v2753_v8 = vadd.f32 %v2195_v48, %v2194_v47  ;;  %2390 = vst [vmem:[%s4232_s14 + $0x510] sm:$0xff] %v2198_v56  ;;  %v2200_v22 = vmax.f32 %v1954_v16, 0.0 }
 0x199   : > { %2745 = vadd.xlane.f32.xlu1 %v4909_v44  ;;  %v1661_v44 = vpop.f32.mrb[67].mxu0  ;;  %2293 = vst [vmem:[%s4232_s14 + $0x208] sm:$0xff] %v2101_v21  ;;  %v2612_v45 = vadd.f32 %v2101_v21, %v2100_v37  ;;  %2294 = vst [vmem:[%s4232_s14 + $0x210] sm:$0xff] %v2102_v32  ;;  %v4986_v6 = vpop.permute.xlu0 %1091 }
 0x19a   : > { %v1662_v1 = vadd.f32 %v1661_v44, %v4200_v55  ;;  %v1665_v51 = vpop.f32.mrb[68].mxu0  ;;  %v1955_v55 = vpop.f32.mrb[69].mxu1  ;;  %2392 = vst [vmem:[%s4232_s14 + $0x520] sm:$0xff] %v2200_v22 }
 0x19b   : > { %v1666_v9 = vadd.f32 %v1665_v51, %v4206_v60  ;;  %v1667_v52 = vpop.f32.mrb[69].mxu0  ;;  %v1956_v31 = vadd.f32 %v1955_v55, %v4855_v18  ;;  %v1959_v23 = vpop.f32.mrb[70].mxu1 }
 0x19c   : > { %2748 = vadd.xlane.f32.xlu0 %v2747_v15  ;;  %v1950_v15 = vadd.f32 %v1949_v5, %v4853_v10  ;;  %v2103_v36 = vmax.f32 %v1662_v1, 0.0  ;;  %v1668_v50 = vadd.f32 %v1667_v52, %v4206_v60  ;;  %v1671_v48 = vpop.f32.mrb[70].mxu0  ;;  %v1960_v18 = vadd.f32 %v1959_v23, %v4876_v27  ;;  %v1961_v53 = vpop.f32.mrb[71].mxu1 }
 0x19d   : > { %2607 = vadd.xlane.f32.xlu1 %v2606_v19  ;;  %v4968_v19 = vpop.permute.xlu1 %1076  ;;  %v2104_v54 = vmax.f32 %v1666_v9, 0.0  ;;  %v2201_v63 = vmax.f32 %v1956_v31, 0.0  ;;  %v1672_v60 = vadd.f32 %v1671_v48, %v4204_v59  ;;  %v1962_v49 = vadd.f32 %v1961_v53, %v4876_v27  ;;  %v1965_v28 = vpop.f32.mrb[72].mxu1 }
 0x19e   : > { %v2199_v14 = vmax.f32 %v1950_v15, 0.0  ;;  %2295 = vst [vmem:[%s4232_s14 + $0x218] sm:$0xff] %v2103_v36  ;;  %v2615_v10 = vadd.f32 %v2103_v36, %v2102_v32  ;;  %v2105_v47 = vmax.f32 %v1668_v50, 0.0  ;;  %v1966_v34 = vadd.f32 %v1965_v28, %v4878_v39  ;;  %v2518_v55 = vpop.xlane.xlu0 %2517  ;;  %v2468_v28 = vld [vmem:[%s4270_s25 + $0x180] sm:$0xff] }
 0x19f   : > { %2296 = vst [vmem:[%s4232_s14 + $0x220] sm:$0xff] %v2104_v54  ;;  %2393 = vst [vmem:[%s4232_s14 + $0x528] sm:$0xff] %v2201_v63  ;;  %v4978_v12 = vadd.f32 %v2201_v63, %v2200_v22  ;;  %v2203_v20 = vmax.f32 %v1962_v49, 0.0 }
 0x1a0   : > { %2610 = vadd.xlane.f32.xlu0 %v2609_v62  ;;  %2391 = vst [vmem:[%s4232_s14 + $0x518] sm:$0xff] %v2199_v14  ;;  %v2759_v46 = vadd.f32 %v2199_v14, %v2198_v56  ;;  %2297 = vst [vmem:[%s4232_s14 + $0x228] sm:$0xff] %v2105_v47  ;;  %v2618_v42 = vadd.f32 %v2105_v47, %v2104_v54  ;;  %v2106_v62 = vmax.f32 %v1672_v60, 0.0  ;;  %v2204_v1 = vmax.f32 %v1966_v34, 0.0  ;;  %v2420_v14 = vld [vmem:[%s4270_s25] sm:$0xff] }
 0x1a1   : > { %2751 = vadd.xlane.f32.xlu1 %v4932_v29  ;;  %v1673_v29 = vpop.f32.mrb[71].mxu0  ;;  %2395 = vst [vmem:[%s4232_s14 + $0x538] sm:$0xff] %v2203_v20  ;;  %v4993_v5 = vpop.permute.xlu1 %1086  ;;  %v2804_v50 = vadd.f32 %v2518_v55, %v2420_v14 }
 0x1a2   : > { %v1674_v30 = vadd.f32 %v1673_v29, %v4204_v59  ;;  %v1677_v37 = vpop.f32.mrb[72].mxu0  ;;  %2298 = vst [vmem:[%s4232_s14 + $0x230] sm:$0xff] %v2106_v62  ;;  %v1967_v59 = vpop.f32.mrb[73].mxu1  ;;  %2396 = vst [vmem:[%s4232_s14 + $0x540] sm:$0xff] %v2204_v1 }
 0x1a3   : > { %v1678_v21 = vadd.f32 %v1677_v37, %v4210_v0  ;;  %v1679_v25 = vpop.f32.mrb[73].mxu0  ;;  %v1968_v44 = vadd.f32 %v1967_v59, %v4878_v39  ;;  %v1971_v36 = vpop.f32.mrb[74].mxu1  ;;  %2901 = vst.msk [vmem:[%s4270_s25] sm:$0xff] %vm329_vm2, %v2804_v50 }
 0x1a4   : > { %2754 = vadd.xlane.f32.xlu0 %v2753_v8  ;;  %v2202_v8 = vmax.f32 %v1960_v18, 0.0  ;;  %v2107_v35 = vmax.f32 %v1674_v30, 0.0  ;;  %v1680_v17 = vadd.f32 %v1679_v25, %v4210_v0  ;;  %v1683_v56 = vpop.f32.mrb[74].mxu0  ;;  %v1972_v39 = vadd.f32 %v1971_v36, %v4899_v57 }
 0x1a5   : > { %2613 = vadd.xlane.f32.xlu1 %v2612_v45  ;;  %v2108_v45 = vmax.f32 %v1678_v21, 0.0  ;;  %v2205_v32 = vmax.f32 %v1968_v44, 0.0  ;;  %v1684_v0 = vadd.f32 %v1683_v56, %v4208_v61  ;;  %v1685_v51 = vpop.f32.mrb[75].mxu0  ;;  %v5019_v53 = vpop.permute.xlu1 %1096 }
 0x1a6   : > { %2394 = vst [vmem:[%s4232_s14 + $0x530] sm:$0xff] %v2202_v8  ;;  %2299 = vst [vmem:[%s4232_s14 + $0x238] sm:$0xff] %v2107_v35  ;;  %v2621_v27 = vadd.f32 %v2107_v35, %v2106_v62  ;;  %v2765_v58 = vadd.f32 %v2203_v20, %v2202_v8  ;;  %v2109_v15 = vmax.f32 %v1680_v17, 0.0  ;;  %v1686_v16 = vadd.f32 %v1685_v51, %v4208_v61  ;;  %v1689_v22 = vpop.f32.mrb[76].mxu0  ;;  %v2469_v20 = vld [vmem:[%s4270_s25 + $0x188] sm:$0xff] }
 0x1a7   : > { %2300 = vst [vmem:[%s4232_s14 + $0x240] sm:$0xff] %v2108_v45  ;;  %2397 = vst [vmem:[%s4232_s14 + $0x548] sm:$0xff] %v2205_v32  ;;  %v5002_v9 = vadd.f32 %v2205_v32, %v2204_v1  ;;  %v1690_v61 = vadd.f32 %v1689_v22, %v4214_v3  ;;  %v1691_v63 = vpop.f32.mrb[77].mxu0 }
 0x1a8   : > { %2616 = vadd.xlane.f32.xlu0 %v2615_v10  ;;  %2301 = vst [vmem:[%s4232_s14 + $0x248] sm:$0xff] %v2109_v15  ;;  %v2624_v38 = vadd.f32 %v2109_v15, %v2108_v45  ;;  %v2110_v10 = vmax.f32 %v1684_v0, 0.0  ;;  %v2111_v31 = vmax.f32 %v1686_v16, 0.0  ;;  %v1692_v18 = vadd.f32 %v1691_v63, %v4214_v3  ;;  %v1695_v8 = vpop.f32.mrb[78].mxu0 }
 0x1a9   : > { %2757 = vadd.xlane.f32.xlu1 %v4955_v41  ;;  %v1973_v41 = vpop.f32.mrb[75].mxu1  ;;  %v1696_v3 = vadd.f32 %v1695_v8, %v4212_v2  ;;  %v2662_v44 = vpop.xlane.xlu1 %2661 }
 0x1aa   : > { %v1974_v52 = vadd.f32 %v1973_v41, %v4899_v57  ;;  %v1977_v47 = vpop.f32.mrb[76].mxu1  ;;  %2302 = vst [vmem:[%s4232_s14 + $0x250] sm:$0xff] %v2110_v10  ;;  %2303 = vst [vmem:[%s4232_s14 + $0x258] sm:$0xff] %v2111_v31  ;;  %v2627_v23 = vadd.f32 %v2111_v31, %v2110_v10  ;;  %v2113_v49 = vmax.f32 %v1692_v18, 0.0  ;;  %v3000_v1 = vld [vmem:[%s4270_s25] sm:$0xff]  ;;  %v2852_v56 = vadd.f32 %v2662_v44, %v2468_v28 }
 0x1ab   : > { %v1978_v57 = vadd.f32 %v1977_v47, %v4901_v43  ;;  %v1979_v48 = vpop.f32.mrb[77].mxu1  ;;  %v3096_v14 = vmul.f32 0.00390625, %v3000_v1 }
 0x1ac   : > { %2760 = vadd.xlane.f32.xlu0 %v2759_v46  ;;  %v2206_v46 = vmax.f32 %v1972_v39, 0.0  ;;  %v2207_v54 = vmax.f32 %v1974_v52, 0.0  ;;  %v1980_v29 = vadd.f32 %v1979_v48, %v4901_v43  ;;  %v1983_v35 = vpop.f32.mrb[78].mxu1  ;;  %2305 = vst [vmem:[%s4232_s14 + $0x268] sm:$0xff] %v2113_v49  ;;  %2949 = vst.msk [vmem:[%s4270_s25 + $0x180] sm:$0xff] %vm329_vm2, %v2852_v56 }
 0x1ad   : > { %2619 = vadd.xlane.f32.xlu1 %v2618_v42  ;;  %v2112_v42 = vmax.f32 %v1690_v61, 0.0  ;;  %v2208_v30 = vmax.f32 %v1978_v57, 0.0  ;;  %v1984_v43 = vadd.f32 %v1983_v35, %v4922_v40  ;;  %v1985_v37 = vpop.f32.mrb[79].mxu1  ;;  %3192 = vst.msk [vmem:[%s4270_s25] sm:$0xff] %vm329_vm2, %v3096_v14 }
 0x1ae   : > { %2398 = vst [vmem:[%s4232_s14 + $0x550] sm:$0xff] %v2206_v46  ;;  %2399 = vst [vmem:[%s4232_s14 + $0x558] sm:$0xff] %v2207_v54  ;;  %v5014_v60 = vadd.f32 %v2207_v54, %v2206_v46  ;;  %v2209_v62 = vmax.f32 %v1980_v29, 0.0  ;;  %v1986_v59 = vadd.f32 %v1985_v37, %v4922_v40  ;;  %v2422_v40 = vld [vmem:[%s4270_s25 + $0x10] sm:$0xff]  ;;  %v2521_v54 = vpop.xlane.xlu1 %2520 }
 0x1af   : > { %2304 = vst [vmem:[%s4232_s14 + $0x260] sm:$0xff] %v2112_v42  ;;  %2400 = vst [vmem:[%s4232_s14 + $0x560] sm:$0xff] %v2208_v30  ;;  %v5028_v21 = vadd.f32 %v2113_v49, %v2112_v42  ;;  %v2210_v17 = vmax.f32 %v1984_v43, 0.0  ;;  %v2470_v29 = vld [vmem:[%s4270_s25 + $0x190] sm:$0xff] }
 0x1b0   : > { %2622 = vadd.xlane.f32.xlu0 %v2621_v27  ;;  %2401 = vst [vmem:[%s4232_s14 + $0x568] sm:$0xff] %v2209_v62  ;;  %v5031_v34 = vadd.f32 %v2209_v62, %v2208_v30  ;;  %v2665_v27 = vpop.xlane.xlu0 %2664  ;;  %v2211_v32 = vmax.f32 %v1986_v59, 0.0 }
 0x1b1   : > { %2763 = vadd.xlane.f32.xlu1 %v4978_v12  ;;  %v1697_v12 = vpop.f32.mrb[79].mxu0  ;;  %v2853_v45 = vadd.f32 %v2665_v27, %v2469_v20  ;;  %2402 = vst [vmem:[%s4232_s14 + $0x570] sm:$0xff] %v2210_v17 }
 0x1b2   : > { %v1698_v25 = vadd.f32 %v1697_v12, %v4212_v2  ;;  %v1701_v36 = vpop.f32.mrb[80].mxu0  ;;  %v1989_v2 = vpop.f32.mrb[80].mxu1  ;;  %2403 = vst [vmem:[%s4232_s14 + $0x578] sm:$0xff] %v2211_v32  ;;  %v5046_v52 = vadd.f32 %v2211_v32, %v2210_v17 }
 0x1b3   : > { %2950 = vst.msk [vmem:[%s4270_s25 + $0x188] sm:$0xff] %vm329_vm2, %v2853_v45  ;;  %v1702_v0 = vadd.f32 %v1701_v36, %v4219_v7  ;;  %v1990_v39 = vadd.f32 %v1989_v2, %v4924_v24  ;;  %v1703_v51 = vpop.f32.mrb[81].mxu0  ;;  %v1991_v41 = vpop.f32.mrb[81].mxu1  ;;  %v2424_v45 = vld [vmem:[%s4270_s25 + $0x20] sm:$0xff] }
 0x1b4   : > { %2766 = vadd.xlane.f32.xlu0 %v2765_v58  ;;  %v2114_v58 = vmax.f32 %v1696_v3, 0.0  ;;  %v2115_v15 = vmax.f32 %v1698_v25, 0.0  ;;  %v1704_v55 = vadd.f32 %v1703_v51, %v4219_v7  ;;  %v1992_v10 = vadd.f32 %v1991_v41, %v4924_v24  ;;  %v2524_v46 = vpop.xlane.xlu0 %2523  ;;  %v1707_v57 = vpop.f32.mrb[82].mxu0 }
 0x1b5   : > { %2625 = vadd.xlane.f32.xlu1 %v2624_v38  ;;  %v2421_v38 = vld [vmem:[%s4270_s25 + $0x8] sm:$0xff]  ;;  %v2116_v50 = vmax.f32 %v1702_v0, 0.0  ;;  %v2212_v31 = vmax.f32 %v1990_v39, 0.0  ;;  %v2806_v22 = vadd.f32 %v2524_v46, %v2422_v40  ;;  %v1995_v24 = vpop.f32.mrb[82].mxu1  ;;  %v1708_v63 = vadd.f32 %v1707_v57, %v4217_v4  ;;  %v2668_v20 = vpop.xlane.xlu1 %2667  ;;  %v5741_v46 = vld [vmem:[#allocation2_spill] sm:$0xff] }
 0x1b6   : > { %2306 = vst [vmem:[%s4232_s14 + $0x270] sm:$0xff] %v2114_v58  ;;  %2307 = vst [vmem:[%s4232_s14 + $0x278] sm:$0xff] %v2115_v15  ;;  %v2633_v16 = vadd.f32 %v2115_v15, %v2114_v58  ;;  %v2117_v47 = vmax.f32 %v1704_v55, 0.0  ;;  %v2213_v61 = vmax.f32 %v1992_v10, 0.0  ;;  %v2805_v7 = vadd.f32 %v2521_v54, %v2421_v38  ;;  %v1997_v18 = vpop.f32.mrb[83].mxu1 }
 0x1b7   : > { %2308 = vst [vmem:[%s4232_s14 + $0x280] sm:$0xff] %v2116_v50  ;;  %2404 = vst [vmem:[%s4232_s14 + $0x580] sm:$0xff] %v2212_v31  ;;  %v1996_v48 = vadd.f32 %v1995_v24, %v4945_v33  ;;  %v1998_v49 = vadd.f32 %v1997_v18, %v4945_v33  ;;  %v2118_v8 = vmax.f32 %v1708_v63, 0.0  ;;  %v2854_v28 = vadd.f32 %v2668_v20, %v2470_v29  ;;  %v2001_v25 = vpop.f32.mrb[84].mxu1  ;;  %v2471_v33 = vld [vmem:[%s4270_s25 + $0x198] sm:$0xff] }
 0x1b8   : > { %2628 = vadd.xlane.f32.xlu0 %v2627_v23  ;;  %2903 = vst.msk [vmem:[%s4270_s25 + $0x10] sm:$0xff] %vm329_vm2, %v2806_v22  ;;  %v1709_v23 = vpop.f32.mrb[83].mxu0  ;;  %2309 = vst [vmem:[%s4232_s14 + $0x288] sm:$0xff] %v2117_v47  ;;  %v5065_v42 = vadd.f32 %v2117_v47, %v2116_v50  ;;  %v5068_v30 = vadd.f32 %v2213_v61, %v2212_v31  ;;  %v2527_v62 = vpop.xlane.xlu0 %2526  ;;  %v2002_v58 = vadd.f32 %v2001_v25, %v4947_v13  ;;  %v2472_v47 = vld [vmem:[%s4270_s25 + $0x1a0] sm:$0xff] }
 0x1b9   : > { %2769 = vadd.xlane.f32.xlu1 %v5002_v9  ;;  %v2423_v9 = vld [vmem:[%s4270_s25 + $0x18] sm:$0xff]  ;;  %2405 = vst [vmem:[%s4232_s14 + $0x588] sm:$0xff] %v2213_v61  ;;  %2902 = vst.msk [vmem:[%s4270_s25 + $0x8] sm:$0xff] %vm329_vm2, %v2805_v7  ;;  %v2214_v35 = vmax.f32 %v1996_v48, 0.0  ;;  %v2215_v37 = vmax.f32 %v1998_v49, 0.0  ;;  %v2003_v44 = vpop.f32.mrb[85].mxu1 }
 0x1ba   : > { %v2807_v3 = vadd.f32 %v2527_v62, %v2423_v9  ;;  %v3049_v43 = vld [vmem:[%s4270_s25 + $0x188] sm:$0xff]  ;;  %2310 = vst [vmem:[%s4232_s14 + $0x290] sm:$0xff] %v2118_v8  ;;  %2951 = vst.msk [vmem:[%s4270_s25 + $0x190] sm:$0xff] %vm329_vm2, %v2854_v28  ;;  %v2216_v40 = vmax.f32 %v2002_v58, 0.0  ;;  %v2004_v14 = vadd.f32 %v2003_v44, %v4947_v13  ;;  %v2007_v38 = vpop.f32.mrb[86].mxu1 }
 0x1bb   : > { %v3145_v59 = vmul.f32 0.00390625, %v3049_v43  ;;  %2406 = vst [vmem:[%s4232_s14 + $0x590] sm:$0xff] %v2214_v35  ;;  %2407 = vst [vmem:[%s4232_s14 + $0x598] sm:$0xff] %v2215_v37  ;;  %v5087_v32 = vadd.f32 %v2215_v37, %v2214_v35  ;;  %v2008_v31 = vadd.f32 %v2007_v38, %v4968_v19  ;;  %v2009_v22 = vpop.f32.mrb[87].mxu1  ;;  %v2474_v38 = vld [vmem:[%s4270_s25 + $0x1b0] sm:$0xff] }
 0x1bc   : > { %2772 = vadd.xlane.f32.xlu0 %v5014_v60  ;;  %v1710_v60 = vadd.f32 %v1709_v23, %v4217_v4  ;;  %v1713_v4 = vpop.f32.mrb[84].mxu0  ;;  %2904 = vst.msk [vmem:[%s4270_s25 + $0x18] sm:$0xff] %vm329_vm2, %v2807_v3  ;;  %v2671_v36 = vpop.xlane.xlu0 %2670  ;;  %2408 = vst [vmem:[%s4232_s14 + $0x5a0] sm:$0xff] %v2216_v40  ;;  %v2217_v13 = vmax.f32 %v2004_v14, 0.0  ;;  %v2010_v57 = vadd.f32 %v2009_v22, %v4968_v19  ;;  %v5742_v3 = vld [vmem:[#allocation4_spill] sm:$0xff] }
 0x1bd   : > { %2631 = vadd.xlane.f32.xlu1 %v5028_v21  ;;  %v3048_v21 = vld [vmem:[%s4270_s25 + $0x180] sm:$0xff]  ;;  %v1714_v27 = vadd.f32 %v1713_v4, %v4224_v11  ;;  %v1715_v17 = vpop.f32.mrb[85].mxu0  ;;  %3241 = vst.msk [vmem:[%s4270_s25 + $0x188] sm:$0xff] %vm329_vm2, %v3145_v59  ;;  %v2855_v39 = vadd.f32 %v2671_v36, %v2471_v33  ;;  %v2218_v48 = vmax.f32 %v2008_v31, 0.0  ;;  %v2013_v62 = vpop.f32.mrb[88].mxu1  ;;  %v2426_v4 = vld [vmem:[%s4270_s25 + $0x30] sm:$0xff] }
 0x1be   : > { %v2119_v12 = vmax.f32 %v1710_v60, 0.0  ;;  %v3144_v1 = vmul.f32 0.00390625, %v3048_v21  ;;  %v1716_v56 = vadd.f32 %v1715_v17, %v4224_v11  ;;  %2409 = vst [vmem:[%s4232_s14 + $0x5a8] sm:$0xff] %v2217_v13  ;;  %v5120_v9 = vadd.f32 %v2217_v13, %v2216_v40  ;;  %v2015_v28 = vpop.f32.mrb[89].mxu1  ;;  %v2427_v40 = vld [vmem:[%s4270_s25 + $0x38] sm:$0xff] }
 0x1bf   : > { %v2120_v2 = vmax.f32 %v1714_v27, 0.0  ;;  %v3002_v51 = vld [vmem:[%s4270_s25 + $0x10] sm:$0xff]  ;;  %2952 = vst.msk [vmem:[%s4270_s25 + $0x198] sm:$0xff] %vm329_vm2, %v2855_v39  ;;  %2410 = vst [vmem:[%s4232_s14 + $0x5b0] sm:$0xff] %v2218_v48  ;;  %v2016_v44 = vadd.f32 %v2015_v28, %v4970_v26  ;;  %v5743_v39 = vld [vmem:[#allocation3_spill] sm:$0xff] }
 0x1c0   : > { %2634 = vadd.xlane.f32.xlu0 %v2633_v16  ;;  %2311 = vst [vmem:[%s4232_s14 + $0x298] sm:$0xff] %v2119_v12  ;;  %v2639_v15 = vadd.f32 %v2119_v12, %v2118_v8  ;;  %3240 = vst.msk [vmem:[%s4270_s25 + $0x180] sm:$0xff] %vm329_vm2, %v3144_v1  ;;  %v2121_v11 = vmax.f32 %v1716_v56, 0.0  ;;  %v2425_v16 = vld [vmem:[%s4270_s25 + $0x28] sm:$0xff]  ;;  %v3098_v10 = vmul.f32 0.00390625, %v3002_v51  ;;  %v2014_v12 = vadd.f32 %v2013_v62, %v4970_v26 }
 0x1c1   : > { %2775 = vadd.xlane.f32.xlu1 %v5031_v34  ;;  %v2530_v0 = vpop.xlane.xlu1 %2529  ;;  %v1719_v34 = vpop.f32.mrb[86].mxu0  ;;  %v3001_v55 = vld [vmem:[%s4270_s25 + $0x8] sm:$0xff]  ;;  %2312 = vst [vmem:[%s4232_s14 + $0x2a0] sm:$0xff] %v2120_v2  ;;  %v3050_v35 = vld [vmem:[%s4270_s25 + $0x190] sm:$0xff]  ;;  %v2221_v26 = vmax.f32 %v2016_v44, 0.0  ;;  %v5745_v44 = vld [vmem:[#allocation5_spill] sm:$0xff] }
 0x1c2   : > { %v2808_v41 = vadd.f32 %v2530_v0, %v2424_v45  ;;  %v1720_v50 = vadd.f32 %v1719_v34, %v5741_v46  ;;  %v1721_v54 = vpop.f32.mrb[87].mxu0  ;;  %2313 = vst [vmem:[%s4232_s14 + $0x2a8] sm:$0xff] %v2121_v11  ;;  %v5110_v61 = vadd.f32 %v2121_v11, %v2120_v2  ;;  %3194 = vst.msk [vmem:[%s4270_s25 + $0x10] sm:$0xff] %vm329_vm2, %v3098_v10  ;;  %v2473_v8 = vld [vmem:[%s4270_s25 + $0x1a8] sm:$0xff]  ;;  %v3146_v25 = vmul.f32 0.00390625, %v3050_v35  ;;  %v2019_v2 = vpop.f32.mrb[90].mxu1 }
 0x1c3   : > { %v1722_v7 = vadd.f32 %v1721_v54, %v5741_v46  ;;  %v3003_v19 = vld [vmem:[%s4270_s25 + $0x18] sm:$0xff]  ;;  %v1725_v49 = vpop.f32.mrb[88].mxu0  ;;  %v2220_v17 = vmax.f32 %v2014_v12, 0.0  ;;  %v2020_v11 = vadd.f32 %v2019_v2, %v4993_v5  ;;  %v2021_v34 = vpop.f32.mrb[91].mxu1  ;;  %2413 = vst [vmem:[%s4232_s14 + $0x5c8] sm:$0xff] %v2221_v26 }
 0x1c4   : > { %2778 = vadd.xlane.f32.xlu0 %v5046_v52  ;;  %v3097_v52 = vmul.f32 0.00390625, %v3001_v55  ;;  %2905 = vst.msk [vmem:[%s4270_s25 + $0x20] sm:$0xff] %vm329_vm2, %v2808_v41  ;;  %v2122_v63 = vmax.f32 %v1720_v50, 0.0  ;;  %v3099_v20 = vmul.f32 0.00390625, %v3003_v19  ;;  %v1726_v43 = vadd.f32 %v1725_v49, %v5742_v3  ;;  %v1727_v37 = vpop.f32.mrb[89].mxu0  ;;  %3242 = vst.msk [vmem:[%s4270_s25 + $0x190] sm:$0xff] %vm329_vm2, %v3146_v25 }
 0x1c5   : > { %2637 = vadd.xlane.f32.xlu1 %v5065_v42  ;;  %v2533_v24 = vpop.xlane.xlu0 %2532  ;;  %v2123_v29 = vmax.f32 %v1722_v7, 0.0  ;;  %v2219_v42 = vmax.f32 %v2010_v57, 0.0  ;;  %v1728_v59 = vadd.f32 %v1727_v37, %v5742_v3  ;;  %2412 = vst [vmem:[%s4232_s14 + $0x5c0] sm:$0xff] %v2220_v17  ;;  %v2022_v10 = vadd.f32 %v2021_v34, %v4993_v5  ;;  %v2025_v57 = vpop.f32.mrb[92].mxu1 }
 0x1c6   : > { %v2674_v23 = vpop.xlane.xlu1 %2673  ;;  %v2809_v18 = vadd.f32 %v2533_v24, %v2425_v16  ;;  %3193 = vst.msk [vmem:[%s4270_s25 + $0x8] sm:$0xff] %vm329_vm2, %v3097_v52  ;;  %2314 = vst [vmem:[%s4232_s14 + $0x2b0] sm:$0xff] %v2122_v63  ;;  %v2124_v58 = vmax.f32 %v1726_v43, 0.0  ;;  %v5169_v46 = vadd.f32 %v2221_v26, %v2220_v17  ;;  %v2222_v31 = vmax.f32 %v2020_v11, 0.0  ;;  %v2475_v24 = vld [vmem:[%s4270_s25 + $0x1b8] sm:$0xff] }
 0x1c7   : > { %v2856_v60 = vadd.f32 %v2674_v23, %v2472_v47  ;;  %2315 = vst [vmem:[%s4232_s14 + $0x2b8] sm:$0xff] %v2123_v29  ;;  %v2645_v33 = vadd.f32 %v2123_v29, %v2122_v63  ;;  %2411 = vst [vmem:[%s4232_s14 + $0x5b8] sm:$0xff] %v2219_v42  ;;  %v5136_v21 = vadd.f32 %v2219_v42, %v2218_v48  ;;  %v2125_v56 = vmax.f32 %v1728_v59, 0.0  ;;  %v5744_v23 = vld [vmem:[#allocation6_spill] sm:$0xff]  ;;  %v2027_v42 = vpop.f32.mrb[93].mxu1 }
 0x1c8   : > { %2640 = vadd.xlane.f32.xlu0 %v2639_v15  ;;  %2906 = vst.msk [vmem:[%s4270_s25 + $0x28] sm:$0xff] %vm329_vm2, %v2809_v18  ;;  %3195 = vst.msk [vmem:[%s4270_s25 + $0x18] sm:$0xff] %vm329_vm2, %v3099_v20  ;;  %v3051_v15 = vld [vmem:[%s4270_s25 + $0x198] sm:$0xff]  ;;  %v2223_v52 = vmax.f32 %v2022_v10, 0.0  ;;  %v2026_v19 = vadd.f32 %v2025_v57, %v4986_v6  ;;  %v2028_v12 = vadd.f32 %v2027_v42, %v4986_v6  ;;  %v2031_v59 = vpop.f32.mrb[94].mxu1  ;;  %v2430_v10 = vld [vmem:[%s4270_s25 + $0x50] sm:$0xff] }
 0x1c9   : > { %2953 = vst.msk [vmem:[%s4270_s25 + $0x1a0] sm:$0xff] %vm329_vm2, %v2856_v60  ;;  %2781 = vadd.xlane.f32.xlu1 %v5068_v30  ;;  %v2677_v27 = vpop.xlane.xlu0 %2676  ;;  %v1731_v30 = vpop.f32.mrb[90].mxu0  ;;  %v3147_v0 = vmul.f32 0.00390625, %v3051_v15  ;;  %2316 = vst [vmem:[%s4232_s14 + $0x2c0] sm:$0xff] %v2124_v58  ;;  %v5159_v16 = vadd.f32 %v2125_v56, %v2124_v58  ;;  %v2428_v60 = vld [vmem:[%s4270_s25 + $0x40] sm:$0xff] }
 0x1ca   : > { %v2536_v45 = vpop.xlane.xlu1 %2535  ;;  %v2857_v1 = vadd.f32 %v2677_v27, %v2473_v8  ;;  %v1732_v51 = vadd.f32 %v1731_v30, %v5743_v39  ;;  %v1733_v41 = vpop.f32.mrb[91].mxu0  ;;  %2317 = vst [vmem:[%s4232_s14 + $0x2c8] sm:$0xff] %v2125_v56  ;;  %2414 = vst [vmem:[%s4232_s14 + $0x5d0] sm:$0xff] %v2222_v31  ;;  %v5185_v8 = vadd.f32 %v2223_v52, %v2222_v31  ;;  %v2224_v43 = vmax.f32 %v2026_v19, 0.0  ;;  %v2429_v27 = vld [vmem:[%s4270_s25 + $0x48] sm:$0xff] }
 0x1cb   : > { %v2810_v36 = vadd.f32 %v2536_v45, %v2426_v4  ;;  %v3004_v14 = vld [vmem:[%s4270_s25 + $0x20] sm:$0xff]  ;;  %v1734_v55 = vadd.f32 %v1733_v41, %v5743_v39  ;;  %3243 = vst.msk [vmem:[%s4270_s25 + $0x198] sm:$0xff] %vm329_vm2, %v3147_v0  ;;  %v1737_v7 = vpop.f32.mrb[92].mxu0  ;;  %2415 = vst [vmem:[%s4232_s14 + $0x5d8] sm:$0xff] %v2223_v52  ;;  %v2225_v6 = vmax.f32 %v2028_v12, 0.0  ;;  %v2033_v56 = vpop.f32.mrb[95].mxu1 }
 0x1cc   : > { %2784 = vadd.xlane.f32.xlu0 %v5087_v32  ;;  %2954 = vst.msk [vmem:[%s4270_s25 + $0x1a8] sm:$0xff] %vm329_vm2, %v2857_v1  ;;  %v3100_v32 = vmul.f32 0.00390625, %v3004_v14  ;;  %v2126_v50 = vmax.f32 %v1732_v51, 0.0  ;;  %v1738_v18 = vadd.f32 %v1737_v7, %v5744_v23  ;;  %v1739_v29 = vpop.f32.mrb[93].mxu0  ;;  %2416 = vst [vmem:[%s4232_s14 + $0x5e0] sm:$0xff] %v2224_v43  ;;  %v2032_v1 = vadd.f32 %v2031_v59, %v5019_v53  ;;  %v2433_v12 = vld [vmem:[%s4270_s25 + $0x68] sm:$0xff] }
 0x1cd   : > { %2907 = vst.msk [vmem:[%s4270_s25 + $0x30] sm:$0xff] %vm329_vm2, %v2810_v36  ;;  %2643 = vadd.xlane.f32.xlu1 %v5110_v61  ;;  %v2539_v13 = vpop.xlane.xlu0 %2538  ;;  %v2127_v47 = vmax.f32 %v1734_v55, 0.0  ;;  %v1740_v35 = vadd.f32 %v1739_v29, %v5744_v23  ;;  %v2476_v36 = vld [vmem:[%s4270_s25 + $0x1c0] sm:$0xff]  ;;  %2417 = vst [vmem:[%s4232_s14 + $0x5e8] sm:$0xff] %v2225_v6  ;;  %v2798_v0 = vadd.f32 %v2225_v6, %v2224_v43  ;;  %v2479_v29 = vld [vmem:[%s4270_s25 + $0x1d8] sm:$0xff] }
 0x1ce   : > { %v2680_v54 = vpop.xlane.xlu1 %2679  ;;  %v2811_v22 = vadd.f32 %v2539_v13, %v2427_v40  ;;  %3196 = vst.msk [vmem:[%s4270_s25 + $0x20] sm:$0xff] %vm329_vm2, %v3100_v32  ;;  %2318 = vst [vmem:[%s4232_s14 + $0x2d0] sm:$0xff] %v2126_v50  ;;  %v2128_v3 = vmax.f32 %v1738_v18, 0.0  ;;  %v2034_v40 = vadd.f32 %v2033_v56, %v5019_v53  ;;  %v2226_v39 = vmax.f32 %v2032_v1, 0.0  ;;  %v2477_v32 = vld [vmem:[%s4270_s25 + $0x1c8] sm:$0xff] }
 0x1cf   : > { %v3005_v5 = vld [vmem:[%s4270_s25 + $0x28] sm:$0xff]  ;;  %v2858_v61 = vadd.f32 %v2680_v54, %v2474_v38  ;;  %2319 = vst [vmem:[%s4232_s14 + $0x2d8] sm:$0xff] %v2127_v47  ;;  %v2651_v62 = vadd.f32 %v2127_v47, %v2126_v50  ;;  %v2129_v25 = vmax.f32 %v1740_v35, 0.0 }
 0x1d0   : > { %2646 = vadd.xlane.f32.xlu0 %v2645_v33  ;;  %v3052_v63 = vld [vmem:[%s4270_s25 + $0x1a0] sm:$0xff]  ;;  %v3101_v48 = vmul.f32 0.00390625, %v3005_v5  ;;  %2908 = vst.msk [vmem:[%s4270_s25 + $0x38] sm:$0xff] %vm329_vm2, %v2811_v22  ;;  %2320 = vst [vmem:[%s4232_s14 + $0x2e0] sm:$0xff] %v2128_v3  ;;  %v2227_v34 = vmax.f32 %v2034_v40, 0.0 }
 0x1d1   : > { %v3148_v49 = vmul.f32 0.00390625, %v3052_v63  ;;  %2955 = vst.msk [vmem:[%s4270_s25 + $0x1b0] sm:$0xff] %vm329_vm2, %v2858_v61  ;;  %2787 = vadd.xlane.f32.xlu1 %v5120_v9  ;;  %v2683_v20 = vpop.xlane.xlu0 %2682  ;;  %v1743_v9 = vpop.f32.mrb[94].mxu0  ;;  %2321 = vst [vmem:[%s4232_s14 + $0x2e8] sm:$0xff] %v2129_v25  ;;  %v2654_v30 = vadd.f32 %v2129_v25, %v2128_v3  ;;  %v2431_v61 = vld [vmem:[%s4270_s25 + $0x58] sm:$0xff] }
 0x1d2   : > { %3197 = vst.msk [vmem:[%s4270_s25 + $0x28] sm:$0xff] %vm329_vm2, %v3101_v48  ;;  %v2542_v37 = vpop.xlane.xlu1 %2541  ;;  %v2859_v28 = vadd.f32 %v2683_v20, %v2475_v24  ;;  %v1744_v45 = vadd.f32 %v1743_v9, %v5745_v44  ;;  %v1745_v15 = vpop.f32.mrb[95].mxu0  ;;  %2418 = vst [vmem:[%s4232_s14 + $0x5f0] sm:$0xff] %v2226_v39  ;;  %v2801_v31 = vadd.f32 %v2227_v34, %v2226_v39 }
 0x1d3   : > { %3244 = vst.msk [vmem:[%s4270_s25 + $0x1a0] sm:$0xff] %vm329_vm2, %v3148_v49  ;;  %v3053_v4 = vld [vmem:[%s4270_s25 + $0x1a8] sm:$0xff]  ;;  %v2812_v33 = vadd.f32 %v2542_v37, %v2428_v60  ;;  %v1746_v2 = vadd.f32 %v1745_v15, %v5745_v44  ;;  %2419 = vst [vmem:[%s4232_s14 + $0x5f8] sm:$0xff] %v2227_v34  ;;  %v2432_v49 = vld [vmem:[%s4270_s25 + $0x60] sm:$0xff] }
 0x1d4   : > { %2790 = vadd.xlane.f32.xlu0 %v5136_v21  ;;  %v3006_v58 = vld [vmem:[%s4270_s25 + $0x30] sm:$0xff]  ;;  %v3149_v17 = vmul.f32 0.00390625, %v3053_v4  ;;  %2956 = vst.msk [vmem:[%s4270_s25 + $0x1b8] sm:$0xff] %vm329_vm2, %v2859_v28  ;;  %v2130_v26 = vmax.f32 %v1744_v45, 0.0  ;;  %v2480_v4 = vld [vmem:[%s4270_s25 + $0x1e0] sm:$0xff]  ;;  %v2483_v34 = vld [vmem:[%s4270_s25 + $0x1f8] sm:$0xff] }
 0x1d5   : > { %v3102_v21 = vmul.f32 0.00390625, %v3006_v58  ;;  %2909 = vst.msk [vmem:[%s4270_s25 + $0x40] sm:$0xff] %vm329_vm2, %v2812_v33  ;;  %2649 = vadd.xlane.f32.xlu1 %v5159_v16  ;;  %v2545_v14 = vpop.xlane.xlu0 %2544  ;;  %v2131_v41 = vmax.f32 %v1746_v2, 0.0  ;;  %v2434_v45 = vld [vmem:[%s4270_s25 + $0x70] sm:$0xff]  ;;  %v2435_v2 = vld [vmem:[%s4270_s25 + $0x78] sm:$0xff] }
 0x1d6   : > { %3245 = vst.msk [vmem:[%s4270_s25 + $0x1a8] sm:$0xff] %vm329_vm2, %v3149_v17  ;;  %v2686_v51 = vpop.xlane.xlu1 %2685  ;;  %v2813_v11 = vadd.f32 %v2545_v14, %v2429_v27  ;;  %2322 = vst [vmem:[%s4232_s14 + $0x2f0] sm:$0xff] %v2130_v26  ;;  %v2481_v17 = vld [vmem:[%s4270_s25 + $0x1e8] sm:$0xff] }
 0x1d7   : > { %3198 = vst.msk [vmem:[%s4270_s25 + $0x30] sm:$0xff] %vm329_vm2, %v3102_v21  ;;  %v3007_v53 = vld [vmem:[%s4270_s25 + $0x38] sm:$0xff]  ;;  %v2860_v38 = vadd.f32 %v2686_v51, %v2476_v36  ;;  %2323 = vst [vmem:[%s4232_s14 + $0x2f8] sm:$0xff] %v2131_v41  ;;  %v2657_v50 = vadd.f32 %v2131_v41, %v2130_v26 }
 0x1d8   : > { %2652 = vadd.xlane.f32.xlu0 %v2651_v62  ;;  %v3054_v16 = vld [vmem:[%s4270_s25 + $0x1b0] sm:$0xff]  ;;  %v3103_v55 = vmul.f32 0.00390625, %v3007_v53  ;;  %2910 = vst.msk [vmem:[%s4270_s25 + $0x48] sm:$0xff] %vm329_vm2, %v2813_v11 }
 0x1d9   : > { %v3150_v13 = vmul.f32 0.00390625, %v3054_v16  ;;  %2957 = vst.msk [vmem:[%s4270_s25 + $0x1c0] sm:$0xff] %vm329_vm2, %v2860_v38  ;;  %2793 = vadd.xlane.f32.xlu1 %v5169_v46  ;;  %v2689_v54 = vpop.xlane.xlu0 %2688  ;;  %v2478_v46 = vld [vmem:[%s4270_s25 + $0x1d0] sm:$0xff]  ;;  %v2436_v16 = vld [vmem:[%s4270_s25 + $0x80] sm:$0xff] }
 0x1da   : > { %3199 = vst.msk [vmem:[%s4270_s25 + $0x38] sm:$0xff] %vm329_vm2, %v3103_v55  ;;  %v2548_v22 = vpop.xlane.xlu1 %2547  ;;  %v2861_v5 = vadd.f32 %v2689_v54, %v2477_v32 }
 0x1db   : > { %3246 = vst.msk [vmem:[%s4270_s25 + $0x1b0] sm:$0xff] %vm329_vm2, %v3150_v13  ;;  %v3055_v47 = vld [vmem:[%s4270_s25 + $0x1b8] sm:$0xff]  ;;  %v2814_v52 = vadd.f32 %v2548_v22, %v2430_v10  ;;  %v2437_v22 = vld [vmem:[%s4270_s25 + $0x88] sm:$0xff] }
 0x1dc   : > { %2796 = vadd.xlane.f32.xlu0 %v5185_v8  ;;  %v3008_v7 = vld [vmem:[%s4270_s25 + $0x40] sm:$0xff]  ;;  %v3151_v57 = vmul.f32 0.00390625, %v3055_v47  ;;  %2958 = vst.msk [vmem:[%s4270_s25 + $0x1c8] sm:$0xff] %vm329_vm2, %v2861_v5 }
 0x1dd   : > { %v3104_v24 = vmul.f32 0.00390625, %v3008_v7  ;;  %2911 = vst.msk [vmem:[%s4270_s25 + $0x50] sm:$0xff] %vm329_vm2, %v2814_v52  ;;  %2655 = vadd.xlane.f32.xlu1 %v2654_v30  ;;  %v2551_v63 = vpop.xlane.xlu0 %2550  ;;  %v2484_v52 = vld [vmem:[%s4270_s25 + $0x200] sm:$0xff] }
 0x1de   : > { %3247 = vst.msk [vmem:[%s4270_s25 + $0x1b8] sm:$0xff] %vm329_vm2, %v3151_v57  ;;  %v2692_v48 = vpop.xlane.xlu1 %2691  ;;  %v2815_v23 = vadd.f32 %v2551_v63, %v2431_v61 }
 0x1df   : > { %3200 = vst.msk [vmem:[%s4270_s25 + $0x40] sm:$0xff] %vm329_vm2, %v3104_v24  ;;  %v3009_v18 = vld [vmem:[%s4270_s25 + $0x48] sm:$0xff]  ;;  %v2862_v19 = vadd.f32 %v2692_v48, %v2478_v46 }
 0x1e0   : > { %2658 = vadd.xlane.f32.xlu0 %v2657_v50  ;;  %v3056_v42 = vld [vmem:[%s4270_s25 + $0x1c0] sm:$0xff]  ;;  %v3105_v60 = vmul.f32 0.00390625, %v3009_v18  ;;  %2912 = vst.msk [vmem:[%s4270_s25 + $0x58] sm:$0xff] %vm329_vm2, %v2815_v23  ;;  %v2485_v48 = vld [vmem:[%s4270_s25 + $0x208] sm:$0xff] }
 0x1e1   : > { %v3152_v62 = vmul.f32 0.00390625, %v3056_v42  ;;  %2959 = vst.msk [vmem:[%s4270_s25 + $0x1d0] sm:$0xff] %vm329_vm2, %v2862_v19  ;;  %2799 = vadd.xlane.f32.xlu1 %v2798_v0  ;;  %v2695_v8 = vpop.xlane.xlu0 %2694  ;;  %v2482_v0 = vld [vmem:[%s4270_s25 + $0x1f0] sm:$0xff] }
 0x1e2   : > { %3201 = vst.msk [vmem:[%s4270_s25 + $0x48] sm:$0xff] %vm329_vm2, %v3105_v60  ;;  %v2554_v35 = vpop.xlane.xlu1 %2553  ;;  %v2863_v20 = vadd.f32 %v2695_v8, %v2479_v29  ;;  %v2438_v19 = vld [vmem:[%s4270_s25 + $0x90] sm:$0xff] }
 0x1e3   : > { %3248 = vst.msk [vmem:[%s4270_s25 + $0x1c0] sm:$0xff] %vm329_vm2, %v3152_v62  ;;  %v3057_v3 = vld [vmem:[%s4270_s25 + $0x1c8] sm:$0xff]  ;;  %v2816_v43 = vadd.f32 %v2554_v35, %v2432_v49  ;;  %v2439_v35 = vld [vmem:[%s4270_s25 + $0x98] sm:$0xff] }
 0x1e4   : > { %2802 = vadd.xlane.f32.xlu0 %v2801_v31  ;;  %v3010_v37 = vld [vmem:[%s4270_s25 + $0x50] sm:$0xff]  ;;  %v3153_v28 = vmul.f32 0.00390625, %v3057_v3  ;;  %2960 = vst.msk [vmem:[%s4270_s25 + $0x1d8] sm:$0xff] %vm329_vm2, %v2863_v20 }
 0x1e5   : > { %v3106_v25 = vmul.f32 0.00390625, %v3010_v37  ;;  %2913 = vst.msk [vmem:[%s4270_s25 + $0x60] sm:$0xff] %vm329_vm2, %v2816_v43  ;;  %v2557_v33 = vpop.xlane.xlu0 %2556  ;;  %v2486_v43 = vld [vmem:[%s4270_s25 + $0x210] sm:$0xff] }
 0x1e6   : > { %3249 = vst.msk [vmem:[%s4270_s25 + $0x1c8] sm:$0xff] %vm329_vm2, %v3153_v28  ;;  %v2698_v9 = vpop.xlane.xlu1 %2697  ;;  %v2817_v59 = vadd.f32 %v2557_v33, %v2433_v12 }
 0x1e7   : > { %3202 = vst.msk [vmem:[%s4270_s25 + $0x50] sm:$0xff] %vm329_vm2, %v3106_v25  ;;  %v3011_v27 = vld [vmem:[%s4270_s25 + $0x58] sm:$0xff]  ;;  %v2864_v58 = vadd.f32 %v2698_v9, %v2480_v4 }
 0x1e8   : > { %v3058_v6 = vld [vmem:[%s4270_s25 + $0x1d0] sm:$0xff]  ;;  %v3107_v44 = vmul.f32 0.00390625, %v3011_v27  ;;  %2914 = vst.msk [vmem:[%s4270_s25 + $0x68] sm:$0xff] %vm329_vm2, %v2817_v59  ;;  %v2487_v9 = vld [vmem:[%s4270_s25 + $0x218] sm:$0xff] }
 0x1e9   : > { %v3154_v1 = vmul.f32 0.00390625, %v3058_v6  ;;  %2961 = vst.msk [vmem:[%s4270_s25 + $0x1e0] sm:$0xff] %vm329_vm2, %v2864_v58  ;;  %v2701_v15 = vpop.xlane.xlu0 %2700  ;;  %v2440_v58 = vld [vmem:[%s4270_s25 + $0xa0] sm:$0xff] }
 0x1ea   : > { %3203 = vst.msk [vmem:[%s4270_s25 + $0x58] sm:$0xff] %vm329_vm2, %v3107_v44  ;;  %v2560_v56 = vpop.xlane.xlu1 %2559  ;;  %v2865_v36 = vadd.f32 %v2701_v15, %v2481_v17 }
 0x1eb   : > { %3250 = vst.msk [vmem:[%s4270_s25 + $0x1d0] sm:$0xff] %vm329_vm2, %v3154_v1  ;;  %v3059_v21 = vld [vmem:[%s4270_s25 + $0x1d8] sm:$0xff]  ;;  %v2818_v30 = vadd.f32 %v2560_v56, %v2434_v45  ;;  %v2441_v56 = vld [vmem:[%s4270_s25 + $0xa8] sm:$0xff] }
 0x1ec   : > { %v3012_v40 = vld [vmem:[%s4270_s25 + $0x60] sm:$0xff]  ;;  %v3155_v14 = vmul.f32 0.00390625, %v3059_v21  ;;  %2962 = vst.msk [vmem:[%s4270_s25 + $0x1e8] sm:$0xff] %vm329_vm2, %v2865_v36 }
 0x1ed   : > { %v3108_v26 = vmul.f32 0.00390625, %v3012_v40  ;;  %2915 = vst.msk [vmem:[%s4270_s25 + $0x70] sm:$0xff] %vm329_vm2, %v2818_v30  ;;  %v2563_v39 = vpop.xlane.xlu0 %2562  ;;  %v2488_v30 = vld [vmem:[%s4270_s25 + $0x220] sm:$0xff] }
 0x1ee   : > { %3251 = vst.msk [vmem:[%s4270_s25 + $0x1d8] sm:$0xff] %vm329_vm2, %v3155_v14  ;;  %v2704_v51 = vpop.xlane.xlu1 %2703  ;;  %v2819_v11 = vadd.f32 %v2563_v39, %v2435_v2 }
 0x1ef   : > { %3204 = vst.msk [vmem:[%s4270_s25 + $0x60] sm:$0xff] %vm329_vm2, %v3108_v26  ;;  %v3013_v53 = vld [vmem:[%s4270_s25 + $0x68] sm:$0xff]  ;;  %v2866_v41 = vadd.f32 %v2704_v51, %v2482_v0 }
 0x1f0   : > { %v3060_v38 = vld [vmem:[%s4270_s25 + $0x1e0] sm:$0xff]  ;;  %v3109_v32 = vmul.f32 0.00390625, %v3013_v53  ;;  %2916 = vst.msk [vmem:[%s4270_s25 + $0x78] sm:$0xff] %vm329_vm2, %v2819_v11  ;;  %v2489_v51 = vld [vmem:[%s4270_s25 + $0x228] sm:$0xff] }
 0x1f1   : > { %v3156_v55 = vmul.f32 0.00390625, %v3060_v38  ;;  %2963 = vst.msk [vmem:[%s4270_s25 + $0x1f0] sm:$0xff] %vm329_vm2, %v2866_v41  ;;  %v2707_v10 = vpop.xlane.xlu0 %2706  ;;  %v2442_v41 = vld [vmem:[%s4270_s25 + $0xb0] sm:$0xff] }
 0x1f2   : > { %3205 = vst.msk [vmem:[%s4270_s25 + $0x68] sm:$0xff] %vm329_vm2, %v3109_v32  ;;  %v2566_v13 = vpop.xlane.xlu1 %2565  ;;  %v2867_v50 = vadd.f32 %v2707_v10, %v2483_v34 }
 0x1f3   : > { %3252 = vst.msk [vmem:[%s4270_s25 + $0x1e0] sm:$0xff] %vm329_vm2, %v3156_v55  ;;  %v3061_v31 = vld [vmem:[%s4270_s25 + $0x1e8] sm:$0xff]  ;;  %v2820_v54 = vadd.f32 %v2566_v13, %v2436_v16  ;;  %v2443_v13 = vld [vmem:[%s4270_s25 + $0xb8] sm:$0xff] }
 0x1f4   : > { %v3014_v5 = vld [vmem:[%s4270_s25 + $0x70] sm:$0xff]  ;;  %v3157_v47 = vmul.f32 0.00390625, %v3061_v31  ;;  %2964 = vst.msk [vmem:[%s4270_s25 + $0x1f8] sm:$0xff] %vm329_vm2, %v2867_v50 }
 0x1f5   : > { %v3110_v61 = vmul.f32 0.00390625, %v3014_v5  ;;  %2917 = vst.msk [vmem:[%s4270_s25 + $0x80] sm:$0xff] %vm329_vm2, %v2820_v54  ;;  %v2569_v7 = vpop.xlane.xlu0 %2568  ;;  %v2490_v54 = vld [vmem:[%s4270_s25 + $0x230] sm:$0xff] }
 0x1f6   : > { %3253 = vst.msk [vmem:[%s4270_s25 + $0x1e8] sm:$0xff] %vm329_vm2, %v3157_v47  ;;  %v2710_v57 = vpop.xlane.xlu1 %2709  ;;  %v2821_v46 = vadd.f32 %v2569_v7, %v2437_v22 }
 0x1f7   : > { %3206 = vst.msk [vmem:[%s4270_s25 + $0x70] sm:$0xff] %vm329_vm2, %v3110_v61  ;;  %v3015_v24 = vld [vmem:[%s4270_s25 + $0x78] sm:$0xff]  ;;  %v2868_v63 = vadd.f32 %v2710_v57, %v2484_v52 }
 0x1f8   : > { %v3062_v23 = vld [vmem:[%s4270_s25 + $0x1f0] sm:$0xff]  ;;  %v3111_v18 = vmul.f32 0.00390625, %v3015_v24  ;;  %2918 = vst.msk [vmem:[%s4270_s25 + $0x88] sm:$0xff] %vm329_vm2, %v2821_v46  ;;  %v2491_v57 = vld [vmem:[%s4270_s25 + $0x238] sm:$0xff] }
 0x1f9   : > { %v3158_v29 = vmul.f32 0.00390625, %v3062_v23  ;;  %2965 = vst.msk [vmem:[%s4270_s25 + $0x200] sm:$0xff] %vm329_vm2, %v2868_v63  ;;  %v2713_v42 = vpop.xlane.xlu0 %2712  ;;  %v2444_v63 = vld [vmem:[%s4270_s25 + $0xc0] sm:$0xff] }
 0x1fa   : > { %3207 = vst.msk [vmem:[%s4270_s25 + $0x78] sm:$0xff] %vm329_vm2, %v3111_v18  ;;  %v2572_v60 = vpop.xlane.xlu1 %2571  ;;  %v2869_v49 = vadd.f32 %v2713_v42, %v2485_v48 }
 0x1fb   : > { %3254 = vst.msk [vmem:[%s4270_s25 + $0x1f0] sm:$0xff] %vm329_vm2, %v3158_v29  ;;  %v3063_v62 = vld [vmem:[%s4270_s25 + $0x1f8] sm:$0xff]  ;;  %v2822_v8 = vadd.f32 %v2572_v60, %v2438_v19  ;;  %v2445_v60 = vld [vmem:[%s4270_s25 + $0xc8] sm:$0xff] }
 0x1fc   : > { %v3016_v20 = vld [vmem:[%s4270_s25 + $0x80] sm:$0xff]  ;;  %v3159_v3 = vmul.f32 0.00390625, %v3063_v62  ;;  %2966 = vst.msk [vmem:[%s4270_s25 + $0x208] sm:$0xff] %vm329_vm2, %v2869_v49 }
 0x1fd   : > { %v3112_v12 = vmul.f32 0.00390625, %v3016_v20  ;;  %2919 = vst.msk [vmem:[%s4270_s25 + $0x90] sm:$0xff] %vm329_vm2, %v2822_v8  ;;  %v2575_v37 = vpop.xlane.xlu0 %2574  ;;  %v2492_v8 = vld [vmem:[%s4270_s25 + $0x240] sm:$0xff] }
 0x1fe   : > { %3255 = vst.msk [vmem:[%s4270_s25 + $0x1f8] sm:$0xff] %vm329_vm2, %v3159_v3  ;;  %v2716_v28 = vpop.xlane.xlu1 %2715  ;;  %v2823_v4 = vadd.f32 %v2575_v37, %v2439_v35 }
 0x1ff   : > { %3208 = vst.msk [vmem:[%s4270_s25 + $0x80] sm:$0xff] %vm329_vm2, %v3112_v12  ;;  %v3017_v25 = vld [vmem:[%s4270_s25 + $0x88] sm:$0xff]  ;;  %v2870_v33 = vadd.f32 %v2716_v28, %v2486_v43 }
 0x200   : > { %v3064_v59 = vld [vmem:[%s4270_s25 + $0x200] sm:$0xff]  ;;  %v3113_v27 = vmul.f32 0.00390625, %v3017_v25  ;;  %2920 = vst.msk [vmem:[%s4270_s25 + $0x98] sm:$0xff] %vm329_vm2, %v2823_v4  ;;  %v2493_v28 = vld [vmem:[%s4270_s25 + $0x248] sm:$0xff] }
 0x201   : > { %v3160_v17 = vmul.f32 0.00390625, %v3064_v59  ;;  %2967 = vst.msk [vmem:[%s4270_s25 + $0x210] sm:$0xff] %vm329_vm2, %v2870_v33  ;;  %v2719_v6 = vpop.xlane.xlu0 %2718  ;;  %v2446_v33 = vld [vmem:[%s4270_s25 + $0xd0] sm:$0xff] }
 0x202   : > { %3209 = vst.msk [vmem:[%s4270_s25 + $0x88] sm:$0xff] %vm329_vm2, %v3113_v27  ;;  %v2578_v44 = vpop.xlane.xlu1 %2577  ;;  %v2871_v45 = vadd.f32 %v2719_v6, %v2487_v9 }
 0x203   : > { %3256 = vst.msk [vmem:[%s4270_s25 + $0x200] sm:$0xff] %vm329_vm2, %v3160_v17  ;;  %v3065_v1 = vld [vmem:[%s4270_s25 + $0x208] sm:$0xff]  ;;  %v2824_v15 = vadd.f32 %v2578_v44, %v2440_v58  ;;  %v2447_v44 = vld [vmem:[%s4270_s25 + $0xd8] sm:$0xff] }
 0x204   : > { %v3018_v36 = vld [vmem:[%s4270_s25 + $0x90] sm:$0xff]  ;;  %v3161_v21 = vmul.f32 0.00390625, %v3065_v1  ;;  %2968 = vst.msk [vmem:[%s4270_s25 + $0x218] sm:$0xff] %vm329_vm2, %v2871_v45 }
 0x205   : > { %v3114_v2 = vmul.f32 0.00390625, %v3018_v36  ;;  %2921 = vst.msk [vmem:[%s4270_s25 + $0xa0] sm:$0xff] %vm329_vm2, %v2824_v15  ;;  %v2581_v40 = vpop.xlane.xlu0 %2580  ;;  %v2494_v15 = vld [vmem:[%s4270_s25 + $0x250] sm:$0xff] }
 0x206   : > { %3257 = vst.msk [vmem:[%s4270_s25 + $0x208] sm:$0xff] %vm329_vm2, %v3161_v21  ;;  %v2722_v14 = vpop.xlane.xlu1 %2721  ;;  %v2825_v0 = vadd.f32 %v2581_v40, %v2441_v56 }
 0x207   : > { %3210 = vst.msk [vmem:[%s4270_s25 + $0x90] sm:$0xff] %vm329_vm2, %v3114_v2  ;;  %v3019_v26 = vld [vmem:[%s4270_s25 + $0x98] sm:$0xff]  ;;  %v2872_v39 = vadd.f32 %v2722_v14, %v2488_v30 }
 0x208   : > { %v3066_v11 = vld [vmem:[%s4270_s25 + $0x210] sm:$0xff]  ;;  %v3115_v53 = vmul.f32 0.00390625, %v3019_v26  ;;  %2922 = vst.msk [vmem:[%s4270_s25 + $0xa8] sm:$0xff] %vm329_vm2, %v2825_v0  ;;  %v2495_v14 = vld [vmem:[%s4270_s25 + $0x258] sm:$0xff] }
 0x209   : > { %v3162_v34 = vmul.f32 0.00390625, %v3066_v11  ;;  %2969 = vst.msk [vmem:[%s4270_s25 + $0x220] sm:$0xff] %vm329_vm2, %v2872_v39  ;;  %v2725_v38 = vpop.xlane.xlu0 %2724  ;;  %v2448_v39 = vld [vmem:[%s4270_s25 + $0xe0] sm:$0xff] }
 0x20a   : > { %3211 = vst.msk [vmem:[%s4270_s25 + $0x98] sm:$0xff] %vm329_vm2, %v3115_v53  ;;  %v2584_v32 = vpop.xlane.xlu1 %2583  ;;  %v2873_v16 = vadd.f32 %v2725_v38, %v2489_v51 }
 0x20b   : > { %3258 = vst.msk [vmem:[%s4270_s25 + $0x210] sm:$0xff] %vm329_vm2, %v3162_v34  ;;  %v3067_v55 = vld [vmem:[%s4270_s25 + $0x218] sm:$0xff]  ;;  %v2826_v10 = vadd.f32 %v2584_v32, %v2442_v41  ;;  %v2449_v32 = vld [vmem:[%s4270_s25 + $0xe8] sm:$0xff] }
 0x20c   : > { %v3020_v50 = vld [vmem:[%s4270_s25 + $0xa0] sm:$0xff]  ;;  %v3163_v31 = vmul.f32 0.00390625, %v3067_v55  ;;  %2970 = vst.msk [vmem:[%s4270_s25 + $0x228] sm:$0xff] %vm329_vm2, %v2873_v16 }
 0x20d   : > { %v3116_v22 = vmul.f32 0.00390625, %v3020_v50  ;;  %2923 = vst.msk [vmem:[%s4270_s25 + $0xb0] sm:$0xff] %vm329_vm2, %v2826_v10  ;;  %v2587_v5 = vpop.xlane.xlu0 %2586  ;;  %v2496_v10 = vld [vmem:[%s4270_s25 + $0x260] sm:$0xff] }
 0x20e   : > { %3259 = vst.msk [vmem:[%s4270_s25 + $0x218] sm:$0xff] %vm329_vm2, %v3163_v31  ;;  %v2728_v47 = vpop.xlane.xlu1 %2727  ;;  %v2827_v52 = vadd.f32 %v2587_v5, %v2443_v13 }
 0x20f   : > { %3212 = vst.msk [vmem:[%s4270_s25 + $0xa0] sm:$0xff] %vm329_vm2, %v3116_v22  ;;  %v3021_v61 = vld [vmem:[%s4270_s25 + $0xa8] sm:$0xff]  ;;  %v2874_v7 = vadd.f32 %v2728_v47, %v2490_v54 }
 0x210   : > { %v3068_v46 = vld [vmem:[%s4270_s25 + $0x220] sm:$0xff]  ;;  %v3117_v24 = vmul.f32 0.00390625, %v3021_v61  ;;  %2924 = vst.msk [vmem:[%s4270_s25 + $0xb8] sm:$0xff] %vm329_vm2, %v2827_v52  ;;  %v2497_v47 = vld [vmem:[%s4270_s25 + $0x268] sm:$0xff] }
 0x211   : > { %v3164_v48 = vmul.f32 0.00390625, %v3068_v46  ;;  %2971 = vst.msk [vmem:[%s4270_s25 + $0x230] sm:$0xff] %vm329_vm2, %v2874_v7  ;;  %v2731_v23 = vpop.xlane.xlu0 %2730  ;;  %v2450_v7 = vld [vmem:[%s4270_s25 + $0xf0] sm:$0xff] }
 0x212   : > { %3213 = vst.msk [vmem:[%s4270_s25 + $0xa8] sm:$0xff] %vm329_vm2, %v3117_v24  ;;  %v2590_v18 = vpop.xlane.xlu1 %2589  ;;  %v2875_v19 = vadd.f32 %v2731_v23, %v2491_v57 }
 0x213   : > { %3260 = vst.msk [vmem:[%s4270_s25 + $0x220] sm:$0xff] %vm329_vm2, %v3164_v48  ;;  %v3069_v29 = vld [vmem:[%s4270_s25 + $0x228] sm:$0xff]  ;;  %v2828_v42 = vadd.f32 %v2590_v18, %v2444_v63  ;;  %v2451_v18 = vld [vmem:[%s4270_s25 + $0xf8] sm:$0xff] }
 0x214   : > { %v3022_v49 = vld [vmem:[%s4270_s25 + $0xb0] sm:$0xff]  ;;  %v3165_v62 = vmul.f32 0.00390625, %v3069_v29  ;;  %2972 = vst.msk [vmem:[%s4270_s25 + $0x238] sm:$0xff] %vm329_vm2, %v2875_v19 }
 0x215   : > { %v3118_v35 = vmul.f32 0.00390625, %v3022_v49  ;;  %2925 = vst.msk [vmem:[%s4270_s25 + $0xc0] sm:$0xff] %vm329_vm2, %v2828_v42  ;;  %v2593_v20 = vpop.xlane.xlu0 %2592  ;;  %v2498_v42 = vld [vmem:[%s4270_s25 + $0x270] sm:$0xff] }
 0x216   : > { %3261 = vst.msk [vmem:[%s4270_s25 + $0x228] sm:$0xff] %vm329_vm2, %v3165_v62  ;;  %v2734_v3 = vpop.xlane.xlu1 %2733  ;;  %v2829_v43 = vadd.f32 %v2593_v20, %v2445_v60 }
 0x217   : > { %3214 = vst.msk [vmem:[%s4270_s25 + $0xb0] sm:$0xff] %vm329_vm2, %v3118_v35  ;;  %v3023_v12 = vld [vmem:[%s4270_s25 + $0xb8] sm:$0xff]  ;;  %v2876_v37 = vadd.f32 %v2734_v3, %v2492_v8 }
 0x218   : > { %v3070_v4 = vld [vmem:[%s4270_s25 + $0x230] sm:$0xff]  ;;  %v3119_v25 = vmul.f32 0.00390625, %v3023_v12  ;;  %2926 = vst.msk [vmem:[%s4270_s25 + $0xc8] sm:$0xff] %vm329_vm2, %v2829_v43  ;;  %v2499_v3 = vld [vmem:[%s4270_s25 + $0x278] sm:$0xff] }
 0x219   : > { %v3166_v9 = vmul.f32 0.00390625, %v3070_v4  ;;  %2973 = vst.msk [vmem:[%s4270_s25 + $0x240] sm:$0xff] %vm329_vm2, %v2876_v37  ;;  %v2737_v59 = vpop.xlane.xlu0 %2736  ;;  %v2452_v37 = vld [vmem:[%s4270_s25 + $0x100] sm:$0xff] }
 0x21a   : > { %3215 = vst.msk [vmem:[%s4270_s25 + $0xb8] sm:$0xff] %vm329_vm2, %v3119_v25  ;;  %v2596_v27 = vpop.xlane.xlu1 %2595  ;;  %v2877_v58 = vadd.f32 %v2737_v59, %v2493_v28 }
 0x21b   : > { %3262 = vst.msk [vmem:[%s4270_s25 + $0x230] sm:$0xff] %vm329_vm2, %v3166_v9  ;;  %v3071_v17 = vld [vmem:[%s4270_s25 + $0x238] sm:$0xff]  ;;  %v2830_v6 = vadd.f32 %v2596_v27, %v2446_v33  ;;  %v2453_v27 = vld [vmem:[%s4270_s25 + $0x108] sm:$0xff] }
 0x21c   : > { %v3024_v45 = vld [vmem:[%s4270_s25 + $0xc0] sm:$0xff]  ;;  %v3167_v1 = vmul.f32 0.00390625, %v3071_v17  ;;  %2974 = vst.msk [vmem:[%s4270_s25 + $0x248] sm:$0xff] %vm329_vm2, %v2877_v58 }
 0x21d   : > { %v3120_v56 = vmul.f32 0.00390625, %v3024_v45  ;;  %2927 = vst.msk [vmem:[%s4270_s25 + $0xd0] sm:$0xff] %vm329_vm2, %v2830_v6  ;;  %v2599_v36 = vpop.xlane.xlu0 %2598  ;;  %v2500_v6 = vld [vmem:[%s4270_s25 + $0x280] sm:$0xff] }
 0x21e   : > { %3263 = vst.msk [vmem:[%s4270_s25 + $0x238] sm:$0xff] %vm329_vm2, %v3167_v1  ;;  %v2740_v21 = vpop.xlane.xlu1 %2739  ;;  %v2831_v30 = vadd.f32 %v2599_v36, %v2447_v44 }
 0x21f   : > { %3216 = vst.msk [vmem:[%s4270_s25 + $0xc0] sm:$0xff] %vm329_vm2, %v3120_v56  ;;  %v3025_v2 = vld [vmem:[%s4270_s25 + $0xc8] sm:$0xff]  ;;  %v2878_v40 = vadd.f32 %v2740_v21, %v2494_v15 }
 0x220   : > { %v3072_v0 = vld [vmem:[%s4270_s25 + $0x240] sm:$0xff]  ;;  %v3121_v26 = vmul.f32 0.00390625, %v3025_v2  ;;  %2928 = vst.msk [vmem:[%s4270_s25 + $0xd8] sm:$0xff] %vm329_vm2, %v2831_v30  ;;  %v2501_v21 = vld [vmem:[%s4270_s25 + $0x288] sm:$0xff] }
 0x221   : > { %v3168_v51 = vmul.f32 0.00390625, %v3072_v0  ;;  %2975 = vst.msk [vmem:[%s4270_s25 + $0x250] sm:$0xff] %vm329_vm2, %v2878_v40  ;;  %v2743_v11 = vpop.xlane.xlu0 %2742  ;;  %v2454_v40 = vld [vmem:[%s4270_s25 + $0x110] sm:$0xff] }
 0x222   : > { %3217 = vst.msk [vmem:[%s4270_s25 + $0xc8] sm:$0xff] %vm329_vm2, %v3121_v26  ;;  %v2602_v53 = vpop.xlane.xlu1 %2601  ;;  %v2879_v41 = vadd.f32 %v2743_v11, %v2495_v14 }
 0x223   : > { %3264 = vst.msk [vmem:[%s4270_s25 + $0x240] sm:$0xff] %vm329_vm2, %v3168_v51  ;;  %v3073_v34 = vld [vmem:[%s4270_s25 + $0x248] sm:$0xff]  ;;  %v2832_v38 = vadd.f32 %v2602_v53, %v2448_v39  ;;  %v2455_v53 = vld [vmem:[%s4270_s25 + $0x118] sm:$0xff] }
 0x224   : > { %v3026_v16 = vld [vmem:[%s4270_s25 + $0xd0] sm:$0xff]  ;;  %v3169_v55 = vmul.f32 0.00390625, %v3073_v34  ;;  %2976 = vst.msk [vmem:[%s4270_s25 + $0x258] sm:$0xff] %vm329_vm2, %v2879_v41 }
 0x225   : > { %v3122_v13 = vmul.f32 0.00390625, %v3026_v16  ;;  %2929 = vst.msk [vmem:[%s4270_s25 + $0xe0] sm:$0xff] %vm329_vm2, %v2832_v38  ;;  %v2605_v50 = vpop.xlane.xlu0 %2604  ;;  %v2502_v38 = vld [vmem:[%s4270_s25 + $0x290] sm:$0xff] }
 0x226   : > { %3265 = vst.msk [vmem:[%s4270_s25 + $0x248] sm:$0xff] %vm329_vm2, %v3169_v55  ;;  %v2746_v31 = vpop.xlane.xlu1 %2745  ;;  %v2833_v54 = vadd.f32 %v2605_v50, %v2449_v32 }
 0x227   : > { %3218 = vst.msk [vmem:[%s4270_s25 + $0xd0] sm:$0xff] %vm329_vm2, %v3122_v13  ;;  %v3027_v22 = vld [vmem:[%s4270_s25 + $0xd8] sm:$0xff]  ;;  %v2880_v5 = vadd.f32 %v2746_v31, %v2496_v10 }
 0x228   : > { %v3074_v52 = vld [vmem:[%s4270_s25 + $0x250] sm:$0xff]  ;;  %v3123_v61 = vmul.f32 0.00390625, %v3027_v22  ;;  %2930 = vst.msk [vmem:[%s4270_s25 + $0xe8] sm:$0xff] %vm329_vm2, %v2833_v54  ;;  %v2503_v31 = vld [vmem:[%s4270_s25 + $0x298] sm:$0xff] }
 0x229   : > { %v3170_v57 = vmul.f32 0.00390625, %v3074_v52  ;;  %2977 = vst.msk [vmem:[%s4270_s25 + $0x260] sm:$0xff] %vm329_vm2, %v2880_v5  ;;  %v2749_v46 = vpop.xlane.xlu0 %2748  ;;  %v2456_v5 = vld [vmem:[%s4270_s25 + $0x120] sm:$0xff] }
 0x22a   : > { %3219 = vst.msk [vmem:[%s4270_s25 + $0xd8] sm:$0xff] %vm329_vm2, %v3123_v61  ;;  %v2608_v24 = vpop.xlane.xlu1 %2607  ;;  %v2881_v63 = vadd.f32 %v2749_v46, %v2497_v47 }
 0x22b   : > { %3266 = vst.msk [vmem:[%s4270_s25 + $0x250] sm:$0xff] %vm329_vm2, %v3170_v57  ;;  %v3075_v48 = vld [vmem:[%s4270_s25 + $0x258] sm:$0xff]  ;;  %v2834_v23 = vadd.f32 %v2608_v24, %v2450_v7  ;;  %v2457_v24 = vld [vmem:[%s4270_s25 + $0x128] sm:$0xff] }
 0x22c   : > { %v3028_v19 = vld [vmem:[%s4270_s25 + $0xe0] sm:$0xff]  ;;  %v3171_v29 = vmul.f32 0.00390625, %v3075_v48  ;;  %2978 = vst.msk [vmem:[%s4270_s25 + $0x268] sm:$0xff] %vm329_vm2, %v2881_v63 }
 0x22d   : > { %v3124_v60 = vmul.f32 0.00390625, %v3028_v19  ;;  %2931 = vst.msk [vmem:[%s4270_s25 + $0xf0] sm:$0xff] %vm329_vm2, %v2834_v23  ;;  %v2611_v49 = vpop.xlane.xlu0 %2610  ;;  %v2504_v23 = vld [vmem:[%s4270_s25 + $0x2a0] sm:$0xff] }
 0x22e   : > { %3267 = vst.msk [vmem:[%s4270_s25 + $0x258] sm:$0xff] %vm329_vm2, %v3171_v29  ;;  %v2752_v62 = vpop.xlane.xlu1 %2751  ;;  %v2835_v8 = vadd.f32 %v2611_v49, %v2451_v18 }
 0x22f   : > { %3220 = vst.msk [vmem:[%s4270_s25 + $0xe0] sm:$0xff] %vm329_vm2, %v3124_v60  ;;  %v3029_v35 = vld [vmem:[%s4270_s25 + $0xe8] sm:$0xff]  ;;  %v2882_v20 = vadd.f32 %v2752_v62, %v2498_v42 }
 0x230   : > { %v3076_v43 = vld [vmem:[%s4270_s25 + $0x260] sm:$0xff]  ;;  %v3125_v12 = vmul.f32 0.00390625, %v3029_v35  ;;  %2932 = vst.msk [vmem:[%s4270_s25 + $0xf8] sm:$0xff] %vm329_vm2, %v2835_v8  ;;  %v2505_v62 = vld [vmem:[%s4270_s25 + $0x2a8] sm:$0xff] }
 0x231   : > { %v3172_v28 = vmul.f32 0.00390625, %v3076_v43  ;;  %2979 = vst.msk [vmem:[%s4270_s25 + $0x270] sm:$0xff] %vm329_vm2, %v2882_v20  ;;  %v2755_v4 = vpop.xlane.xlu0 %2754  ;;  %v2458_v20 = vld [vmem:[%s4270_s25 + $0x130] sm:$0xff] }
 0x232   : > { %3221 = vst.msk [vmem:[%s4270_s25 + $0xe8] sm:$0xff] %vm329_vm2, %v3125_v12  ;;  %v2614_v25 = vpop.xlane.xlu1 %2613  ;;  %v2883_v33 = vadd.f32 %v2755_v4, %v2499_v3 }
 0x233   : > { %3268 = vst.msk [vmem:[%s4270_s25 + $0x260] sm:$0xff] %vm329_vm2, %v3172_v28  ;;  %v3077_v9 = vld [vmem:[%s4270_s25 + $0x268] sm:$0xff]  ;;  %v2836_v59 = vadd.f32 %v2614_v25, %v2452_v37  ;;  %v2459_v25 = vld [vmem:[%s4270_s25 + $0x138] sm:$0xff] }
 0x234   : > { %v3030_v58 = vld [vmem:[%s4270_s25 + $0xf0] sm:$0xff]  ;;  %v3173_v17 = vmul.f32 0.00390625, %v3077_v9  ;;  %2980 = vst.msk [vmem:[%s4270_s25 + $0x278] sm:$0xff] %vm329_vm2, %v2883_v33 }
 0x235   : > { %v3126_v44 = vmul.f32 0.00390625, %v3030_v58  ;;  %2933 = vst.msk [vmem:[%s4270_s25 + $0x100] sm:$0xff] %vm329_vm2, %v2836_v59  ;;  %v2617_v45 = vpop.xlane.xlu0 %2616  ;;  %v2506_v59 = vld [vmem:[%s4270_s25 + $0x2b0] sm:$0xff] }
 0x236   : > { %3269 = vst.msk [vmem:[%s4270_s25 + $0x268] sm:$0xff] %vm329_vm2, %v3173_v17  ;;  %v2758_v1 = vpop.xlane.xlu1 %2757  ;;  %v2837_v15 = vadd.f32 %v2617_v45, %v2453_v27 }
 0x237   : > { %3222 = vst.msk [vmem:[%s4270_s25 + $0xf0] sm:$0xff] %vm329_vm2, %v3126_v44  ;;  %v3031_v56 = vld [vmem:[%s4270_s25 + $0xf8] sm:$0xff]  ;;  %v2884_v36 = vadd.f32 %v2758_v1, %v2500_v6 }
 0x238   : > { %v3078_v30 = vld [vmem:[%s4270_s25 + $0x270] sm:$0xff]  ;;  %v3127_v2 = vmul.f32 0.00390625, %v3031_v56  ;;  %2934 = vst.msk [vmem:[%s4270_s25 + $0x108] sm:$0xff] %vm329_vm2, %v2837_v15  ;;  %v2507_v1 = vld [vmem:[%s4270_s25 + $0x2b8] sm:$0xff] }
 0x239   : > { %v3174_v14 = vmul.f32 0.00390625, %v3078_v30  ;;  %2981 = vst.msk [vmem:[%s4270_s25 + $0x280] sm:$0xff] %vm329_vm2, %v2884_v36  ;;  %v2761_v0 = vpop.xlane.xlu0 %2760  ;;  %v2460_v36 = vld [vmem:[%s4270_s25 + $0x140] sm:$0xff] }
 0x23a   : > { %3223 = vst.msk [vmem:[%s4270_s25 + $0xf8] sm:$0xff] %vm329_vm2, %v3127_v2  ;;  %v2620_v26 = vpop.xlane.xlu1 %2619  ;;  %v2885_v39 = vadd.f32 %v2761_v0, %v2501_v21 }
 0x23b   : > { %3270 = vst.msk [vmem:[%s4270_s25 + $0x270] sm:$0xff] %vm329_vm2, %v3174_v14  ;;  %v3079_v51 = vld [vmem:[%s4270_s25 + $0x278] sm:$0xff]  ;;  %v2838_v11 = vadd.f32 %v2620_v26, %v2454_v40  ;;  %v2461_v26 = vld [vmem:[%s4270_s25 + $0x148] sm:$0xff] }
 0x23c   : > { %v3032_v41 = vld [vmem:[%s4270_s25 + $0x100] sm:$0xff]  ;;  %v3175_v34 = vmul.f32 0.00390625, %v3079_v51  ;;  %2982 = vst.msk [vmem:[%s4270_s25 + $0x288] sm:$0xff] %vm329_vm2, %v2885_v39 }
 0x23d   : > { %v3128_v32 = vmul.f32 0.00390625, %v3032_v41  ;;  %2935 = vst.msk [vmem:[%s4270_s25 + $0x110] sm:$0xff] %vm329_vm2, %v2838_v11  ;;  %v2623_v16 = vpop.xlane.xlu0 %2622  ;;  %v2508_v11 = vld [vmem:[%s4270_s25 + $0x2c0] sm:$0xff] }
 0x23e   : > { %3271 = vst.msk [vmem:[%s4270_s25 + $0x278] sm:$0xff] %vm329_vm2, %v3175_v34  ;;  %v2764_v55 = vpop.xlane.xlu1 %2763  ;;  %v2839_v10 = vadd.f32 %v2623_v16, %v2455_v53 }
 0x23f   : > { %3224 = vst.msk [vmem:[%s4270_s25 + $0x100] sm:$0xff] %vm329_vm2, %v3128_v32  ;;  %v3033_v13 = vld [vmem:[%s4270_s25 + $0x108] sm:$0xff]  ;;  %v2886_v50 = vadd.f32 %v2764_v55, %v2502_v38 }
 0x240   : > { %v3080_v54 = vld [vmem:[%s4270_s25 + $0x280] sm:$0xff]  ;;  %v3129_v22 = vmul.f32 0.00390625, %v3033_v13  ;;  %2936 = vst.msk [vmem:[%s4270_s25 + $0x118] sm:$0xff] %vm329_vm2, %v2839_v10  ;;  %v2509_v55 = vld [vmem:[%s4270_s25 + $0x2c8] sm:$0xff] }
 0x241   : > { %v3176_v47 = vmul.f32 0.00390625, %v3080_v54  ;;  %2983 = vst.msk [vmem:[%s4270_s25 + $0x290] sm:$0xff] %vm329_vm2, %v2886_v50  ;;  %v2767_v52 = vpop.xlane.xlu0 %2766  ;;  %v2462_v50 = vld [vmem:[%s4270_s25 + $0x150] sm:$0xff] }
 0x242   : > { %3225 = vst.msk [vmem:[%s4270_s25 + $0x108] sm:$0xff] %vm329_vm2, %v3129_v22  ;;  %v2626_v61 = vpop.xlane.xlu1 %2625  ;;  %v2887_v7 = vadd.f32 %v2767_v52, %v2503_v31 }
 0x243   : > { %3272 = vst.msk [vmem:[%s4270_s25 + $0x280] sm:$0xff] %vm329_vm2, %v3176_v47  ;;  %v3081_v57 = vld [vmem:[%s4270_s25 + $0x288] sm:$0xff]  ;;  %v2840_v46 = vadd.f32 %v2626_v61, %v2456_v5  ;;  %v2463_v61 = vld [vmem:[%s4270_s25 + $0x158] sm:$0xff] }
 0x244   : > { %v3034_v63 = vld [vmem:[%s4270_s25 + $0x110] sm:$0xff]  ;;  %v3177_v48 = vmul.f32 0.00390625, %v3081_v57  ;;  %2984 = vst.msk [vmem:[%s4270_s25 + $0x298] sm:$0xff] %vm329_vm2, %v2887_v7 }
 0x245   : > { %v3130_v18 = vmul.f32 0.00390625, %v3034_v63  ;;  %2937 = vst.msk [vmem:[%s4270_s25 + $0x120] sm:$0xff] %vm329_vm2, %v2840_v46  ;;  %v2629_v19 = vpop.xlane.xlu0 %2628  ;;  %v2510_v46 = vld [vmem:[%s4270_s25 + $0x2d0] sm:$0xff] }
 0x246   : > { %3273 = vst.msk [vmem:[%s4270_s25 + $0x288] sm:$0xff] %vm329_vm2, %v3177_v48  ;;  %v2770_v29 = vpop.xlane.xlu1 %2769  ;;  %v2841_v42 = vadd.f32 %v2629_v19, %v2457_v24 }
 0x247   : > { %3226 = vst.msk [vmem:[%s4270_s25 + $0x110] sm:$0xff] %vm329_vm2, %v3130_v18  ;;  %v3035_v60 = vld [vmem:[%s4270_s25 + $0x118] sm:$0xff]  ;;  %v2888_v49 = vadd.f32 %v2770_v29, %v2504_v23 }
 0x248   : > { %v3082_v8 = vld [vmem:[%s4270_s25 + $0x290] sm:$0xff]  ;;  %v3131_v35 = vmul.f32 0.00390625, %v3035_v60  ;;  %2938 = vst.msk [vmem:[%s4270_s25 + $0x128] sm:$0xff] %vm329_vm2, %v2841_v42  ;;  %v2511_v29 = vld [vmem:[%s4270_s25 + $0x2d8] sm:$0xff] }
 0x249   : > { %v3178_v3 = vmul.f32 0.00390625, %v3082_v8  ;;  %2985 = vst.msk [vmem:[%s4270_s25 + $0x2a0] sm:$0xff] %vm329_vm2, %v2888_v49  ;;  %v2773_v43 = vpop.xlane.xlu0 %2772  ;;  %v2464_v49 = vld [vmem:[%s4270_s25 + $0x160] sm:$0xff] }
 0x24a   : > { %3227 = vst.msk [vmem:[%s4270_s25 + $0x118] sm:$0xff] %vm329_vm2, %v3131_v35  ;;  %v2632_v12 = vpop.xlane.xlu1 %2631  ;;  %v2889_v37 = vadd.f32 %v2773_v43, %v2505_v62 }
 0x24b   : > { %3274 = vst.msk [vmem:[%s4270_s25 + $0x290] sm:$0xff] %vm329_vm2, %v3178_v3  ;;  %v3083_v28 = vld [vmem:[%s4270_s25 + $0x298] sm:$0xff]  ;;  %v2842_v4 = vadd.f32 %v2632_v12, %v2458_v20  ;;  %v2465_v12 = vld [vmem:[%s4270_s25 + $0x168] sm:$0xff] }
 0x24c   : > { %v3036_v33 = vld [vmem:[%s4270_s25 + $0x120] sm:$0xff]  ;;  %v3179_v9 = vmul.f32 0.00390625, %v3083_v28  ;;  %2986 = vst.msk [vmem:[%s4270_s25 + $0x2a8] sm:$0xff] %vm329_vm2, %v2889_v37 }
 0x24d   : > { %v3132_v27 = vmul.f32 0.00390625, %v3036_v33  ;;  %2939 = vst.msk [vmem:[%s4270_s25 + $0x130] sm:$0xff] %vm329_vm2, %v2842_v4  ;;  %v2635_v58 = vpop.xlane.xlu0 %2634  ;;  %v2512_v4 = vld [vmem:[%s4270_s25 + $0x2e0] sm:$0xff] }
 0x24e   : > { %3275 = vst.msk [vmem:[%s4270_s25 + $0x298] sm:$0xff] %vm329_vm2, %v3179_v9  ;;  %v2776_v17 = vpop.xlane.xlu1 %2775  ;;  %v2843_v6 = vadd.f32 %v2635_v58, %v2459_v25 }
 0x24f   : > { %3228 = vst.msk [vmem:[%s4270_s25 + $0x120] sm:$0xff] %vm329_vm2, %v3132_v27  ;;  %v3037_v44 = vld [vmem:[%s4270_s25 + $0x128] sm:$0xff]  ;;  %v2890_v45 = vadd.f32 %v2776_v17, %v2506_v59 }
 0x250   : > { %v3084_v15 = vld [vmem:[%s4270_s25 + $0x2a0] sm:$0xff]  ;;  %v3133_v56 = vmul.f32 0.00390625, %v3037_v44  ;;  %2940 = vst.msk [vmem:[%s4270_s25 + $0x138] sm:$0xff] %vm329_vm2, %v2843_v6  ;;  %v2513_v17 = vld [vmem:[%s4270_s25 + $0x2e8] sm:$0xff] }
 0x251   : > { %v3180_v21 = vmul.f32 0.00390625, %v3084_v15  ;;  %2987 = vst.msk [vmem:[%s4270_s25 + $0x2b0] sm:$0xff] %vm329_vm2, %v2890_v45  ;;  %v2779_v30 = vpop.xlane.xlu0 %2778  ;;  %v2466_v45 = vld [vmem:[%s4270_s25 + $0x170] sm:$0xff] }
 0x252   : > { %3229 = vst.msk [vmem:[%s4270_s25 + $0x128] sm:$0xff] %vm329_vm2, %v3133_v56  ;;  %v2638_v2 = vpop.xlane.xlu1 %2637  ;;  %v2891_v40 = vadd.f32 %v2779_v30, %v2507_v1 }
 0x253   : > { %3276 = vst.msk [vmem:[%s4270_s25 + $0x2a0] sm:$0xff] %vm329_vm2, %v3180_v21  ;;  %v3085_v14 = vld [vmem:[%s4270_s25 + $0x2a8] sm:$0xff]  ;;  %v2844_v0 = vadd.f32 %v2638_v2, %v2460_v36  ;;  %v2467_v2 = vld [vmem:[%s4270_s25 + $0x178] sm:$0xff] }
 0x254   : > { %v3038_v39 = vld [vmem:[%s4270_s25 + $0x130] sm:$0xff]  ;;  %v3181_v51 = vmul.f32 0.00390625, %v3085_v14  ;;  %2988 = vst.msk [vmem:[%s4270_s25 + $0x2b8] sm:$0xff] %vm329_vm2, %v2891_v40 }
 0x255   : > { %v3134_v53 = vmul.f32 0.00390625, %v3038_v39  ;;  %2941 = vst.msk [vmem:[%s4270_s25 + $0x140] sm:$0xff] %vm329_vm2, %v2844_v0  ;;  %v2641_v41 = vpop.xlane.xlu0 %2640  ;;  %v2514_v0 = vld [vmem:[%s4270_s25 + $0x2f0] sm:$0xff] }
 0x256   : > { %3277 = vst.msk [vmem:[%s4270_s25 + $0x2a8] sm:$0xff] %vm329_vm2, %v3181_v51  ;;  %v2782_v34 = vpop.xlane.xlu1 %2781  ;;  %v2845_v38 = vadd.f32 %v2641_v41, %v2461_v26 }
 0x257   : > { %3230 = vst.msk [vmem:[%s4270_s25 + $0x130] sm:$0xff] %vm329_vm2, %v3134_v53  ;;  %v3039_v32 = vld [vmem:[%s4270_s25 + $0x138] sm:$0xff]  ;;  %v2892_v16 = vadd.f32 %v2782_v34, %v2508_v11 }
 0x258   : > { %v3086_v10 = vld [vmem:[%s4270_s25 + $0x2b0] sm:$0xff]  ;;  %v3135_v13 = vmul.f32 0.00390625, %v3039_v32  ;;  %2942 = vst.msk [vmem:[%s4270_s25 + $0x148] sm:$0xff] %vm329_vm2, %v2845_v38  ;;  %v2515_v34 = vld [vmem:[%s4270_s25 + $0x2f8] sm:$0xff] }
 0x259   : > { %v3182_v31 = vmul.f32 0.00390625, %v3086_v10  ;;  %2989 = vst.msk [vmem:[%s4270_s25 + $0x2c0] sm:$0xff] %vm329_vm2, %v2892_v16  ;;  %v2785_v54 = vpop.xlane.xlu0 %2784 }
 0x25a   : > { %3231 = vst.msk [vmem:[%s4270_s25 + $0x138] sm:$0xff] %vm329_vm2, %v3135_v13  ;;  %v2644_v22 = vpop.xlane.xlu1 %2643  ;;  %v2893_v5 = vadd.f32 %v2785_v54, %v2509_v55 }
 0x25b   : > { %3278 = vst.msk [vmem:[%s4270_s25 + $0x2b0] sm:$0xff] %vm329_vm2, %v3182_v31  ;;  %v3087_v47 = vld [vmem:[%s4270_s25 + $0x2b8] sm:$0xff]  ;;  %v2846_v52 = vadd.f32 %v2644_v22, %v2462_v50 }
 0x25c   : > { %v3040_v7 = vld [vmem:[%s4270_s25 + $0x140] sm:$0xff]  ;;  %v3183_v57 = vmul.f32 0.00390625, %v3087_v47  ;;  %2990 = vst.msk [vmem:[%s4270_s25 + $0x2c8] sm:$0xff] %vm329_vm2, %v2893_v5 }
 0x25d   : > { %v3136_v24 = vmul.f32 0.00390625, %v3040_v7  ;;  %2943 = vst.msk [vmem:[%s4270_s25 + $0x150] sm:$0xff] %vm329_vm2, %v2846_v52  ;;  %v2647_v63 = vpop.xlane.xlu0 %2646 }
 0x25e   : > { %3279 = vst.msk [vmem:[%s4270_s25 + $0x2b8] sm:$0xff] %vm329_vm2, %v3183_v57  ;;  %v2788_v48 = vpop.xlane.xlu1 %2787  ;;  %v2847_v23 = vadd.f32 %v2647_v63, %v2463_v61 }
 0x25f   : > { %3232 = vst.msk [vmem:[%s4270_s25 + $0x140] sm:$0xff] %vm329_vm2, %v3136_v24  ;;  %v3041_v18 = vld [vmem:[%s4270_s25 + $0x148] sm:$0xff]  ;;  %v2894_v19 = vadd.f32 %v2788_v48, %v2510_v46 }
 0x260   : > { %v3088_v42 = vld [vmem:[%s4270_s25 + $0x2c0] sm:$0xff]  ;;  %v3137_v60 = vmul.f32 0.00390625, %v3041_v18  ;;  %2944 = vst.msk [vmem:[%s4270_s25 + $0x158] sm:$0xff] %vm329_vm2, %v2847_v23 }
 0x261   : > { %v3184_v62 = vmul.f32 0.00390625, %v3088_v42  ;;  %2991 = vst.msk [vmem:[%s4270_s25 + $0x2d0] sm:$0xff] %vm329_vm2, %v2894_v19  ;;  %v2791_v8 = vpop.xlane.xlu0 %2790 }
 0x262   : > { %3233 = vst.msk [vmem:[%s4270_s25 + $0x148] sm:$0xff] %vm329_vm2, %v3137_v60  ;;  %v2650_v35 = vpop.xlane.xlu1 %2649  ;;  %v2895_v20 = vadd.f32 %v2791_v8, %v2511_v29 }
 0x263   : > { %3280 = vst.msk [vmem:[%s4270_s25 + $0x2c0] sm:$0xff] %vm329_vm2, %v3184_v62  ;;  %v3089_v3 = vld [vmem:[%s4270_s25 + $0x2c8] sm:$0xff]  ;;  %v2848_v43 = vadd.f32 %v2650_v35, %v2464_v49 }
 0x264   : > { %v3042_v37 = vld [vmem:[%s4270_s25 + $0x150] sm:$0xff]  ;;  %v3185_v28 = vmul.f32 0.00390625, %v3089_v3  ;;  %2992 = vst.msk [vmem:[%s4270_s25 + $0x2d8] sm:$0xff] %vm329_vm2, %v2895_v20 }
 0x265   : > { %v3138_v25 = vmul.f32 0.00390625, %v3042_v37  ;;  %2945 = vst.msk [vmem:[%s4270_s25 + $0x160] sm:$0xff] %vm329_vm2, %v2848_v43  ;;  %v2653_v33 = vpop.xlane.xlu0 %2652 }
 0x266   : > { %3281 = vst.msk [vmem:[%s4270_s25 + $0x2c8] sm:$0xff] %vm329_vm2, %v3185_v28  ;;  %v2794_v9 = vpop.xlane.xlu1 %2793  ;;  %v2849_v59 = vadd.f32 %v2653_v33, %v2465_v12 }
 0x267   : > { %3234 = vst.msk [vmem:[%s4270_s25 + $0x150] sm:$0xff] %vm329_vm2, %v3138_v25  ;;  %v3043_v27 = vld [vmem:[%s4270_s25 + $0x158] sm:$0xff]  ;;  %v2896_v58 = vadd.f32 %v2794_v9, %v2512_v4 }
 0x268   : > { %v3090_v6 = vld [vmem:[%s4270_s25 + $0x2d0] sm:$0xff]  ;;  %v3139_v44 = vmul.f32 0.00390625, %v3043_v27  ;;  %2946 = vst.msk [vmem:[%s4270_s25 + $0x168] sm:$0xff] %vm329_vm2, %v2849_v59 }
 0x269   : > { %v3186_v1 = vmul.f32 0.00390625, %v3090_v6  ;;  %2993 = vst.msk [vmem:[%s4270_s25 + $0x2e0] sm:$0xff] %vm329_vm2, %v2896_v58  ;;  %v2797_v15 = vpop.xlane.xlu0 %2796 }
 0x26a   : > { %3235 = vst.msk [vmem:[%s4270_s25 + $0x158] sm:$0xff] %vm329_vm2, %v3139_v44  ;;  %v2656_v56 = vpop.xlane.xlu1 %2655  ;;  %v2897_v36 = vadd.f32 %v2797_v15, %v2513_v17 }
 0x26b   : > { %3282 = vst.msk [vmem:[%s4270_s25 + $0x2d0] sm:$0xff] %vm329_vm2, %v3186_v1  ;;  %v3091_v21 = vld [vmem:[%s4270_s25 + $0x2d8] sm:$0xff]  ;;  %v2850_v30 = vadd.f32 %v2656_v56, %v2466_v45 }
 0x26c   : > { %v3044_v40 = vld [vmem:[%s4270_s25 + $0x160] sm:$0xff]  ;;  %v3187_v14 = vmul.f32 0.00390625, %v3091_v21  ;;  %2994 = vst.msk [vmem:[%s4270_s25 + $0x2e8] sm:$0xff] %vm329_vm2, %v2897_v36 }
 0x26d   : > { %v3140_v26 = vmul.f32 0.00390625, %v3044_v40  ;;  %2947 = vst.msk [vmem:[%s4270_s25 + $0x170] sm:$0xff] %vm329_vm2, %v2850_v30  ;;  %v2659_v39 = vpop.xlane.xlu0 %2658 }
 0x26e   : > { %3283 = vst.msk [vmem:[%s4270_s25 + $0x2d8] sm:$0xff] %vm329_vm2, %v3187_v14  ;;  %v2800_v51 = vpop.xlane.xlu1 %2799  ;;  %v2851_v11 = vadd.f32 %v2659_v39, %v2467_v2 }
 0x26f   : > { %3236 = vst.msk [vmem:[%s4270_s25 + $0x160] sm:$0xff] %vm329_vm2, %v3140_v26  ;;  %v3045_v53 = vld [vmem:[%s4270_s25 + $0x168] sm:$0xff]  ;;  %v2898_v41 = vadd.f32 %v2800_v51, %v2514_v0 }
 0x270   : > { %v3092_v38 = vld [vmem:[%s4270_s25 + $0x2e0] sm:$0xff]  ;;  %v3141_v32 = vmul.f32 0.00390625, %v3045_v53  ;;  %2948 = vst.msk [vmem:[%s4270_s25 + $0x178] sm:$0xff] %vm329_vm2, %v2851_v11 }
 0x271   : > { %v3188_v16 = vmul.f32 0.00390625, %v3092_v38  ;;  %2995 = vst.msk [vmem:[%s4270_s25 + $0x2f0] sm:$0xff] %vm329_vm2, %v2898_v41  ;;  %v2803_v55 = vpop.xlane.xlu0 %2802 }
 0x272   : > { %3237 = vst.msk [vmem:[%s4270_s25 + $0x168] sm:$0xff] %vm329_vm2, %v3141_v32  ;;  %v2899_v10 = vadd.f32 %v2803_v55, %v2515_v34 }
 0x273   : > { %3284 = vst.msk [vmem:[%s4270_s25 + $0x2e0] sm:$0xff] %vm329_vm2, %v3188_v16  ;;  %v3093_v13 = vld [vmem:[%s4270_s25 + $0x2e8] sm:$0xff] }
 0x274   : > { %v3046_v50 = vld [vmem:[%s4270_s25 + $0x170] sm:$0xff]  ;;  %v3189_v31 = vmul.f32 0.00390625, %v3093_v13  ;;  %2996 = vst.msk [vmem:[%s4270_s25 + $0x2f8] sm:$0xff] %vm329_vm2, %v2899_v10 }
 0x275   : > { %v3142_v54 = vmul.f32 0.00390625, %v3046_v50 }
 0x276   : > { %3285 = vst.msk [vmem:[%s4270_s25 + $0x2e8] sm:$0xff] %vm329_vm2, %v3189_v31 }
 0x277   : > { %3238 = vst.msk [vmem:[%s4270_s25 + $0x170] sm:$0xff] %vm329_vm2, %v3142_v54  ;;  %v3047_v22 = vld [vmem:[%s4270_s25 + $0x178] sm:$0xff] }
 0x278   : > { %v3094_v5 = vld [vmem:[%s4270_s25 + $0x2f0] sm:$0xff]  ;;  %v3143_v47 = vmul.f32 0.00390625, %v3047_v22 }
 0x279   : > { %v3190_v52 = vmul.f32 0.00390625, %v3094_v5 }
 0x27a   : > { %3239 = vst.msk [vmem:[%s4270_s25 + $0x178] sm:$0xff] %vm329_vm2, %v3143_v47 }
 0x27b   : > { %3286 = vst.msk [vmem:[%s4270_s25 + $0x2f0] sm:$0xff] %vm329_vm2, %v3190_v52  ;;  %v3095_v61 = vld [vmem:[%s4270_s25 + $0x2f8] sm:$0xff] }
 0x27c   : > { %v3191_v7 = vmul.f32 0.00390625, %v3095_v61 }
 0x27e   : > { %3287 = vst.msk [vmem:[%s4270_s25 + $0x2f8] sm:$0xff] %vm329_vm2, %v3191_v7 }
 0x27f PF: > { %s15_s19 = sadd.s32 1, %s3674_s19   ;;  %s5746_s15 = smov %s3666_s17 }
 0x280   : > { %p12_p7 = scmp.ge.s32.totalorder %s15_s19, 6   ;;  %s5747_s16 = smov %s3670_s18 }
 0x281   : > { %s5748_s17 = smov %s5751_s20  ;;  %s5749_s18 = smov %s5755_s21 }
 0x282   :  { %14 = sbr.rel (!%p12_p7) target bundleno = 3 (0x3), region = 88 }

</bundles_post_ra>
